<compile_context>
chip_gen: v7x
topology: tpu7x:2x2x1
jax: 0.10.0
libtpu: 0.0.40
codegen_flags: <defaults>
</compile_context>

<pallas_src>
import functools
import math

import jax
import jax.numpy as jnp
from jax.experimental import pallas as pl
from jax.experimental.pallas import tpu as pltpu


# ----------------------------------------------------------------------------
# Fused PedETA kernel.  One grid step = one batch block of BB rows.
# Layout inside the block is time-major-flattened: row = t*BB + b_local.
# ----------------------------------------------------------------------------
def _pedeta_kernel(x_ref, cw_ref, cb_ref,
                   w1_ref, b1_ref, w2_ref, b2_ref,
                   lg_ref, lb_ref,
                   wie_ref, whe_ref, be_ref,
                   wid_ref, whd_ref, bd_ref,
                   wt0_ref, bt0_ref, wt1_ref, bt1_ref,
                   out_ref,
                   gx_buf, seq_buf,
                   *, T, BB, D, H, GP, O, horizon):
    f32 = jnp.float32
    slope = 0.01                      # F.leaky_relu default negative_slope
    n_dec = horizon - 1
    TB = T * BB

    # ------------- time-parallel pre-pass -----------------------------------
    # Conv1d(kernel=5, padding=2) + residual as ONE im2col matmul.
    xi = x_ref[...]                                  # (T*BB, 5D), residual tap first
    x = xi[:, 0:D]                                   # un-shifted rows (lane-aligned)
    xr = jnp.dot(xi, cw_ref[...], preferred_element_type=f32) + cb_ref[...] + x

    # tvll1 -> tvll2 -> leaky_relu + residual
    y = jnp.dot(xr, w1_ref[...], preferred_element_type=f32) + b1_ref[...]
    z = jnp.dot(y, w2_ref[...], preferred_element_type=f32) + b2_ref[...]
    y = jnp.where(z > 0, z, slope * z) + y

    # LNembd (eps = 1e-5).  Dropout == identity (eval mode).
    mean = jnp.mean(y, axis=-1, keepdims=True)
    var = jnp.mean((y - mean) * (y - mean), axis=-1, keepdims=True)
    y_ln = (y - mean) * jax.lax.rsqrt(var + 1e-5) * lg_ref[...] + lb_ref[...]

    # Encoder input projection hoisted out of the recurrence: one big matmul.
    gx_buf[...] = (jnp.dot(y_ln, wie_ref[...], preferred_element_type=f32)
                   + be_ref[...])

    whe = whe_ref[...]                               # (H, 4*GP), gate-lane-padded
    wdec = wid_ref[...] + whd_ref[...]               # decoder input == hidden state
    bdec = bd_ref[...]
    wt0 = wt0_ref[...]
    bt0 = bt0_ref[...]
    wt1 = wt1_ref[...]
    bt1 = bt1_ref[...]

    def lstm_cell(g, c):
        # Gate blocks start at multiples of GP (a multiple of 128): lane-aligned.
        i_g = jax.nn.sigmoid(g[:, 0:H])
        f_g = jax.nn.sigmoid(g[:, GP:GP + H])
        g_g = jnp.tanh(g[:, 2 * GP:2 * GP + H])
        o_g = jax.nn.sigmoid(g[:, 3 * GP:3 * GP + H])
        c = f_g * c + i_g * g_g
        h = o_g * jnp.tanh(c)
        return h, c

    def head(rows):
        z = jnp.dot(rows, wt0, preferred_element_type=f32) + bt0
        z = jnp.where(z > 0, z, slope * z) + rows
        return (jnp.dot(z, wt1, preferred_element_type=f32)
                + bt1).astype(out_ref.dtype)

    # ------------- encoder LSTM recurrence (only h @ W_hh per step) ----------
    def enc_step(t, carry):
        h, c = carry
        row = pl.multiple_of(t * BB, 8)
        g = gx_buf[pl.ds(row, BB), :] + jnp.dot(h, whe,
                                                preferred_element_type=f32)
        h, c = lstm_cell(g, c)
        seq_buf[pl.ds(row, BB), :] = h
        return h, c

    h0 = jnp.zeros((BB, H), f32)
    c0 = jnp.zeros((BB, H), f32)
    h, c = jax.lax.fori_loop(0, T, enc_step, (h0, c0), unroll=min(T, 8))

    # ------------- decoder LSTM + interleaved encoder output head ------------
    # The decoder chain is latency-bound; fill its idle MXU/VPU slots with the
    # output head for the already-finished encoder rows, one chunk per step.
    chunk_t = -(-T // n_dec)                         # ceil(T / n_dec) time steps

    def dec_step(i, carry):
        h, c = carry
        g = jnp.dot(h, wdec, preferred_element_type=f32) + bdec
        h, c = lstm_cell(g, c)
        row = pl.multiple_of((T + i) * BB, 8)
        seq_buf[pl.ds(row, BB), :] = h
        # Output head for one chunk of encoder rows (clamped; overlap rewrites
        # identical values, so coverage of [0, T) is exact).
        t0 = jnp.minimum(i * chunk_t, T - chunk_t)
        r0 = pl.multiple_of(t0 * BB, 8)
        rows = seq_buf[pl.ds(r0, chunk_t * BB), :]
        out_ref[pl.ds(r0, chunk_t * BB), :] = head(rows)
        return h, c

    jax.lax.fori_loop(0, n_dec, dec_step, (h, c), unroll=min(n_dec, 8))

    # ------------- output head for the decoder rows --------------------------
    rows = seq_buf[pl.ds(TB, n_dec * BB), :]
    out_ref[pl.ds(TB, n_dec * BB), :] = head(rows)


def _rep_spec(shape):
    zeros = (0,) * len(shape)
    return pl.BlockSpec(shape, lambda b, _z=zeros: _z)


def _vmem_tile_bytes(shape, itemsize=4):
    r = 1
    for s in shape[:-1]:
        r *= int(s)
    c = int(shape[-1])
    return (-(-r // 8) * 8) * (-(-c // 128) * 128) * itemsize


# ----------------------------------------------------------------------------
# Public wrapper: accepts batch_first x (B, T, D), PyTorch-shaped params.
# ----------------------------------------------------------------------------
def pedeta_forward(params, x, horizon):
    assert horizon >= 2, "PedETA forward requires horizon >= 2 (as in PyTorch)"
    B, T, D = x.shape
    H = params["tvll1_w"].shape[0]
    O = params["transform1_w"].shape[0]
    n_dec = horizon - 1
    Ttot = T + n_dec

    BB = 8                                         # batch rows per grid step
    Bp = -(-B // BB) * BB                          # batch padded to multiple of 8
    nb = Bp // BB                                  # grid size (parallel on v7x)
    GP = -(-H // 128) * 128                        # lane-padded per-gate width

    f32 = jnp.float32
    x = x.astype(f32)

    # im2col slab: time-major, zero-padded batch and time edges, residual tap
    # (k=2) placed FIRST so the in-kernel residual extract is lane-aligned at 0.
    x_tm = jnp.transpose(x, (1, 0, 2))                        # (T, B, D)
    x_tm = jnp.pad(x_tm, ((2, 2), (0, Bp - B), (0, 0)))       # (T+4, Bp, D)
    tap_order = (2, 0, 1, 3, 4)
    x_i2c = jnp.concatenate([x_tm[k:k + T] for k in tap_order], axis=-1)
    x_i2c = (x_i2c.reshape(T, nb, BB, 5 * D)
                   .transpose(1, 0, 2, 3)
                   .reshape(nb, T * BB, 5 * D))               # row = t*BB + b_local

    # Conv weight flattened to (5D, D), rows ordered to match tap_order.
    cw = jnp.stack([params["conv1_w"][:, :, k].T for k in tap_order], axis=0)
    cw = cw.reshape(5 * D, D).astype(f32)

    def pad_gates_w(wt):                                       # (in, 4H) -> (in, 4GP)
        wt = wt.astype(f32)
        if GP == H:
            return wt
        return jnp.concatenate(
            [jnp.pad(wt[:, k * H:(k + 1) * H], ((0, 0), (0, GP - H)))
             for k in range(4)], axis=1)

    def pad_gates_b(b):                                        # (4H,) -> (1, 4GP)
        b = b.astype(f32)
        if GP == H:
            return b[None, :]
        return jnp.concatenate(
            [jnp.pad(b[k * H:(k + 1) * H], (0, GP - H)) for k in range(4)],
            axis=0)[None, :]

    args = (
        x_i2c,
        cw, params["conv1_b"][None, :].astype(f32),
        params["tvll1_w"].T.astype(f32), params["tvll1_b"][None, :].astype(f32),
        params["tvll2_w"].T.astype(f32), params["tvll2_b"][None, :].astype(f32),
        params["LNembd_w"][None, :].astype(f32), params["LNembd_b"][None, :].astype(f32),
        pad_gates_w(params["enc_w_ih"].T), pad_gates_w(params["enc_w_hh"].T),
        pad_gates_b(params["enc_b_ih"] + params["enc_b_hh"]),
        pad_gates_w(params["dec_w_ih"].T), pad_gates_w(params["dec_w_hh"].T),
        pad_gates_b(params["dec_b_ih"] + params["dec_b_hh"]),
        params["transform0_w"].T.astype(f32), params["transform0_b"][None, :].astype(f32),
        params["transform1_w"].T.astype(f32), params["transform1_b"][None, :].astype(f32),
    )

    # Explicit scoped-VMEM request (review: v7x has 64 MiB physical / 32 default).
    scratch_bytes = (_vmem_tile_bytes((T * BB, 4 * GP))
                     + _vmem_tile_bytes((Ttot * BB, H)))
    io_bytes = 2 * (_vmem_tile_bytes((T * BB, 5 * D))
                    + _vmem_tile_bytes((Ttot * BB, O)))
    w_bytes = 2 * sum(_vmem_tile_bytes(a.shape) for a in args[1:])
    vmem_limit = int(min(max(scratch_bytes + io_bytes + w_bytes + (4 << 20),
                             16 << 20), 128 << 20))

    kernel = functools.partial(_pedeta_kernel, T=T, BB=BB, D=D, H=H, GP=GP,
                               O=O, horizon=horizon)

    out = pl.pallas_call(
        kernel,
        out_shape=jax.ShapeDtypeStruct((nb, Ttot * BB, O), jnp.float32),
        grid_spec=pltpu.PrefetchScalarGridSpec(
            num_scalar_prefetch=0,
            grid=(nb,),
            in_specs=[pl.BlockSpec((None, T * BB, 5 * D), lambda b: (b, 0, 0))]
                     + [_rep_spec(a.shape) for a in args[1:]],
            out_specs=pl.BlockSpec((None, Ttot * BB, O), lambda b: (b, 0, 0)),
            scratch_shapes=[
                pltpu.VMEM((T * BB, 4 * GP), jnp.float32),   # hoisted enc gate inputs
                pltpu.VMEM((Ttot * BB, H), jnp.float32),     # enc + dec hidden sequence
            ],
        ),
        compiler_params=pltpu.CompilerParams(
            dimension_semantics=("parallel",),               # batch blocks -> 2 TCs on v7x
            vmem_limit_bytes=vmem_limit),
    )(*args)

    # (nb, Ttot*BB, O) -> (Bp, Ttot, O) -> drop batch padding
    out = out.reshape(nb, Ttot, BB, O).transpose(0, 2, 1, 3).reshape(Bp, Ttot, O)
    return out[:B]


# ----------------------------------------------------------------------------
# Pure-JAX reference (mirrors the PyTorch forward).
# ----------------------------------------------------------------------------
def _reference_forward(params, x, horizon):
    B, T, D = x.shape
    H = params["tvll1_w"].shape[0]
    x = x.astype(jnp.float32)

    w = params["conv1_w"]                                        # (Dout, Din, 5)
    xp = jnp.pad(x, ((0, 0), (2, 2), (0, 0)))
    conv = jnp.zeros((B, T, D), jnp.float32)
    for k in range(5):
        conv = conv + jnp.einsum("bti,oi->bto", xp[:, k:k + T, :], w[:, :, k])
    x = conv + params["conv1_b"][None, None, :] + x

    y = x @ params["tvll1_w"].T + params["tvll1_b"]
    z = y @ params["tvll2_w"].T + params["tvll2_b"]
    y = jnp.where(z > 0, z, 0.01 * z) + y

    mean = jnp.mean(y, -1, keepdims=True)
    var = jnp.mean((y - mean) ** 2, -1, keepdims=True)
    y = (y - mean) / jnp.sqrt(var + 1e-5) * params["LNembd_w"] + params["LNembd_b"]

    def lstm(seq, w_ih, w_hh, b_ih, b_hh, h, c):
        outs = []
        for t in range(seq.shape[1]):
            g = seq[:, t, :] @ w_ih.T + h @ w_hh.T + b_ih + b_hh
            i_g = jax.nn.sigmoid(g[:, 0:H]); f_g = jax.nn.sigmoid(g[:, H:2 * H])
            g_g = jnp.tanh(g[:, 2 * H:3 * H]); o_g = jax.nn.sigmoid(g[:, 3 * H:4 * H])
            c = f_g * c + i_g * g_g
            h = o_g * jnp.tanh(c)
            outs.append(h)
        return jnp.stack(outs, 1), h, c

    h0 = jnp.zeros((B, H), jnp.float32)
    c0 = jnp.zeros((B, H), jnp.float32)
    enc_out, h, c = lstm(y, params["enc_w_ih"], params["enc_w_hh"],
                         params["enc_b_ih"], params["enc_b_hh"], h0, c0)

    tok = enc_out[:, -1:, :]
    dec_outs = []
    for _ in range(1, horizon):
        tok, h, c = lstm(tok, params["dec_w_ih"], params["dec_w_hh"],
                         params["dec_b_ih"], params["dec_b_hh"], h, c)
        dec_outs.append(tok)
    out = jnp.concatenate([enc_out] + dec_outs, axis=1)

    z = out @ params["transform0_w"].T + params["transform0_b"]
    out = jnp.where(z > 0, z, 0.01 * z) + out
    return out @ params["transform1_w"].T + params["transform1_b"]


# ----------------------------------------------------------------------------
# Deterministic PyTorch-style parameter init.
# ----------------------------------------------------------------------------
def init_params(key, input_size, hidden_size, output_size):
    D, H, O = input_size, hidden_size, output_size

    def uni(k, shape, bound):
        return jax.random.uniform(k, shape, minval=-bound, maxval=bound,
                                  dtype=jnp.float32)

    ks = jax.random.split(key, 18)
    b_conv = 1.0 / math.sqrt(D * 5)
    b_d = 1.0 / math.sqrt(D)
    b_h = 1.0 / math.sqrt(H)
    return {
        "conv1_w": uni(ks[0], (D, D, 5), b_conv),
        "conv1_b": uni(ks[1], (D,), b_conv),
        "tvll1_w": uni(ks[2], (H, D), b_d),
        "tvll1_b": uni(ks[3], (H,), b_d),
        "tvll2_w": uni(ks[4], (H, H), b_h),
        "tvll2_b": uni(ks[5], (H,), b_h),
        "LNembd_w": jnp.ones((H,), jnp.float32),
        "LNembd_b": jnp.zeros((H,), jnp.float32),
        "enc_w_ih": uni(ks[6], (4 * H, H), b_h),
        "enc_w_hh": uni(ks[7], (4 * H, H), b_h),
        "enc_b_ih": uni(ks[8], (4 * H,), b_h),
        "enc_b_hh": uni(ks[9], (4 * H,), b_h),
        "dec_w_ih": uni(ks[10], (4 * H, H), b_h),
        "dec_w_hh": uni(ks[11], (4 * H, H), b_h),
        "dec_b_ih": uni(ks[12], (4 * H,), b_h),
        "dec_b_hh": uni(ks[13], (4 * H,), b_h),
        "transform0_w": uni(ks[14], (H, H), b_h),
        "transform0_b": uni(ks[15], (H,), b_h),
        "transform1_w": uni(ks[16], (O, H), b_h),
        "transform1_b": uni(ks[17], (O,), b_h),
    }


if __name__ == "__main__":
    B, T = 2, 8
    INPUT, HIDDEN, OUTPUT, HORIZON = 8, 32, 4, 4

    key = jax.random.PRNGKey(0)
    kx, kp = jax.random.split(key)
    x = jax.random.normal(kx, (B, T, INPUT), dtype=jnp.float32)
    params = init_params(kp, INPUT, HIDDEN, OUTPUT)

    out = pedeta_forward(params, x, HORIZON)
    out = jax.block_until_ready(out)

    with jax.default_matmul_precision("highest"):
        ref = _reference_forward(params, x, HORIZON)
    ref = jax.block_until_ready(ref)

    assert out.shape == (B, T + HORIZON - 1, OUTPUT)
    max_err = float(jnp.max(jnp.abs(out - ref)))
    assert jnp.allclose(out, ref, atol=1e-4, rtol=1e-4), max_err

    print("KERNEL_OK")
</pallas_src>

<mosaic_0001>
module attributes {stable_mosaic.version = 11 : i64} {
  func.func @_pedeta_kernel(%arg0: i32, %arg1: memref<1x64x40xf32, #tpu.memory_space<vmem>>, %arg2: memref<40x8xf32, #tpu.memory_space<vmem>>, %arg3: memref<1x8xf32, #tpu.memory_space<vmem>>, %arg4: memref<8x32xf32, #tpu.memory_space<vmem>>, %arg5: memref<1x32xf32, #tpu.memory_space<vmem>>, %arg6: memref<32x32xf32, #tpu.memory_space<vmem>>, %arg7: memref<1x32xf32, #tpu.memory_space<vmem>>, %arg8: memref<1x32xf32, #tpu.memory_space<vmem>>, %arg9: memref<1x32xf32, #tpu.memory_space<vmem>>, %arg10: memref<32x512xf32, #tpu.memory_space<vmem>>, %arg11: memref<32x512xf32, #tpu.memory_space<vmem>>, %arg12: memref<1x512xf32, #tpu.memory_space<vmem>>, %arg13: memref<32x512xf32, #tpu.memory_space<vmem>>, %arg14: memref<32x512xf32, #tpu.memory_space<vmem>>, %arg15: memref<1x512xf32, #tpu.memory_space<vmem>>, %arg16: memref<32x32xf32, #tpu.memory_space<vmem>>, %arg17: memref<1x32xf32, #tpu.memory_space<vmem>>, %arg18: memref<32x4xf32, #tpu.memory_space<vmem>>, %arg19: memref<1x4xf32, #tpu.memory_space<vmem>>, %arg20: memref<1x88x4xf32, #tpu.memory_space<vmem>>, %arg21: memref<64x512xf32, #tpu.memory_space<vmem>>, %arg22: memref<88x32xf32, #tpu.memory_space<vmem>>) attributes {dimension_semantics = [#tpu.dimension_semantics<parallel>], iteration_bounds = array<i64: 1>, scalar_prefetch = 0 : i64, scratch_operands = 2 : i64, tpu.core_type = #tpu.core_type<tc>, window_params = [{transform_indices = @transform_0, window_bounds = array<i64: 1, 64, 40>}, {pipeline_mode = #tpu.pipeline_mode<synchronous>, transform_indices = @transform_1, window_bounds = array<i64: 40, 8>}, {pipeline_mode = #tpu.pipeline_mode<synchronous>, transform_indices = @transform_2, window_bounds = array<i64: 1, 8>}, {pipeline_mode = #tpu.pipeline_mode<synchronous>, transform_indices = @transform_3, window_bounds = array<i64: 8, 32>}, {pipeline_mode = #tpu.pipeline_mode<synchronous>, transform_indices = @transform_4, window_bounds = array<i64: 1, 32>}, {pipeline_mode = #tpu.pipeline_mode<synchronous>, transform_indices = @transform_5, window_bounds = array<i64: 32, 32>}, {pipeline_mode = #tpu.pipeline_mode<synchronous>, transform_indices = @transform_6, window_bounds = array<i64: 1, 32>}, {pipeline_mode = #tpu.pipeline_mode<synchronous>, transform_indices = @transform_7, window_bounds = array<i64: 1, 32>}, {pipeline_mode = #tpu.pipeline_mode<synchronous>, transform_indices = @transform_8, window_bounds = array<i64: 1, 32>}, {pipeline_mode = #tpu.pipeline_mode<synchronous>, transform_indices = @transform_9, window_bounds = array<i64: 32, 512>}, {pipeline_mode = #tpu.pipeline_mode<synchronous>, transform_indices = @transform_10, window_bounds = array<i64: 32, 512>}, {pipeline_mode = #tpu.pipeline_mode<synchronous>, transform_indices = @transform_11, window_bounds = array<i64: 1, 512>}, {pipeline_mode = #tpu.pipeline_mode<synchronous>, transform_indices = @transform_12, window_bounds = array<i64: 32, 512>}, {pipeline_mode = #tpu.pipeline_mode<synchronous>, transform_indices = @transform_13, window_bounds = array<i64: 32, 512>}, {pipeline_mode = #tpu.pipeline_mode<synchronous>, transform_indices = @transform_14, window_bounds = array<i64: 1, 512>}, {pipeline_mode = #tpu.pipeline_mode<synchronous>, transform_indices = @transform_15, window_bounds = array<i64: 32, 32>}, {pipeline_mode = #tpu.pipeline_mode<synchronous>, transform_indices = @transform_16, window_bounds = array<i64: 1, 32>}, {pipeline_mode = #tpu.pipeline_mode<synchronous>, transform_indices = @transform_17, window_bounds = array<i64: 32, 4>}, {pipeline_mode = #tpu.pipeline_mode<synchronous>, transform_indices = @transform_18, window_bounds = array<i64: 1, 4>}, {transform_indices = @transform_19, window_bounds = array<i64: 1, 88, 4>}]} {
    %c0 = arith.constant 0 : index
    %c0_0 = arith.constant 0 : index
    %c0_1 = arith.constant 0 : index
    %0 = vector.load %arg1[%c0, %c0_0, %c0_1] : memref<1x64x40xf32, #tpu.memory_space<vmem>>, vector<1x64x40xf32>
    %1 = vector.shape_cast %0 : vector<1x64x40xf32> to vector<64x40xf32>
    %2 = vector.extract_strided_slice %1 {offsets = [0, 0], sizes = [64, 8], strides = [1, 1]} : vector<64x40xf32> to vector<64x8xf32>
    %c0_2 = arith.constant 0 : index
    %c0_3 = arith.constant 0 : index
    %3 = vector.load %arg2[%c0_2, %c0_3] : memref<40x8xf32, #tpu.memory_space<vmem>>, vector<40x8xf32>
    %cst = arith.constant dense<0.000000e+00> : vector<64x8xf32>
    %4 = tpu.matmul %1, %3, %cst {dimension_numbers = #tpu.dot_dimension_numbers<[1], [0], [0], [1], [0, 0, 1, 1], [], []>} : vector<64x40xf32>, vector<40x8xf32>, vector<64x8xf32> -> vector<64x8xf32>
    %c0_4 = arith.constant 0 : index
    %c0_5 = arith.constant 0 : index
    %5 = vector.load %arg3[%c0_4, %c0_5] : memref<1x8xf32, #tpu.memory_space<vmem>>, vector<1x8xf32>
    %6 = vector.broadcast %5 : vector<1x8xf32> to vector<64x8xf32>
    %7 = arith.addf %4, %6 : vector<64x8xf32>
    %8 = arith.addf %7, %2 : vector<64x8xf32>
    %c0_6 = arith.constant 0 : index
    %c0_7 = arith.constant 0 : index
    %9 = vector.load %arg4[%c0_6, %c0_7] : memref<8x32xf32, #tpu.memory_space<vmem>>, vector<8x32xf32>
    %cst_8 = arith.constant dense<0.000000e+00> : vector<64x32xf32>
    %10 = tpu.matmul %8, %9, %cst_8 {dimension_numbers = #tpu.dot_dimension_numbers<[1], [0], [0], [1], [0, 0, 1, 1], [], []>} : vector<64x8xf32>, vector<8x32xf32>, vector<64x32xf32> -> vector<64x32xf32>
    %c0_9 = arith.constant 0 : index
    %c0_10 = arith.constant 0 : index
    %11 = vector.load %arg5[%c0_9, %c0_10] : memref<1x32xf32, #tpu.memory_space<vmem>>, vector<1x32xf32>
    %12 = vector.broadcast %11 : vector<1x32xf32> to vector<64x32xf32>
    %13 = arith.addf %10, %12 : vector<64x32xf32>
    %c0_11 = arith.constant 0 : index
    %c0_12 = arith.constant 0 : index
    %14 = vector.load %arg6[%c0_11, %c0_12] : memref<32x32xf32, #tpu.memory_space<vmem>>, vector<32x32xf32>
    %cst_13 = arith.constant dense<0.000000e+00> : vector<64x32xf32>
    %15 = tpu.matmul %13, %14, %cst_13 {dimension_numbers = #tpu.dot_dimension_numbers<[1], [0], [0], [1], [0, 0, 1, 1], [], []>} : vector<64x32xf32>, vector<32x32xf32>, vector<64x32xf32> -> vector<64x32xf32>
    %c0_14 = arith.constant 0 : index
    %c0_15 = arith.constant 0 : index
    %16 = vector.load %arg7[%c0_14, %c0_15] : memref<1x32xf32, #tpu.memory_space<vmem>>, vector<1x32xf32>
    %17 = vector.broadcast %16 : vector<1x32xf32> to vector<64x32xf32>
    %18 = arith.addf %15, %17 : vector<64x32xf32>
    %cst_16 = arith.constant 0.000000e+00 : f32
    %19 = vector.broadcast %cst_16 : f32 to vector<64x32xf32>
    %20 = arith.cmpf ogt, %18, %19 : vector<64x32xf32>
    %cst_17 = arith.constant 0.00999999977 : f32
    %21 = vector.broadcast %cst_17 : f32 to vector<64x32xf32>
    %22 = arith.mulf %21, %18 : vector<64x32xf32>
    %23 = arith.select %20, %18, %22 : vector<64x32xi1>, vector<64x32xf32>
    %24 = arith.addf %23, %13 : vector<64x32xf32>
    %cst_18 = arith.constant dense<0.000000e+00> : vector<64xf32>
    %25 = vector.multi_reduction <add>, %24, %cst_18 [1] : vector<64x32xf32> to vector<64xf32>
    %26 = vector.shape_cast %25 : vector<64xf32> to vector<64x1xf32>
    %cst_19 = arith.constant 3.200000e+01 : f32
    %27 = vector.broadcast %cst_19 : f32 to vector<64x1xf32>
    %28 = arith.divf %26, %27 : vector<64x1xf32>
    %29 = vector.broadcast %28 : vector<64x1xf32> to vector<64x32xf32>
    %30 = arith.subf %24, %29 : vector<64x32xf32>
    %31 = vector.broadcast %28 : vector<64x1xf32> to vector<64x32xf32>
    %32 = arith.subf %24, %31 : vector<64x32xf32>
    %33 = arith.mulf %30, %32 : vector<64x32xf32>
    %cst_20 = arith.constant dense<0.000000e+00> : vector<64xf32>
    %34 = vector.multi_reduction <add>, %33, %cst_20 [1] : vector<64x32xf32> to vector<64xf32>
    %35 = vector.shape_cast %34 : vector<64xf32> to vector<64x1xf32>
    %cst_21 = arith.constant 3.200000e+01 : f32
    %36 = vector.broadcast %cst_21 : f32 to vector<64x1xf32>
    %37 = arith.divf %35, %36 : vector<64x1xf32>
    %38 = vector.broadcast %28 : vector<64x1xf32> to vector<64x32xf32>
    %39 = arith.subf %24, %38 : vector<64x32xf32>
    %cst_22 = arith.constant 9.99999974E-6 : f32
    %40 = vector.broadcast %cst_22 : f32 to vector<64x1xf32>
    %41 = arith.addf %37, %40 : vector<64x1xf32>
    %42 = math.rsqrt %41 : vector<64x1xf32>
    %43 = vector.broadcast %42 : vector<64x1xf32> to vector<64x32xf32>
    %44 = arith.mulf %39, %43 : vector<64x32xf32>
    %c0_23 = arith.constant 0 : index
    %c0_24 = arith.constant 0 : index
    %45 = vector.load %arg8[%c0_23, %c0_24] : memref<1x32xf32, #tpu.memory_space<vmem>>, vector<1x32xf32>
    %46 = vector.broadcast %45 : vector<1x32xf32> to vector<64x32xf32>
    %47 = arith.mulf %44, %46 : vector<64x32xf32>
    %c0_25 = arith.constant 0 : index
    %c0_26 = arith.constant 0 : index
    %48 = vector.load %arg9[%c0_25, %c0_26] : memref<1x32xf32, #tpu.memory_space<vmem>>, vector<1x32xf32>
    %49 = vector.broadcast %48 : vector<1x32xf32> to vector<64x32xf32>
    %50 = arith.addf %47, %49 : vector<64x32xf32>
    %c0_27 = arith.constant 0 : index
    %c0_28 = arith.constant 0 : index
    %51 = vector.load %arg10[%c0_27, %c0_28] : memref<32x512xf32, #tpu.memory_space<vmem>>, vector<32x512xf32>
    %cst_29 = arith.constant dense<0.000000e+00> : vector<64x512xf32>
    %52 = tpu.matmul %50, %51, %cst_29 {dimension_numbers = #tpu.dot_dimension_numbers<[1], [0], [0], [1], [0, 0, 1, 1], [], []>} : vector<64x32xf32>, vector<32x512xf32>, vector<64x512xf32> -> vector<64x512xf32>
    %c0_30 = arith.constant 0 : index
    %c0_31 = arith.constant 0 : index
    %53 = vector.load %arg12[%c0_30, %c0_31] : memref<1x512xf32, #tpu.memory_space<vmem>>, vector<1x512xf32>
    %54 = vector.broadcast %53 : vector<1x512xf32> to vector<64x512xf32>
    %55 = arith.addf %52, %54 : vector<64x512xf32>
    %c0_32 = arith.constant 0 : index
    %c0_33 = arith.constant 0 : index
    %56 = vector.load %arg21[%c0_32, %c0_33] : memref<64x512xf32, #tpu.memory_space<vmem>>, vector<64x512xf32>
    tpu.vector_store %arg21[%c0_32, %c0_33], %55 {strides = array<i32>} : memref<64x512xf32, #tpu.memory_space<vmem>>, vector<64x512xf32>,
    %c0_34 = arith.constant 0 : index
    %c0_35 = arith.constant 0 : index
    %57 = vector.load %arg11[%c0_34, %c0_35] : memref<32x512xf32, #tpu.memory_space<vmem>>, vector<32x512xf32>
    %c0_36 = arith.constant 0 : index
    %c0_37 = arith.constant 0 : index
    %58 = vector.load %arg13[%c0_36, %c0_37] : memref<32x512xf32, #tpu.memory_space<vmem>>, vector<32x512xf32>
    %c0_38 = arith.constant 0 : index
    %c0_39 = arith.constant 0 : index
    %59 = vector.load %arg14[%c0_38, %c0_39] : memref<32x512xf32, #tpu.memory_space<vmem>>, vector<32x512xf32>
    %60 = arith.addf %58, %59 : vector<32x512xf32>
    %c0_40 = arith.constant 0 : index
    %c0_41 = arith.constant 0 : index
    %61 = vector.load %arg15[%c0_40, %c0_41] : memref<1x512xf32, #tpu.memory_space<vmem>>, vector<1x512xf32>
    %c0_42 = arith.constant 0 : index
    %c0_43 = arith.constant 0 : index
    %62 = vector.load %arg16[%c0_42, %c0_43] : memref<32x32xf32, #tpu.memory_space<vmem>>, vector<32x32xf32>
    %c0_44 = arith.constant 0 : index
    %c0_45 = arith.constant 0 : index
    %63 = vector.load %arg17[%c0_44, %c0_45] : memref<1x32xf32, #tpu.memory_space<vmem>>, vector<1x32xf32>
    %c0_46 = arith.constant 0 : index
    %c0_47 = arith.constant 0 : index
    %64 = vector.load %arg18[%c0_46, %c0_47] : memref<32x4xf32, #tpu.memory_space<vmem>>, vector<32x4xf32>
    %c0_48 = arith.constant 0 : index
    %c0_49 = arith.constant 0 : index
    %65 = vector.load %arg19[%c0_48, %c0_49] : memref<1x4xf32, #tpu.memory_space<vmem>>, vector<1x4xf32>
    %cst_50 = arith.constant 0.000000e+00 : f32
    %66 = vector.broadcast %cst_50 : f32 to vector<8x32xf32>
    %cst_51 = arith.constant 0.000000e+00 : f32
    %67 = vector.broadcast %cst_51 : f32 to vector<8x32xf32>
    %c0_i32 = arith.constant 0 : i32
    %c8_i32 = arith.constant 8 : i32
    %68 = arith.muli %c0_i32, %c8_i32 : i32
    %69 = tpu.assume_multiple %68, 8 : i32
    %70 = arith.index_cast %69 : i32 to index
    %c0_52 = arith.constant 0 : index
    %71 = vector.load %arg21[%70, %c0_52] : memref<64x512xf32, #tpu.memory_space<vmem>>, vector<8x512xf32>
    %cst_53 = arith.constant dense<0.000000e+00> : vector<8x512xf32>
    %72 = tpu.matmul %66, %57, %cst_53 {dimension_numbers = #tpu.dot_dimension_numbers<[1], [0], [0], [1], [0, 0, 1, 1], [], []>} : vector<8x32xf32>, vector<32x512xf32>, vector<8x512xf32> -> vector<8x512xf32>
    %73 = arith.addf %71, %72 : vector<8x512xf32>
    %74 = vector.extract_strided_slice %73 {offsets = [0, 0], sizes = [8, 32], strides = [1, 1]} : vector<8x512xf32> to vector<8x32xf32>
    %75 = arith.negf %74 : vector<8x32xf32>
    %76 = math.exp %75 : vector<8x32xf32>
    %cst_54 = arith.constant 1.000000e+00 : f32
    %77 = vector.broadcast %cst_54 : f32 to vector<8x32xf32>
    %78 = arith.addf %77, %76 : vector<8x32xf32>
    %79 = arith.divf %77, %78 : vector<8x32xf32>
    %80 = vector.extract_strided_slice %73 {offsets = [0, 128], sizes = [8, 32], strides = [1, 1]} : vector<8x512xf32> to vector<8x32xf32>
    %81 = arith.negf %80 : vector<8x32xf32>
    %82 = math.exp %81 : vector<8x32xf32>
    %cst_55 = arith.constant 1.000000e+00 : f32
    %83 = vector.broadcast %cst_55 : f32 to vector<8x32xf32>
    %84 = arith.addf %83, %82 : vector<8x32xf32>
    %85 = arith.divf %83, %84 : vector<8x32xf32>
    %86 = vector.extract_strided_slice %73 {offsets = [0, 256], sizes = [8, 32], strides = [1, 1]} : vector<8x512xf32> to vector<8x32xf32>
    %87 = math.tanh %86 : vector<8x32xf32>
    %88 = vector.extract_strided_slice %73 {offsets = [0, 384], sizes = [8, 32], strides = [1, 1]} : vector<8x512xf32> to vector<8x32xf32>
    %89 = arith.negf %88 : vector<8x32xf32>
    %90 = math.exp %89 : vector<8x32xf32>
    %cst_56 = arith.constant 1.000000e+00 : f32
    %91 = vector.broadcast %cst_56 : f32 to vector<8x32xf32>
    %92 = arith.addf %91, %90 : vector<8x32xf32>
    %93 = arith.divf %91, %92 : vector<8x32xf32>
    %94 = arith.mulf %85, %67 : vector<8x32xf32>
    %95 = arith.mulf %79, %87 : vector<8x32xf32>
    %96 = arith.addf %94, %95 : vector<8x32xf32>
    %97 = math.tanh %96 : vector<8x32xf32>
    %98 = arith.mulf %93, %97 : vector<8x32xf32>
    %99 = arith.index_cast %69 : i32 to index
    %c0_57 = arith.constant 0 : index
    %100 = vector.load %arg22[%99, %c0_57] : memref<88x32xf32, #tpu.memory_space<vmem>>, vector<8x32xf32>
    tpu.vector_store %arg22[%99, %c0_57], %98 {strides = array<i32>} : memref<88x32xf32, #tpu.memory_space<vmem>>, vector<8x32xf32>,
    %c1_i32 = arith.constant 1 : i32
    %c8_i32_58 = arith.constant 8 : i32
    %101 = arith.muli %c1_i32, %c8_i32_58 : i32
    %102 = tpu.assume_multiple %101, 8 : i32
    %103 = arith.index_cast %102 : i32 to index
    %c0_59 = arith.constant 0 : index
    %104 = vector.load %arg21[%103, %c0_59] : memref<64x512xf32, #tpu.memory_space<vmem>>, vector<8x512xf32>
    %cst_60 = arith.constant dense<0.000000e+00> : vector<8x512xf32>
    %105 = tpu.matmul %98, %57, %cst_60 {dimension_numbers = #tpu.dot_dimension_numbers<[1], [0], [0], [1], [0, 0, 1, 1], [], []>} : vector<8x32xf32>, vector<32x512xf32>, vector<8x512xf32> -> vector<8x512xf32>
    %106 = arith.addf %104, %105 : vector<8x512xf32>
    %107 = vector.extract_strided_slice %106 {offsets = [0, 0], sizes = [8, 32], strides = [1, 1]} : vector<8x512xf32> to vector<8x32xf32>
    %108 = arith.negf %107 : vector<8x32xf32>
    %109 = math.exp %108 : vector<8x32xf32>
    %cst_61 = arith.constant 1.000000e+00 : f32
    %110 = vector.broadcast %cst_61 : f32 to vector<8x32xf32>
    %111 = arith.addf %110, %109 : vector<8x32xf32>
    %112 = arith.divf %110, %111 : vector<8x32xf32>
    %113 = vector.extract_strided_slice %106 {offsets = [0, 128], sizes = [8, 32], strides = [1, 1]} : vector<8x512xf32> to vector<8x32xf32>
    %114 = arith.negf %113 : vector<8x32xf32>
    %115 = math.exp %114 : vector<8x32xf32>
    %cst_62 = arith.constant 1.000000e+00 : f32
    %116 = vector.broadcast %cst_62 : f32 to vector<8x32xf32>
    %117 = arith.addf %116, %115 : vector<8x32xf32>
    %118 = arith.divf %116, %117 : vector<8x32xf32>
    %119 = vector.extract_strided_slice %106 {offsets = [0, 256], sizes = [8, 32], strides = [1, 1]} : vector<8x512xf32> to vector<8x32xf32>
    %120 = math.tanh %119 : vector<8x32xf32>
    %121 = vector.extract_strided_slice %106 {offsets = [0, 384], sizes = [8, 32], strides = [1, 1]} : vector<8x512xf32> to vector<8x32xf32>
    %122 = arith.negf %121 : vector<8x32xf32>
    %123 = math.exp %122 : vector<8x32xf32>
    %cst_63 = arith.constant 1.000000e+00 : f32
    %124 = vector.broadcast %cst_63 : f32 to vector<8x32xf32>
    %125 = arith.addf %124, %123 : vector<8x32xf32>
    %126 = arith.divf %124, %125 : vector<8x32xf32>
    %127 = arith.mulf %118, %96 : vector<8x32xf32>
    %128 = arith.mulf %112, %120 : vector<8x32xf32>
    %129 = arith.addf %127, %128 : vector<8x32xf32>
    %130 = math.tanh %129 : vector<8x32xf32>
    %131 = arith.mulf %126, %130 : vector<8x32xf32>
    %132 = arith.index_cast %102 : i32 to index
    %c0_64 = arith.constant 0 : index
    %133 = vector.load %arg22[%132, %c0_64] : memref<88x32xf32, #tpu.memory_space<vmem>>, vector<8x32xf32>
    tpu.vector_store %arg22[%132, %c0_64], %131 {strides = array<i32>} : memref<88x32xf32, #tpu.memory_space<vmem>>, vector<8x32xf32>,
    %c2_i32 = arith.constant 2 : i32
    %c8_i32_65 = arith.constant 8 : i32
    %134 = arith.muli %c2_i32, %c8_i32_65 : i32
    %135 = tpu.assume_multiple %134, 8 : i32
    %136 = arith.index_cast %135 : i32 to index
    %c0_66 = arith.constant 0 : index
    %137 = vector.load %arg21[%136, %c0_66] : memref<64x512xf32, #tpu.memory_space<vmem>>, vector<8x512xf32>
    %cst_67 = arith.constant dense<0.000000e+00> : vector<8x512xf32>
    %138 = tpu.matmul %131, %57, %cst_67 {dimension_numbers = #tpu.dot_dimension_numbers<[1], [0], [0], [1], [0, 0, 1, 1], [], []>} : vector<8x32xf32>, vector<32x512xf32>, vector<8x512xf32> -> vector<8x512xf32>
    %139 = arith.addf %137, %138 : vector<8x512xf32>
    %140 = vector.extract_strided_slice %139 {offsets = [0, 0], sizes = [8, 32], strides = [1, 1]} : vector<8x512xf32> to vector<8x32xf32>
    %141 = arith.negf %140 : vector<8x32xf32>
    %142 = math.exp %141 : vector<8x32xf32>
    %cst_68 = arith.constant 1.000000e+00 : f32
    %143 = vector.broadcast %cst_68 : f32 to vector<8x32xf32>
    %144 = arith.addf %143, %142 : vector<8x32xf32>
    %145 = arith.divf %143, %144 : vector<8x32xf32>
    %146 = vector.extract_strided_slice %139 {offsets = [0, 128], sizes = [8, 32], strides = [1, 1]} : vector<8x512xf32> to vector<8x32xf32>
    %147 = arith.negf %146 : vector<8x32xf32>
    %148 = math.exp %147 : vector<8x32xf32>
    %cst_69 = arith.constant 1.000000e+00 : f32
    %149 = vector.broadcast %cst_69 : f32 to vector<8x32xf32>
    %150 = arith.addf %149, %148 : vector<8x32xf32>
    %151 = arith.divf %149, %150 : vector<8x32xf32>
    %152 = vector.extract_strided_slice %139 {offsets = [0, 256], sizes = [8, 32], strides = [1, 1]} : vector<8x512xf32> to vector<8x32xf32>
    %153 = math.tanh %152 : vector<8x32xf32>
    %154 = vector.extract_strided_slice %139 {offsets = [0, 384], sizes = [8, 32], strides = [1, 1]} : vector<8x512xf32> to vector<8x32xf32>
    %155 = arith.negf %154 : vector<8x32xf32>
    %156 = math.exp %155 : vector<8x32xf32>
    %cst_70 = arith.constant 1.000000e+00 : f32
    %157 = vector.broadcast %cst_70 : f32 to vector<8x32xf32>
    %158 = arith.addf %157, %156 : vector<8x32xf32>
    %159 = arith.divf %157, %158 : vector<8x32xf32>
    %160 = arith.mulf %151, %129 : vector<8x32xf32>
    %161 = arith.mulf %145, %153 : vector<8x32xf32>
    %162 = arith.addf %160, %161 : vector<8x32xf32>
    %163 = math.tanh %162 : vector<8x32xf32>
    %164 = arith.mulf %159, %163 : vector<8x32xf32>
    %165 = arith.index_cast %135 : i32 to index
    %c0_71 = arith.constant 0 : index
    %166 = vector.load %arg22[%165, %c0_71] : memref<88x32xf32, #tpu.memory_space<vmem>>, vector<8x32xf32>
    tpu.vector_store %arg22[%165, %c0_71], %164 {strides = array<i32>} : memref<88x32xf32, #tpu.memory_space<vmem>>, vector<8x32xf32>,
    %c3_i32 = arith.constant 3 : i32
    %c8_i32_72 = arith.constant 8 : i32
    %167 = arith.muli %c3_i32, %c8_i32_72 : i32
    %168 = tpu.assume_multiple %167, 8 : i32
    %169 = arith.index_cast %168 : i32 to index
    %c0_73 = arith.constant 0 : index
    %170 = vector.load %arg21[%169, %c0_73] : memref<64x512xf32, #tpu.memory_space<vmem>>, vector<8x512xf32>
    %cst_74 = arith.constant dense<0.000000e+00> : vector<8x512xf32>
    %171 = tpu.matmul %164, %57, %cst_74 {dimension_numbers = #tpu.dot_dimension_numbers<[1], [0], [0], [1], [0, 0, 1, 1], [], []>} : vector<8x32xf32>, vector<32x512xf32>, vector<8x512xf32> -> vector<8x512xf32>
    %172 = arith.addf %170, %171 : vector<8x512xf32>
    %173 = vector.extract_strided_slice %172 {offsets = [0, 0], sizes = [8, 32], strides = [1, 1]} : vector<8x512xf32> to vector<8x32xf32>
    %174 = arith.negf %173 : vector<8x32xf32>
    %175 = math.exp %174 : vector<8x32xf32>
    %cst_75 = arith.constant 1.000000e+00 : f32
    %176 = vector.broadcast %cst_75 : f32 to vector<8x32xf32>
    %177 = arith.addf %176, %175 : vector<8x32xf32>
    %178 = arith.divf %176, %177 : vector<8x32xf32>
    %179 = vector.extract_strided_slice %172 {offsets = [0, 128], sizes = [8, 32], strides = [1, 1]} : vector<8x512xf32> to vector<8x32xf32>
    %180 = arith.negf %179 : vector<8x32xf32>
    %181 = math.exp %180 : vector<8x32xf32>
    %cst_76 = arith.constant 1.000000e+00 : f32
    %182 = vector.broadcast %cst_76 : f32 to vector<8x32xf32>
    %183 = arith.addf %182, %181 : vector<8x32xf32>
    %184 = arith.divf %182, %183 : vector<8x32xf32>
    %185 = vector.extract_strided_slice %172 {offsets = [0, 256], sizes = [8, 32], strides = [1, 1]} : vector<8x512xf32> to vector<8x32xf32>
    %186 = math.tanh %185 : vector<8x32xf32>
    %187 = vector.extract_strided_slice %172 {offsets = [0, 384], sizes = [8, 32], strides = [1, 1]} : vector<8x512xf32> to vector<8x32xf32>
    %188 = arith.negf %187 : vector<8x32xf32>
    %189 = math.exp %188 : vector<8x32xf32>
    %cst_77 = arith.constant 1.000000e+00 : f32
    %190 = vector.broadcast %cst_77 : f32 to vector<8x32xf32>
    %191 = arith.addf %190, %189 : vector<8x32xf32>
    %192 = arith.divf %190, %191 : vector<8x32xf32>
    %193 = arith.mulf %184, %162 : vector<8x32xf32>
    %194 = arith.mulf %178, %186 : vector<8x32xf32>
    %195 = arith.addf %193, %194 : vector<8x32xf32>
    %196 = math.tanh %195 : vector<8x32xf32>
    %197 = arith.mulf %192, %196 : vector<8x32xf32>
    %198 = arith.index_cast %168 : i32 to index
    %c0_78 = arith.constant 0 : index
    %199 = vector.load %arg22[%198, %c0_78] : memref<88x32xf32, #tpu.memory_space<vmem>>, vector<8x32xf32>
    tpu.vector_store %arg22[%198, %c0_78], %197 {strides = array<i32>} : memref<88x32xf32, #tpu.memory_space<vmem>>, vector<8x32xf32>,
    %c4_i32 = arith.constant 4 : i32
    %c8_i32_79 = arith.constant 8 : i32
    %200 = arith.muli %c4_i32, %c8_i32_79 : i32
    %201 = tpu.assume_multiple %200, 8 : i32
    %202 = arith.index_cast %201 : i32 to index
    %c0_80 = arith.constant 0 : index
    %203 = vector.load %arg21[%202, %c0_80] : memref<64x512xf32, #tpu.memory_space<vmem>>, vector<8x512xf32>
    %cst_81 = arith.constant dense<0.000000e+00> : vector<8x512xf32>
    %204 = tpu.matmul %197, %57, %cst_81 {dimension_numbers = #tpu.dot_dimension_numbers<[1], [0], [0], [1], [0, 0, 1, 1], [], []>} : vector<8x32xf32>, vector<32x512xf32>, vector<8x512xf32> -> vector<8x512xf32>
    %205 = arith.addf %203, %204 : vector<8x512xf32>
    %206 = vector.extract_strided_slice %205 {offsets = [0, 0], sizes = [8, 32], strides = [1, 1]} : vector<8x512xf32> to vector<8x32xf32>
    %207 = arith.negf %206 : vector<8x32xf32>
    %208 = math.exp %207 : vector<8x32xf32>
    %cst_82 = arith.constant 1.000000e+00 : f32
    %209 = vector.broadcast %cst_82 : f32 to vector<8x32xf32>
    %210 = arith.addf %209, %208 : vector<8x32xf32>
    %211 = arith.divf %209, %210 : vector<8x32xf32>
    %212 = vector.extract_strided_slice %205 {offsets = [0, 128], sizes = [8, 32], strides = [1, 1]} : vector<8x512xf32> to vector<8x32xf32>
    %213 = arith.negf %212 : vector<8x32xf32>
    %214 = math.exp %213 : vector<8x32xf32>
    %cst_83 = arith.constant 1.000000e+00 : f32
    %215 = vector.broadcast %cst_83 : f32 to vector<8x32xf32>
    %216 = arith.addf %215, %214 : vector<8x32xf32>
    %217 = arith.divf %215, %216 : vector<8x32xf32>
    %218 = vector.extract_strided_slice %205 {offsets = [0, 256], sizes = [8, 32], strides = [1, 1]} : vector<8x512xf32> to vector<8x32xf32>
    %219 = math.tanh %218 : vector<8x32xf32>
    %220 = vector.extract_strided_slice %205 {offsets = [0, 384], sizes = [8, 32], strides = [1, 1]} : vector<8x512xf32> to vector<8x32xf32>
    %221 = arith.negf %220 : vector<8x32xf32>
    %222 = math.exp %221 : vector<8x32xf32>
    %cst_84 = arith.constant 1.000000e+00 : f32
    %223 = vector.broadcast %cst_84 : f32 to vector<8x32xf32>
    %224 = arith.addf %223, %222 : vector<8x32xf32>
    %225 = arith.divf %223, %224 : vector<8x32xf32>
    %226 = arith.mulf %217, %195 : vector<8x32xf32>
    %227 = arith.mulf %211, %219 : vector<8x32xf32>
    %228 = arith.addf %226, %227 : vector<8x32xf32>
    %229 = math.tanh %228 : vector<8x32xf32>
    %230 = arith.mulf %225, %229 : vector<8x32xf32>
    %231 = arith.index_cast %201 : i32 to index
    %c0_85 = arith.constant 0 : index
    %232 = vector.load %arg22[%231, %c0_85] : memref<88x32xf32, #tpu.memory_space<vmem>>, vector<8x32xf32>
    tpu.vector_store %arg22[%231, %c0_85], %230 {strides = array<i32>} : memref<88x32xf32, #tpu.memory_space<vmem>>, vector<8x32xf32>,
    %c5_i32 = arith.constant 5 : i32
    %c8_i32_86 = arith.constant 8 : i32
    %233 = arith.muli %c5_i32, %c8_i32_86 : i32
    %234 = tpu.assume_multiple %233, 8 : i32
    %235 = arith.index_cast %234 : i32 to index
    %c0_87 = arith.constant 0 : index
    %236 = vector.load %arg21[%235, %c0_87] : memref<64x512xf32, #tpu.memory_space<vmem>>, vector<8x512xf32>
    %cst_88 = arith.constant dense<0.000000e+00> : vector<8x512xf32>
    %237 = tpu.matmul %230, %57, %cst_88 {dimension_numbers = #tpu.dot_dimension_numbers<[1], [0], [0], [1], [0, 0, 1, 1], [], []>} : vector<8x32xf32>, vector<32x512xf32>, vector<8x512xf32> -> vector<8x512xf32>
    %238 = arith.addf %236, %237 : vector<8x512xf32>
    %239 = vector.extract_strided_slice %238 {offsets = [0, 0], sizes = [8, 32], strides = [1, 1]} : vector<8x512xf32> to vector<8x32xf32>
    %240 = arith.negf %239 : vector<8x32xf32>
    %241 = math.exp %240 : vector<8x32xf32>
    %cst_89 = arith.constant 1.000000e+00 : f32
    %242 = vector.broadcast %cst_89 : f32 to vector<8x32xf32>
    %243 = arith.addf %242, %241 : vector<8x32xf32>
    %244 = arith.divf %242, %243 : vector<8x32xf32>
    %245 = vector.extract_strided_slice %238 {offsets = [0, 128], sizes = [8, 32], strides = [1, 1]} : vector<8x512xf32> to vector<8x32xf32>
    %246 = arith.negf %245 : vector<8x32xf32>
    %247 = math.exp %246 : vector<8x32xf32>
    %cst_90 = arith.constant 1.000000e+00 : f32
    %248 = vector.broadcast %cst_90 : f32 to vector<8x32xf32>
    %249 = arith.addf %248, %247 : vector<8x32xf32>
    %250 = arith.divf %248, %249 : vector<8x32xf32>
    %251 = vector.extract_strided_slice %238 {offsets = [0, 256], sizes = [8, 32], strides = [1, 1]} : vector<8x512xf32> to vector<8x32xf32>
    %252 = math.tanh %251 : vector<8x32xf32>
    %253 = vector.extract_strided_slice %238 {offsets = [0, 384], sizes = [8, 32], strides = [1, 1]} : vector<8x512xf32> to vector<8x32xf32>
    %254 = arith.negf %253 : vector<8x32xf32>
    %255 = math.exp %254 : vector<8x32xf32>
    %cst_91 = arith.constant 1.000000e+00 : f32
    %256 = vector.broadcast %cst_91 : f32 to vector<8x32xf32>
    %257 = arith.addf %256, %255 : vector<8x32xf32>
    %258 = arith.divf %256, %257 : vector<8x32xf32>
    %259 = arith.mulf %250, %228 : vector<8x32xf32>
    %260 = arith.mulf %244, %252 : vector<8x32xf32>
    %261 = arith.addf %259, %260 : vector<8x32xf32>
    %262 = math.tanh %261 : vector<8x32xf32>
    %263 = arith.mulf %258, %262 : vector<8x32xf32>
    %264 = arith.index_cast %234 : i32 to index
    %c0_92 = arith.constant 0 : index
    %265 = vector.load %arg22[%264, %c0_92] : memref<88x32xf32, #tpu.memory_space<vmem>>, vector<8x32xf32>
    tpu.vector_store %arg22[%264, %c0_92], %263 {strides = array<i32>} : memref<88x32xf32, #tpu.memory_space<vmem>>, vector<8x32xf32>,
    %c6_i32 = arith.constant 6 : i32
    %c8_i32_93 = arith.constant 8 : i32
    %266 = arith.muli %c6_i32, %c8_i32_93 : i32
    %267 = tpu.assume_multiple %266, 8 : i32
    %268 = arith.index_cast %267 : i32 to index
    %c0_94 = arith.constant 0 : index
    %269 = vector.load %arg21[%268, %c0_94] : memref<64x512xf32, #tpu.memory_space<vmem>>, vector<8x512xf32>
    %cst_95 = arith.constant dense<0.000000e+00> : vector<8x512xf32>
    %270 = tpu.matmul %263, %57, %cst_95 {dimension_numbers = #tpu.dot_dimension_numbers<[1], [0], [0], [1], [0, 0, 1, 1], [], []>} : vector<8x32xf32>, vector<32x512xf32>, vector<8x512xf32> -> vector<8x512xf32>
    %271 = arith.addf %269, %270 : vector<8x512xf32>
    %272 = vector.extract_strided_slice %271 {offsets = [0, 0], sizes = [8, 32], strides = [1, 1]} : vector<8x512xf32> to vector<8x32xf32>
    %273 = arith.negf %272 : vector<8x32xf32>
    %274 = math.exp %273 : vector<8x32xf32>
    %cst_96 = arith.constant 1.000000e+00 : f32
    %275 = vector.broadcast %cst_96 : f32 to vector<8x32xf32>
    %276 = arith.addf %275, %274 : vector<8x32xf32>
    %277 = arith.divf %275, %276 : vector<8x32xf32>
    %278 = vector.extract_strided_slice %271 {offsets = [0, 128], sizes = [8, 32], strides = [1, 1]} : vector<8x512xf32> to vector<8x32xf32>
    %279 = arith.negf %278 : vector<8x32xf32>
    %280 = math.exp %279 : vector<8x32xf32>
    %cst_97 = arith.constant 1.000000e+00 : f32
    %281 = vector.broadcast %cst_97 : f32 to vector<8x32xf32>
    %282 = arith.addf %281, %280 : vector<8x32xf32>
    %283 = arith.divf %281, %282 : vector<8x32xf32>
    %284 = vector.extract_strided_slice %271 {offsets = [0, 256], sizes = [8, 32], strides = [1, 1]} : vector<8x512xf32> to vector<8x32xf32>
    %285 = math.tanh %284 : vector<8x32xf32>
    %286 = vector.extract_strided_slice %271 {offsets = [0, 384], sizes = [8, 32], strides = [1, 1]} : vector<8x512xf32> to vector<8x32xf32>
    %287 = arith.negf %286 : vector<8x32xf32>
    %288 = math.exp %287 : vector<8x32xf32>
    %cst_98 = arith.constant 1.000000e+00 : f32
    %289 = vector.broadcast %cst_98 : f32 to vector<8x32xf32>
    %290 = arith.addf %289, %288 : vector<8x32xf32>
    %291 = arith.divf %289, %290 : vector<8x32xf32>
    %292 = arith.mulf %283, %261 : vector<8x32xf32>
    %293 = arith.mulf %277, %285 : vector<8x32xf32>
    %294 = arith.addf %292, %293 : vector<8x32xf32>
    %295 = math.tanh %294 : vector<8x32xf32>
    %296 = arith.mulf %291, %295 : vector<8x32xf32>
    %297 = arith.index_cast %267 : i32 to index
    %c0_99 = arith.constant 0 : index
    %298 = vector.load %arg22[%297, %c0_99] : memref<88x32xf32, #tpu.memory_space<vmem>>, vector<8x32xf32>
    tpu.vector_store %arg22[%297, %c0_99], %296 {strides = array<i32>} : memref<88x32xf32, #tpu.memory_space<vmem>>, vector<8x32xf32>,
    %c7_i32 = arith.constant 7 : i32
    %c8_i32_100 = arith.constant 8 : i32
    %299 = arith.muli %c7_i32, %c8_i32_100 : i32
    %300 = tpu.assume_multiple %299, 8 : i32
    %301 = arith.index_cast %300 : i32 to index
    %c0_101 = arith.constant 0 : index
    %302 = vector.load %arg21[%301, %c0_101] : memref<64x512xf32, #tpu.memory_space<vmem>>, vector<8x512xf32>
    %cst_102 = arith.constant dense<0.000000e+00> : vector<8x512xf32>
    %303 = tpu.matmul %296, %57, %cst_102 {dimension_numbers = #tpu.dot_dimension_numbers<[1], [0], [0], [1], [0, 0, 1, 1], [], []>} : vector<8x32xf32>, vector<32x512xf32>, vector<8x512xf32> -> vector<8x512xf32>
    %304 = arith.addf %302, %303 : vector<8x512xf32>
    %305 = vector.extract_strided_slice %304 {offsets = [0, 0], sizes = [8, 32], strides = [1, 1]} : vector<8x512xf32> to vector<8x32xf32>
    %306 = arith.negf %305 : vector<8x32xf32>
    %307 = math.exp %306 : vector<8x32xf32>
    %cst_103 = arith.constant 1.000000e+00 : f32
    %308 = vector.broadcast %cst_103 : f32 to vector<8x32xf32>
    %309 = arith.addf %308, %307 : vector<8x32xf32>
    %310 = arith.divf %308, %309 : vector<8x32xf32>
    %311 = vector.extract_strided_slice %304 {offsets = [0, 128], sizes = [8, 32], strides = [1, 1]} : vector<8x512xf32> to vector<8x32xf32>
    %312 = arith.negf %311 : vector<8x32xf32>
    %313 = math.exp %312 : vector<8x32xf32>
    %cst_104 = arith.constant 1.000000e+00 : f32
    %314 = vector.broadcast %cst_104 : f32 to vector<8x32xf32>
    %315 = arith.addf %314, %313 : vector<8x32xf32>
    %316 = arith.divf %314, %315 : vector<8x32xf32>
    %317 = vector.extract_strided_slice %304 {offsets = [0, 256], sizes = [8, 32], strides = [1, 1]} : vector<8x512xf32> to vector<8x32xf32>
    %318 = math.tanh %317 : vector<8x32xf32>
    %319 = vector.extract_strided_slice %304 {offsets = [0, 384], sizes = [8, 32], strides = [1, 1]} : vector<8x512xf32> to vector<8x32xf32>
    %320 = arith.negf %319 : vector<8x32xf32>
    %321 = math.exp %320 : vector<8x32xf32>
    %cst_105 = arith.constant 1.000000e+00 : f32
    %322 = vector.broadcast %cst_105 : f32 to vector<8x32xf32>
    %323 = arith.addf %322, %321 : vector<8x32xf32>
    %324 = arith.divf %322, %323 : vector<8x32xf32>
    %325 = arith.mulf %316, %294 : vector<8x32xf32>
    %326 = arith.mulf %310, %318 : vector<8x32xf32>
    %327 = arith.addf %325, %326 : vector<8x32xf32>
    %328 = math.tanh %327 : vector<8x32xf32>
    %329 = arith.mulf %324, %328 : vector<8x32xf32>
    %330 = arith.index_cast %300 : i32 to index
    %c0_106 = arith.constant 0 : index
    %331 = vector.load %arg22[%330, %c0_106] : memref<88x32xf32, #tpu.memory_space<vmem>>, vector<8x32xf32>
    tpu.vector_store %arg22[%330, %c0_106], %329 {strides = array<i32>} : memref<88x32xf32, #tpu.memory_space<vmem>>, vector<8x32xf32>,
    %c8_i32_107 = arith.constant 8 : i32
    %c0_i32_108 = arith.constant 0 : i32
    %cst_109 = arith.constant dense<0.000000e+00> : vector<8x512xf32>
    %332 = tpu.matmul %329, %60, %cst_109 {dimension_numbers = #tpu.dot_dimension_numbers<[1], [0], [0], [1], [0, 0, 1, 1], [], []>} : vector<8x32xf32>, vector<32x512xf32>, vector<8x512xf32> -> vector<8x512xf32>
    %333 = vector.broadcast %61 : vector<1x512xf32> to vector<8x512xf32>
    %334 = arith.addf %332, %333 : vector<8x512xf32>
    %335 = vector.extract_strided_slice %334 {offsets = [0, 0], sizes = [8, 32], strides = [1, 1]} : vector<8x512xf32> to vector<8x32xf32>
    %336 = arith.negf %335 : vector<8x32xf32>
    %337 = math.exp %336 : vector<8x32xf32>
    %cst_110 = arith.constant 1.000000e+00 : f32
    %338 = vector.broadcast %cst_110 : f32 to vector<8x32xf32>
    %339 = arith.addf %338, %337 : vector<8x32xf32>
    %340 = arith.divf %338, %339 : vector<8x32xf32>
    %341 = vector.extract_strided_slice %334 {offsets = [0, 128], sizes = [8, 32], strides = [1, 1]} : vector<8x512xf32> to vector<8x32xf32>
    %342 = arith.negf %341 : vector<8x32xf32>
    %343 = math.exp %342 : vector<8x32xf32>
    %cst_111 = arith.constant 1.000000e+00 : f32
    %344 = vector.broadcast %cst_111 : f32 to vector<8x32xf32>
    %345 = arith.addf %344, %343 : vector<8x32xf32>
    %346 = arith.divf %344, %345 : vector<8x32xf32>
    %347 = vector.extract_strided_slice %334 {offsets = [0, 256], sizes = [8, 32], strides = [1, 1]} : vector<8x512xf32> to vector<8x32xf32>
    %348 = math.tanh %347 : vector<8x32xf32>
    %349 = vector.extract_strided_slice %334 {offsets = [0, 384], sizes = [8, 32], strides = [1, 1]} : vector<8x512xf32> to vector<8x32xf32>
    %350 = arith.negf %349 : vector<8x32xf32>
    %351 = math.exp %350 : vector<8x32xf32>
    %cst_112 = arith.constant 1.000000e+00 : f32
    %352 = vector.broadcast %cst_112 : f32 to vector<8x32xf32>
    %353 = arith.addf %352, %351 : vector<8x32xf32>
    %354 = arith.divf %352, %353 : vector<8x32xf32>
    %355 = arith.mulf %346, %327 : vector<8x32xf32>
    %356 = arith.mulf %340, %348 : vector<8x32xf32>
    %357 = arith.addf %355, %356 : vector<8x32xf32>
    %358 = math.tanh %357 : vector<8x32xf32>
    %359 = arith.mulf %354, %358 : vector<8x32xf32>
    %c8_i32_113 = arith.constant 8 : i32
    %360 = arith.addi %c8_i32_113, %c0_i32_108 : i32
    %c8_i32_114 = arith.constant 8 : i32
    %361 = arith.muli %360, %c8_i32_114 : i32
    %362 = tpu.assume_multiple %361, 8 : i32
    %363 = arith.index_cast %362 : i32 to index
    %c0_115 = arith.constant 0 : index
    %364 = vector.load %arg22[%363, %c0_115] : memref<88x32xf32, #tpu.memory_space<vmem>>, vector<8x32xf32>
    tpu.vector_store %arg22[%363, %c0_115], %359 {strides = array<i32>} : memref<88x32xf32, #tpu.memory_space<vmem>>, vector<8x32xf32>,
    %c3_i32_116 = arith.constant 3 : i32
    %365 = arith.muli %c0_i32_108, %c3_i32_116 : i32
    %c5_i32_117 = arith.constant 5 : i32
    %366 = arith.minsi %365, %c5_i32_117 : i32
    %c8_i32_118 = arith.constant 8 : i32
    %367 = arith.muli %366, %c8_i32_118 : i32
    %368 = tpu.assume_multiple %367, 8 : i32
    %369 = arith.index_cast %368 : i32 to index
    %c0_119 = arith.constant 0 : index
    %370 = vector.load %arg22[%369, %c0_119] : memref<88x32xf32, #tpu.memory_space<vmem>>, vector<24x32xf32>
    %cst_120 = arith.constant dense<0.000000e+00> : vector<24x32xf32>
    %371 = tpu.matmul %370, %62, %cst_120 {dimension_numbers = #tpu.dot_dimension_numbers<[1], [0], [0], [1], [0, 0, 1, 1], [], []>} : vector<24x32xf32>, vector<32x32xf32>, vector<24x32xf32> -> vector<24x32xf32>
    %372 = vector.broadcast %63 : vector<1x32xf32> to vector<24x32xf32>
    %373 = arith.addf %371, %372 : vector<24x32xf32>
    %cst_121 = arith.constant 0.000000e+00 : f32
    %374 = vector.broadcast %cst_121 : f32 to vector<24x32xf32>
    %375 = arith.cmpf ogt, %373, %374 : vector<24x32xf32>
    %cst_122 = arith.constant 0.00999999977 : f32
    %376 = vector.broadcast %cst_122 : f32 to vector<24x32xf32>
    %377 = arith.mulf %376, %373 : vector<24x32xf32>
    %378 = arith.select %375, %373, %377 : vector<24x32xi1>, vector<24x32xf32>
    %379 = arith.addf %378, %370 : vector<24x32xf32>
    %cst_123 = arith.constant dense<0.000000e+00> : vector<24x4xf32>
    %380 = tpu.matmul %379, %64, %cst_123 {dimension_numbers = #tpu.dot_dimension_numbers<[1], [0], [0], [1], [0, 0, 1, 1], [], []>} : vector<24x32xf32>, vector<32x4xf32>, vector<24x4xf32> -> vector<24x4xf32>
    %381 = vector.broadcast %65 : vector<1x4xf32> to vector<24x4xf32>
    %382 = arith.addf %380, %381 : vector<24x4xf32>
    %c0_124 = arith.constant 0 : index
    %383 = arith.index_cast %368 : i32 to index
    %c0_125 = arith.constant 0 : index
    %384 = vector.load %arg20[%c0_124, %383, %c0_125] : memref<1x88x4xf32, #tpu.memory_space<vmem>>, vector<1x24x4xf32>
    %385 = vector.shape_cast %384 : vector<1x24x4xf32> to vector<24x4xf32>
    %386 = vector.shape_cast %382 : vector<24x4xf32> to vector<1x24x4xf32>
    tpu.vector_store %arg20[%c0_124, %383, %c0_125], %386 {strides = array<i32>} : memref<1x88x4xf32, #tpu.memory_space<vmem>>, vector<1x24x4xf32>,
    %c1_i32_126 = arith.constant 1 : i32
    %cst_127 = arith.constant dense<0.000000e+00> : vector<8x512xf32>
    %387 = tpu.matmul %359, %60, %cst_127 {dimension_numbers = #tpu.dot_dimension_numbers<[1], [0], [0], [1], [0, 0, 1, 1], [], []>} : vector<8x32xf32>, vector<32x512xf32>, vector<8x512xf32> -> vector<8x512xf32>
    %388 = vector.broadcast %61 : vector<1x512xf32> to vector<8x512xf32>
    %389 = arith.addf %387, %388 : vector<8x512xf32>
    %390 = vector.extract_strided_slice %389 {offsets = [0, 0], sizes = [8, 32], strides = [1, 1]} : vector<8x512xf32> to vector<8x32xf32>
    %391 = arith.negf %390 : vector<8x32xf32>
    %392 = math.exp %391 : vector<8x32xf32>
    %cst_128 = arith.constant 1.000000e+00 : f32
    %393 = vector.broadcast %cst_128 : f32 to vector<8x32xf32>
    %394 = arith.addf %393, %392 : vector<8x32xf32>
    %395 = arith.divf %393, %394 : vector<8x32xf32>
    %396 = vector.extract_strided_slice %389 {offsets = [0, 128], sizes = [8, 32], strides = [1, 1]} : vector<8x512xf32> to vector<8x32xf32>
    %397 = arith.negf %396 : vector<8x32xf32>
    %398 = math.exp %397 : vector<8x32xf32>
    %cst_129 = arith.constant 1.000000e+00 : f32
    %399 = vector.broadcast %cst_129 : f32 to vector<8x32xf32>
    %400 = arith.addf %399, %398 : vector<8x32xf32>
    %401 = arith.divf %399, %400 : vector<8x32xf32>
    %402 = vector.extract_strided_slice %389 {offsets = [0, 256], sizes = [8, 32], strides = [1, 1]} : vector<8x512xf32> to vector<8x32xf32>
    %403 = math.tanh %402 : vector<8x32xf32>
    %404 = vector.extract_strided_slice %389 {offsets = [0, 384], sizes = [8, 32], strides = [1, 1]} : vector<8x512xf32> to vector<8x32xf32>
    %405 = arith.negf %404 : vector<8x32xf32>
    %406 = math.exp %405 : vector<8x32xf32>
    %cst_130 = arith.constant 1.000000e+00 : f32
    %407 = vector.broadcast %cst_130 : f32 to vector<8x32xf32>
    %408 = arith.addf %407, %406 : vector<8x32xf32>
    %409 = arith.divf %407, %408 : vector<8x32xf32>
    %410 = arith.mulf %401, %357 : vector<8x32xf32>
    %411 = arith.mulf %395, %403 : vector<8x32xf32>
    %412 = arith.addf %410, %411 : vector<8x32xf32>
    %413 = math.tanh %412 : vector<8x32xf32>
    %414 = arith.mulf %409, %413 : vector<8x32xf32>
    %c8_i32_131 = arith.constant 8 : i32
    %415 = arith.addi %c8_i32_131, %c1_i32_126 : i32
    %c8_i32_132 = arith.constant 8 : i32
    %416 = arith.muli %415, %c8_i32_132 : i32
    %417 = tpu.assume_multiple %416, 8 : i32
    %418 = arith.index_cast %417 : i32 to index
    %c0_133 = arith.constant 0 : index
    %419 = vector.load %arg22[%418, %c0_133] : memref<88x32xf32, #tpu.memory_space<vmem>>, vector<8x32xf32>
    tpu.vector_store %arg22[%418, %c0_133], %414 {strides = array<i32>} : memref<88x32xf32, #tpu.memory_space<vmem>>, vector<8x32xf32>,
    %c3_i32_134 = arith.constant 3 : i32
    %420 = arith.muli %c1_i32_126, %c3_i32_134 : i32
    %c5_i32_135 = arith.constant 5 : i32
    %421 = arith.minsi %420, %c5_i32_135 : i32
    %c8_i32_136 = arith.constant 8 : i32
    %422 = arith.muli %421, %c8_i32_136 : i32
    %423 = tpu.assume_multiple %422, 8 : i32
    %424 = arith.index_cast %423 : i32 to index
    %c0_137 = arith.constant 0 : index
    %425 = vector.load %arg22[%424, %c0_137] : memref<88x32xf32, #tpu.memory_space<vmem>>, vector<24x32xf32>
    %cst_138 = arith.constant dense<0.000000e+00> : vector<24x32xf32>
    %426 = tpu.matmul %425, %62, %cst_138 {dimension_numbers = #tpu.dot_dimension_numbers<[1], [0], [0], [1], [0, 0, 1, 1], [], []>} : vector<24x32xf32>, vector<32x32xf32>, vector<24x32xf32> -> vector<24x32xf32>
    %427 = vector.broadcast %63 : vector<1x32xf32> to vector<24x32xf32>
    %428 = arith.addf %426, %427 : vector<24x32xf32>
    %cst_139 = arith.constant 0.000000e+00 : f32
    %429 = vector.broadcast %cst_139 : f32 to vector<24x32xf32>
    %430 = arith.cmpf ogt, %428, %429 : vector<24x32xf32>
    %cst_140 = arith.constant 0.00999999977 : f32
    %431 = vector.broadcast %cst_140 : f32 to vector<24x32xf32>
    %432 = arith.mulf %431, %428 : vector<24x32xf32>
    %433 = arith.select %430, %428, %432 : vector<24x32xi1>, vector<24x32xf32>
    %434 = arith.addf %433, %425 : vector<24x32xf32>
    %cst_141 = arith.constant dense<0.000000e+00> : vector<24x4xf32>
    %435 = tpu.matmul %434, %64, %cst_141 {dimension_numbers = #tpu.dot_dimension_numbers<[1], [0], [0], [1], [0, 0, 1, 1], [], []>} : vector<24x32xf32>, vector<32x4xf32>, vector<24x4xf32> -> vector<24x4xf32>
    %436 = vector.broadcast %65 : vector<1x4xf32> to vector<24x4xf32>
    %437 = arith.addf %435, %436 : vector<24x4xf32>
    %c0_142 = arith.constant 0 : index
    %438 = arith.index_cast %423 : i32 to index
    %c0_143 = arith.constant 0 : index
    %439 = vector.load %arg20[%c0_142, %438, %c0_143] : memref<1x88x4xf32, #tpu.memory_space<vmem>>, vector<1x24x4xf32>
    %440 = vector.shape_cast %439 : vector<1x24x4xf32> to vector<24x4xf32>
    %441 = vector.shape_cast %437 : vector<24x4xf32> to vector<1x24x4xf32>
    tpu.vector_store %arg20[%c0_142, %438, %c0_143], %441 {strides = array<i32>} : memref<1x88x4xf32, #tpu.memory_space<vmem>>, vector<1x24x4xf32>,
    %c2_i32_144 = arith.constant 2 : i32
    %cst_145 = arith.constant dense<0.000000e+00> : vector<8x512xf32>
    %442 = tpu.matmul %414, %60, %cst_145 {dimension_numbers = #tpu.dot_dimension_numbers<[1], [0], [0], [1], [0, 0, 1, 1], [], []>} : vector<8x32xf32>, vector<32x512xf32>, vector<8x512xf32> -> vector<8x512xf32>
    %443 = vector.broadcast %61 : vector<1x512xf32> to vector<8x512xf32>
    %444 = arith.addf %442, %443 : vector<8x512xf32>
    %445 = vector.extract_strided_slice %444 {offsets = [0, 0], sizes = [8, 32], strides = [1, 1]} : vector<8x512xf32> to vector<8x32xf32>
    %446 = arith.negf %445 : vector<8x32xf32>
    %447 = math.exp %446 : vector<8x32xf32>
    %cst_146 = arith.constant 1.000000e+00 : f32
    %448 = vector.broadcast %cst_146 : f32 to vector<8x32xf32>
    %449 = arith.addf %448, %447 : vector<8x32xf32>
    %450 = arith.divf %448, %449 : vector<8x32xf32>
    %451 = vector.extract_strided_slice %444 {offsets = [0, 128], sizes = [8, 32], strides = [1, 1]} : vector<8x512xf32> to vector<8x32xf32>
    %452 = arith.negf %451 : vector<8x32xf32>
    %453 = math.exp %452 : vector<8x32xf32>
    %cst_147 = arith.constant 1.000000e+00 : f32
    %454 = vector.broadcast %cst_147 : f32 to vector<8x32xf32>
    %455 = arith.addf %454, %453 : vector<8x32xf32>
    %456 = arith.divf %454, %455 : vector<8x32xf32>
    %457 = vector.extract_strided_slice %444 {offsets = [0, 256], sizes = [8, 32], strides = [1, 1]} : vector<8x512xf32> to vector<8x32xf32>
    %458 = math.tanh %457 : vector<8x32xf32>
    %459 = vector.extract_strided_slice %444 {offsets = [0, 384], sizes = [8, 32], strides = [1, 1]} : vector<8x512xf32> to vector<8x32xf32>
    %460 = arith.negf %459 : vector<8x32xf32>
    %461 = math.exp %460 : vector<8x32xf32>
    %cst_148 = arith.constant 1.000000e+00 : f32
    %462 = vector.broadcast %cst_148 : f32 to vector<8x32xf32>
    %463 = arith.addf %462, %461 : vector<8x32xf32>
    %464 = arith.divf %462, %463 : vector<8x32xf32>
    %465 = arith.mulf %456, %412 : vector<8x32xf32>
    %466 = arith.mulf %450, %458 : vector<8x32xf32>
    %467 = arith.addf %465, %466 : vector<8x32xf32>
    %468 = math.tanh %467 : vector<8x32xf32>
    %469 = arith.mulf %464, %468 : vector<8x32xf32>
    %c8_i32_149 = arith.constant 8 : i32
    %470 = arith.addi %c8_i32_149, %c2_i32_144 : i32
    %c8_i32_150 = arith.constant 8 : i32
    %471 = arith.muli %470, %c8_i32_150 : i32
    %472 = tpu.assume_multiple %471, 8 : i32
    %473 = arith.index_cast %472 : i32 to index
    %c0_151 = arith.constant 0 : index
    %474 = vector.load %arg22[%473, %c0_151] : memref<88x32xf32, #tpu.memory_space<vmem>>, vector<8x32xf32>
    tpu.vector_store %arg22[%473, %c0_151], %469 {strides = array<i32>} : memref<88x32xf32, #tpu.memory_space<vmem>>, vector<8x32xf32>,
    %c3_i32_152 = arith.constant 3 : i32
    %475 = arith.muli %c2_i32_144, %c3_i32_152 : i32
    %c5_i32_153 = arith.constant 5 : i32
    %476 = arith.minsi %475, %c5_i32_153 : i32
    %c8_i32_154 = arith.constant 8 : i32
    %477 = arith.muli %476, %c8_i32_154 : i32
    %478 = tpu.assume_multiple %477, 8 : i32
    %479 = arith.index_cast %478 : i32 to index
    %c0_155 = arith.constant 0 : index
    %480 = vector.load %arg22[%479, %c0_155] : memref<88x32xf32, #tpu.memory_space<vmem>>, vector<24x32xf32>
    %cst_156 = arith.constant dense<0.000000e+00> : vector<24x32xf32>
    %481 = tpu.matmul %480, %62, %cst_156 {dimension_numbers = #tpu.dot_dimension_numbers<[1], [0], [0], [1], [0, 0, 1, 1], [], []>} : vector<24x32xf32>, vector<32x32xf32>, vector<24x32xf32> -> vector<24x32xf32>
    %482 = vector.broadcast %63 : vector<1x32xf32> to vector<24x32xf32>
    %483 = arith.addf %481, %482 : vector<24x32xf32>
    %cst_157 = arith.constant 0.000000e+00 : f32
    %484 = vector.broadcast %cst_157 : f32 to vector<24x32xf32>
    %485 = arith.cmpf ogt, %483, %484 : vector<24x32xf32>
    %cst_158 = arith.constant 0.00999999977 : f32
    %486 = vector.broadcast %cst_158 : f32 to vector<24x32xf32>
    %487 = arith.mulf %486, %483 : vector<24x32xf32>
    %488 = arith.select %485, %483, %487 : vector<24x32xi1>, vector<24x32xf32>
    %489 = arith.addf %488, %480 : vector<24x32xf32>
    %cst_159 = arith.constant dense<0.000000e+00> : vector<24x4xf32>
    %490 = tpu.matmul %489, %64, %cst_159 {dimension_numbers = #tpu.dot_dimension_numbers<[1], [0], [0], [1], [0, 0, 1, 1], [], []>} : vector<24x32xf32>, vector<32x4xf32>, vector<24x4xf32> -> vector<24x4xf32>
    %491 = vector.broadcast %65 : vector<1x4xf32> to vector<24x4xf32>
    %492 = arith.addf %490, %491 : vector<24x4xf32>
    %c0_160 = arith.constant 0 : index
    %493 = arith.index_cast %478 : i32 to index
    %c0_161 = arith.constant 0 : index
    %494 = vector.load %arg20[%c0_160, %493, %c0_161] : memref<1x88x4xf32, #tpu.memory_space<vmem>>, vector<1x24x4xf32>
    %495 = vector.shape_cast %494 : vector<1x24x4xf32> to vector<24x4xf32>
    %496 = vector.shape_cast %492 : vector<24x4xf32> to vector<1x24x4xf32>
    tpu.vector_store %arg20[%c0_160, %493, %c0_161], %496 {strides = array<i32>} : memref<1x88x4xf32, #tpu.memory_space<vmem>>, vector<1x24x4xf32>,
    %c3_i32_162 = arith.constant 3 : i32
    %c64 = arith.constant 64 : index
    %c0_163 = arith.constant 0 : index
    %497 = vector.load %arg22[%c64, %c0_163] : memref<88x32xf32, #tpu.memory_space<vmem>>, vector<24x32xf32>
    %cst_164 = arith.constant dense<0.000000e+00> : vector<24x32xf32>
    %498 = tpu.matmul %497, %62, %cst_164 {dimension_numbers = #tpu.dot_dimension_numbers<[1], [0], [0], [1], [0, 0, 1, 1], [], []>} : vector<24x32xf32>, vector<32x32xf32>, vector<24x32xf32> -> vector<24x32xf32>
    %499 = vector.broadcast %63 : vector<1x32xf32> to vector<24x32xf32>
    %500 = arith.addf %498, %499 : vector<24x32xf32>
    %cst_165 = arith.constant 0.000000e+00 : f32
    %501 = vector.broadcast %cst_165 : f32 to vector<24x32xf32>
    %502 = arith.cmpf ogt, %500, %501 : vector<24x32xf32>
    %cst_166 = arith.constant 0.00999999977 : f32
    %503 = vector.broadcast %cst_166 : f32 to vector<24x32xf32>
    %504 = arith.mulf %503, %500 : vector<24x32xf32>
    %505 = arith.select %502, %500, %504 : vector<24x32xi1>, vector<24x32xf32>
    %506 = arith.addf %505, %497 : vector<24x32xf32>
    %cst_167 = arith.constant dense<0.000000e+00> : vector<24x4xf32>
    %507 = tpu.matmul %506, %64, %cst_167 {dimension_numbers = #tpu.dot_dimension_numbers<[1], [0], [0], [1], [0, 0, 1, 1], [], []>} : vector<24x32xf32>, vector<32x4xf32>, vector<24x4xf32> -> vector<24x4xf32>
    %508 = vector.broadcast %65 : vector<1x4xf32> to vector<24x4xf32>
    %509 = arith.addf %507, %508 : vector<24x4xf32>
    %c0_168 = arith.constant 0 : index
    %c64_169 = arith.constant 64 : index
    %c0_170 = arith.constant 0 : index
    %510 = vector.load %arg20[%c0_168, %c64_169, %c0_170] : memref<1x88x4xf32, #tpu.memory_space<vmem>>, vector<1x24x4xf32>
    %511 = vector.shape_cast %510 : vector<1x24x4xf32> to vector<24x4xf32>
    %512 = vector.shape_cast %509 : vector<24x4xf32> to vector<1x24x4xf32>
    tpu.vector_store %arg20[%c0_168, %c64_169, %c0_170], %512 {strides = array<i32>} : memref<1x88x4xf32, #tpu.memory_space<vmem>>, vector<1x24x4xf32>,
    return
  }
  func.func @transform_0(%arg0: i32) -> (i32, i32, i32) {
    %c0_i32 = arith.constant 0 : i32
    %c0_i32_0 = arith.constant 0 : i32
    %c0_i32_1 = arith.constant 0 : i32
    return %arg0, %c0_i32, %c0_i32_0 : i32, i32, i32
  }
  func.func @transform_1(%arg0: i32) -> (i32, i32) {
    %c0_i32 = arith.constant 0 : i32
    %c0_i32_0 = arith.constant 0 : i32
    %c0_i32_1 = arith.constant 0 : i32
    return %c0_i32, %c0_i32_0 : i32, i32
  }
  func.func @transform_2(%arg0: i32) -> (i32, i32) {
    %c0_i32 = arith.constant 0 : i32
    %c0_i32_0 = arith.constant 0 : i32
    %c0_i32_1 = arith.constant 0 : i32
    return %c0_i32, %c0_i32_0 : i32, i32
  }
  func.func @transform_3(%arg0: i32) -> (i32, i32) {
    %c0_i32 = arith.constant 0 : i32
    %c0_i32_0 = arith.constant 0 : i32
    %c0_i32_1 = arith.constant 0 : i32
    return %c0_i32, %c0_i32_0 : i32, i32
  }
  func.func @transform_4(%arg0: i32) -> (i32, i32) {
    %c0_i32 = arith.constant 0 : i32
    %c0_i32_0 = arith.constant 0 : i32
    %c0_i32_1 = arith.constant 0 : i32
    return %c0_i32, %c0_i32_0 : i32, i32
  }
  func.func @transform_5(%arg0: i32) -> (i32, i32) {
    %c0_i32 = arith.constant 0 : i32
    %c0_i32_0 = arith.constant 0 : i32
    %c0_i32_1 = arith.constant 0 : i32
    return %c0_i32, %c0_i32_0 : i32, i32
  }
  func.func @transform_6(%arg0: i32) -> (i32, i32) {
    %c0_i32 = arith.constant 0 : i32
    %c0_i32_0 = arith.constant 0 : i32
    %c0_i32_1 = arith.constant 0 : i32
    return %c0_i32, %c0_i32_0 : i32, i32
  }
  func.func @transform_7(%arg0: i32) -> (i32, i32) {
    %c0_i32 = arith.constant 0 : i32
    %c0_i32_0 = arith.constant 0 : i32
    %c0_i32_1 = arith.constant 0 : i32
    return %c0_i32, %c0_i32_0 : i32, i32
  }
  func.func @transform_8(%arg0: i32) -> (i32, i32) {
    %c0_i32 = arith.constant 0 : i32
    %c0_i32_0 = arith.constant 0 : i32
    %c0_i32_1 = arith.constant 0 : i32
    return %c0_i32, %c0_i32_0 : i32, i32
  }
  func.func @transform_9(%arg0: i32) -> (i32, i32) {
    %c0_i32 = arith.constant 0 : i32
    %c0_i32_0 = arith.constant 0 : i32
    %c0_i32_1 = arith.constant 0 : i32
    return %c0_i32, %c0_i32_0 : i32, i32
  }
  func.func @transform_10(%arg0: i32) -> (i32, i32) {
    %c0_i32 = arith.constant 0 : i32
    %c0_i32_0 = arith.constant 0 : i32
    %c0_i32_1 = arith.constant 0 : i32
    return %c0_i32, %c0_i32_0 : i32, i32
  }
  func.func @transform_11(%arg0: i32) -> (i32, i32) {
    %c0_i32 = arith.constant 0 : i32
    %c0_i32_0 = arith.constant 0 : i32
    %c0_i32_1 = arith.constant 0 : i32
    return %c0_i32, %c0_i32_0 : i32, i32
  }
  func.func @transform_12(%arg0: i32) -> (i32, i32) {
    %c0_i32 = arith.constant 0 : i32
    %c0_i32_0 = arith.constant 0 : i32
    %c0_i32_1 = arith.constant 0 : i32
    return %c0_i32, %c0_i32_0 : i32, i32
  }
  func.func @transform_13(%arg0: i32) -> (i32, i32) {
    %c0_i32 = arith.constant 0 : i32
    %c0_i32_0 = arith.constant 0 : i32
    %c0_i32_1 = arith.constant 0 : i32
    return %c0_i32, %c0_i32_0 : i32, i32
  }
  func.func @transform_14(%arg0: i32) -> (i32, i32) {
    %c0_i32 = arith.constant 0 : i32
    %c0_i32_0 = arith.constant 0 : i32
    %c0_i32_1 = arith.constant 0 : i32
    return %c0_i32, %c0_i32_0 : i32, i32
  }
  func.func @transform_15(%arg0: i32) -> (i32, i32) {
    %c0_i32 = arith.constant 0 : i32
    %c0_i32_0 = arith.constant 0 : i32
    %c0_i32_1 = arith.constant 0 : i32
    return %c0_i32, %c0_i32_0 : i32, i32
  }
  func.func @transform_16(%arg0: i32) -> (i32, i32) {
    %c0_i32 = arith.constant 0 : i32
    %c0_i32_0 = arith.constant 0 : i32
    %c0_i32_1 = arith.constant 0 : i32
    return %c0_i32, %c0_i32_0 : i32, i32
  }
  func.func @transform_17(%arg0: i32) -> (i32, i32) {
    %c0_i32 = arith.constant 0 : i32
    %c0_i32_0 = arith.constant 0 : i32
    %c0_i32_1 = arith.constant 0 : i32
    return %c0_i32, %c0_i32_0 : i32, i32
  }
  func.func @transform_18(%arg0: i32) -> (i32, i32) {
    %c0_i32 = arith.constant 0 : i32
    %c0_i32_0 = arith.constant 0 : i32
    %c0_i32_1 = arith.constant 0 : i32
    return %c0_i32, %c0_i32_0 : i32, i32
  }
  func.func @transform_19(%arg0: i32) -> (i32, i32, i32) {
    %c0_i32 = arith.constant 0 : i32
    %c0_i32_0 = arith.constant 0 : i32
    %c0_i32_1 = arith.constant 0 : i32
    return %arg0, %c0_i32, %c0_i32_0 : i32, i32, i32
  }
}

</mosaic_0001>

<bundles_post_ra>
// kernel: tpu_custom_call.1
= control target key start
LH: loop header
LB: loop body
LE: loop exit
PB: predicated region body
PF: predicated region fallthrough
CT: control target
= control target key end

     0   :  { %s5864_s0 = inlined_call_operand.vmem [shape: f32[1,64,40], index: 0, kind: input, shape index: {}]   ;;  %s5865_s1 = inlined_call_operand.vmem [shape: f32[40,8], index: 1, kind: input, shape index: {}]   ;;  %s5866_s2 = inlined_call_operand.vmem [shape: f32[1,8], index: 2, kind: input, shape index: {}]   ;;  %s5867_s3 = inlined_call_operand.vmem [shape: f32[8,32], index: 3, kind: input, shape index: {}]   ;;  %s5868_s4 = inlined_call_operand.vmem [shape: f32[1,32], index: 4, kind: input, shape index: {}]   ;;  %s5869_s5 = inlined_call_operand.vmem [shape: f32[32,32], index: 5, kind: input, shape index: {}]   ;;  %s5870_s6 = inlined_call_operand.vmem [shape: f32[1,32], index: 6, kind: input, shape index: {}]   ;;  %s5871_s7 = inlined_call_operand.vmem [shape: f32[1,32], index: 7, kind: input, shape index: {}]   ;;  %s5872_s8 = inlined_call_operand.vmem [shape: f32[1,32], index: 8, kind: input, shape index: {}]   ;;  %s5873_s9 = inlined_call_operand.vmem [shape: f32[32,512], index: 9, kind: input, shape index: {}]   ;;  %s5874_s10 = inlined_call_operand.hbm [shape: f32[32,512], index: 10, kind: input, shape index: {}]   ;;  %s5875_s11 = inlined_call_operand.vmem [shape: f32[1,512], index: 11, kind: input, shape index: {}]   ;;  %s5876_s12 = inlined_call_operand.hbm [shape: f32[32,512], index: 12, kind: input, shape index: {}]   ;;  %s5877_s13 = inlined_call_operand.hbm [shape: f32[32,512], index: 13, kind: input, shape index: {}]   ;;  %s5878_s14 = inlined_call_operand.vmem [shape: f32[1,512], index: 14, kind: input, shape index: {}]   ;;  %s5879_s15 = inlined_call_operand.vmem [shape: f32[32,32], index: 15, kind: input, shape index: {}]   ;;  %s5880_s16 = inlined_call_operand.vmem [shape: f32[1,32], index: 16, kind: input, shape index: {}]   ;;  %s5881_s17 = inlined_call_operand.vmem [shape: f32[32,4], index: 17, kind: input, shape index: {}]   ;;  %s5882_s18 = inlined_call_operand.vmem [shape: f32[1,4], index: 18, kind: input, shape index: {}]   ;;  %s5883_s19 = inlined_call_operand.vmem [shape: f32[1,88,4], index: 19, kind: output, shape index: {}]  }
   0x1   :  { %5886 = sst [smem:[#allocation11_spill]] %s5864_s0 }
   0x2   :  { %5887 = sst [smem:[#allocation12_spill]] %s5865_s1 }
   0x3   :  { %5888 = sst [smem:[#allocation13_spill]] %s5866_s2 }
   0x4   :  { %5889 = sst [smem:[#allocation14_spill]] %s5867_s3 }
   0x5   :  { %24 = vsyncpa [#allocation5], 0 }
   0x6   :  { %25 = vsyncpa [#allocation7], 0  ;;  %s4909_s0 = smov [#allocation6]   ;;  %s4910_s20 = smov [#allocation4]  }
   0x7   :  { %s65_s30 = sshll.u32 %s4909_s0, 4  ;;  %s51_s21 = sshll.u32 %s4910_s20, 4  ;;  %s66_s30 = int_to_ptr.vmem [resolvable:$true] %s65_s30  ;;  %s5017_s21 = int_to_ptr.vmem [resolvable:$true] %s51_s21 }
   0x8   :  { %s4839_s2 = scalar_lea.hbm %s5876_s12, 2048 }
   0x9   :  { %p4840_p0 = scmp.ne.s32.totalorder %s5876_s12, %s4839_s2  ;;  %p4843_p1 = scmp.lt.u32.totalorder %s4839_s2, %s5876_s12 }
   0xb   :  { %p4845_p2 = pnand %p4843_p1, %p4840_p0 }
   0xd   :  { %4848 = shalt.err (!%p4845_p2)
}
   0xe   :  { %s4849_s26 = scalar_lea.vmem %s66_s30, 2048  ;;  %p4854_p4 = scmp.lt.s32.totalorder %s66_s30, %s66_s30 }
   0xf   :  { %p4850_p3 = scmp.ne.s32.totalorder %s66_s30, %s4849_s26  ;;  %p4855_p5 = scmp.lt.s32.totalorder %s4849_s26, %s4849_s26 }
  0x11   :  { %p4856_p6 = por %p4855_p5, %p4854_p4 }
  0x13   :  { %p4857_p7 = pnand %p4856_p6, %p4850_p3 }
  0x15   :  { %4860 = shalt.err (!%p4857_p7)
}
  0x16   :  { %s4911_s27 = smov 512   ;;  %s4912_s28 = smov 32  }
  0x17   :  { %71 = dma.hbm_to_vmem [thread:$0]  %s5876_s12, 2048, %s66_s30, [#allocation7], %s4911_s27, %s4911_s27, %s4912_s28  }
  0x18   :  { %s4861_s22 = scalar_lea.hbm %s5874_s10, 2048 }
  0x19   :  { %p4862_p8 = scmp.ne.s32.totalorder %s5874_s10, %s4861_s22  ;;  %p4865_p9 = scmp.lt.u32.totalorder %s4861_s22, %s5874_s10 }
  0x1b   :  { %p4867_p10 = pnand %p4865_p9, %p4862_p8 }
  0x1d   :  { %4870 = shalt.err (!%p4867_p10)
}
  0x1e   :  { %s4871_s3 = scalar_lea.vmem %s5017_s21, 2048  ;;  %p4876_p12 = scmp.lt.s32.totalorder %s5017_s21, %s5017_s21 }
  0x1f   :  { %p4872_p11 = scmp.ne.s32.totalorder %s5017_s21, %s4871_s3  ;;  %p4877_p13 = scmp.lt.s32.totalorder %s4871_s3, %s4871_s3 }
  0x21   :  { %p4878_p0 = por %p4877_p13, %p4876_p12 }
  0x23   :  { %p4879_p1 = pnand %p4878_p0, %p4872_p11 }
  0x25   :  { %4882 = shalt.err (!%p4879_p1)
}
  0x26   :  { %57 = dma.hbm_to_vmem [thread:$0]  %s5874_s10, 2048, %s5017_s21, [#allocation5], %s4911_s27, %s4911_s27, %s4912_s28  }
  0x27   :  { %s4913_s26 = smov [#allocation8]   ;;  %s4883_s1 = scalar_lea.hbm %s5877_s13, 2048 }
  0x28   :  { %s77_s29 = sshll.u32 %s4913_s26, 4  ;;  %p4884_p2 = scmp.ne.s32.totalorder %s5877_s13, %s4883_s1  ;;  %s78_s29 = int_to_ptr.vmem [resolvable:$true] %s77_s29 }
  0x29   :  { %p4887_p3 = scmp.lt.u32.totalorder %s4883_s1, %s5877_s13 }
  0x2b   :  { %p4889_p4 = pnand %p4887_p3, %p4884_p2 }
  0x2d   :  { %4892 = shalt.err (!%p4889_p4)
}
  0x2e   :  { %s4893_s25 = scalar_lea.vmem %s78_s29, 2048  ;;  %p4898_p6 = scmp.lt.s32.totalorder %s78_s29, %s78_s29 }
  0x2f   :  { %p4894_p5 = scmp.ne.s32.totalorder %s78_s29, %s4893_s25  ;;  %p4899_p7 = scmp.lt.s32.totalorder %s4893_s25, %s4893_s25 }
  0x31   :  { %p4900_p8 = por %p4899_p7, %p4898_p6 }
  0x33   :  { %p4901_p9 = pnand %p4900_p8, %p4894_p5 }
  0x35   :  { %4904 = shalt.err (!%p4901_p9)
}
  0x36   :  { %83 = dma.hbm_to_vmem [thread:$0]  %s5877_s13, 2048, %s78_s29, [#allocation7], %s4911_s27, %s4911_s27, %s4912_s28  }
  0x37   :  { %4905 = dma.done.wait [#allocation5], 2048  }
  0x38   :  { %4906 = vsyncadd [#allocation5], 4294965248 }
  0x39   :  { %4907 = dma.done.wait [#allocation7], 4096  }
  0x3a   :  { %4908 = vsyncadd [#allocation7], 4294963200  ;;  %vm123_vm0 = vcmask 326656   ;;  %s5890_s30 = sld [smem:[#allocation12_spill]]  ;;  %s5891_s29 = sld [smem:[#allocation11_spill]]  ;;  %v399_v16 = vld [vmem:[%s5869_s5] sm:$0xff] }
  0x3b   :  { %s5892_s23 = sld [smem:[#allocation14_spill]]  ;;  %v400_v17 = vld [vmem:[%s5869_s5 + $0x8] sm:$0xff]  ;;  %s5893_s12 = sld [smem:[#allocation13_spill]]  ;;  %v401_v24 = vld [vmem:[%s5869_s5 + $0x10] sm:$0xff]  ;;  %v402_v25 = vld [vmem:[%s5869_s5 + $0x18] sm:$0xff]  ;;  %vm269_vm1 = vcmask 64512  }
  0x3c   :  { %v4323_v18 = vpack.c.bf16 %v400_v17, %v399_v16  ;;  %v4327_v31 = vpack.c.bf16 %v402_v25, %v401_v24  ;;  %v3912_v47 = vld [vmem:[%s5868_s4] ss:$0 sm:$0xff]  ;;  %vm410_vm2 = vcmask 261120   ;;  %vm4916_vm11 = vmmov 0  }
  0x3d   :  { %vm2954_vm15 = vcmask 31744  }
  0x40   :  { %v111_v0 = vld [vmem:[%s5890_s30] sm:$0xff]  ;;  %v112_v1 = vld [vmem:[%s5890_s30 + $0x8] sm:$0xff]  ;;  %v113_v2 = vld [vmem:[%s5890_s30 + $0x10] sm:$0xff] }
  0x41   :  { %v4315_v3 = vpack.c.bf16 %v112_v1, %v111_v0  ;;  %v114_v4 = vld [vmem:[%s5890_s30 + $0x18] sm:$0xff]  ;;  %v103_v5 = vld [vmem:[%s5891_s29] sm:$0xff]  ;;  %v104_v8 = vld [vmem:[%s5891_s29 + $0x8] sm:$0xff] }
  0x42   :  { %v4319_v6 = vpack.c.bf16 %v114_v4, %v113_v2  ;;  %4133 = vmatprep.mubr.msk.f32.mxu0 %vm123_vm0, %v103_v5  ;;  %v115_v7 = vld [vmem:[%s5890_s30 + $0x20] sm:$0xff]  ;;  %v105_v9 = vld [vmem:[%s5891_s29 + $0x10] sm:$0xff]  ;;  %v106_v10 = vld [vmem:[%s5891_s29 + $0x18] sm:$0xff] }
  0x43   :  { %4316 = vmatprep.subr.bf16.mxu0 %v4315_v3  ;;  %v107_v11 = vld [vmem:[%s5891_s29 + $0x20] sm:$0xff]  ;;  %v108_v12 = vld [vmem:[%s5891_s29 + $0x28] sm:$0xff]  ;;  %v109_v13 = vld [vmem:[%s5891_s29 + $0x30] sm:$0xff] }
  0x44   :  { %4318 = vmatpush3.bf16.msra.mxu0 %v4315_v3  ;;  %v110_v14 = vld [vmem:[%s5891_s29 + $0x38] sm:$0xff]  ;;  %v261_v15 = vld [vmem:[%s5892_s23] sm:$0xff] }
  0x45   :  { %4320 = vmatprep.subr.bf16.mxu0 %v4319_v6  ;;  %4145 = vmatprep.subr.mxu1 %v261_v15  ;;  %v3903_v19 = vld [vmem:[%s5893_s12] ss:$0 sm:$0xff] }
  0x46   :  { %4146 = vmatpush3.msra.mxu1 %v261_v15  ;;  %v3921_v0 = vld [vmem:[%s5870_s6] ss:$0 sm:$0xff] }
  0x47   :  { %4324 = vmatprep.subr.bf16.mxu1 %v4323_v18 }
  0x48   :  { %4322 = vmatpush3.bf16.msra.mxu0 %v4319_v6 }
  0x49   :  { %4131 = vmatprep.subr.mxu0 %v115_v7 }
  0x4c   :  { %4132 = vmatpush3.msra.mxu0 %v115_v7 }
  0x4d   :  { %4134 = vmatmul.mubr.msk.f32.vlgmr.msra.gmra.mrb[0].mxu0 %vm123_vm0, %v104_v8 }
  0x4e   :  { %4136 = vmatprep.mubr.msk.f32.mxu0 %vm123_vm0, %v105_v9 }
  0x51   :  { %4137 = vmatmul.mubr.msk.f32.gmra.mrb[2].mxu0 %vm123_vm0, %v106_v10 }
  0x52   :  { %4139 = vmatprep.mubr.msk.f32.mxu0 %vm123_vm0, %v107_v11 }
  0x55   :  { %4140 = vmatmul.mubr.msk.f32.gmra.mrb[4].mxu0 %vm123_vm0, %v108_v12 }
  0x56   :  { %4142 = vmatprep.mubr.msk.f32.mxu0 %vm123_vm0, %v109_v13 }
  0x59   :  { %4143 = vmatmul.mubr.msk.f32.gmra.mrb[6].mxu0 %vm123_vm0, %v110_v14 }
 0x120   :  { %v4135_v20 = vpop.f32.mrb[0].mxu0 }
 0x121   :  { %v220_v21 = vadd.f32 %v4135_v20, %v3903_v19  ;;  %v214_v22 = vpop.f32.mrb[1].mxu0 }
 0x122   :  { %v215_v23 = vadd.f32 %v3903_v19, %v214_v22 }
 0x123   :  { %v254_v28 = vadd.f32 %v220_v21, %v104_v8 }
 0x124   :  { %v4138_v26 = vpop.f32.mrb[2].mxu0  ;;  %v253_v27 = vadd.f32 %v215_v23, %v103_v5 }
 0x125   :  { %v230_v29 = vadd.f32 %v4138_v26, %v3903_v19  ;;  %v224_v30 = vpop.f32.mrb[3].mxu0 }
 0x126   :  { %v225_v32 = vadd.f32 %v3903_v19, %v224_v30  ;;  %4147 = vmatprep.mubr.msk.f32.mxu1 %vm269_vm1, %v253_v27 }
 0x127   :  { %v256_v33 = vadd.f32 %v230_v29, %v106_v10  ;;  %4148 = vmatmul.mubr.msk.f32.vlgmr.msra.gmra.mrb[0].mxu1 %vm269_vm1, %v254_v28 }
 0x128   :  { %v255_v34 = vadd.f32 %v225_v32, %v105_v9  ;;  %v4141_v35 = vpop.f32.mrb[4].mxu0  ;;  %4326 = vmatpush3.bf16.msra.mxu1 %v4323_v18 }
 0x129   :  { %v240_v36 = vadd.f32 %v4141_v35, %v3903_v19  ;;  %v234_v37 = vpop.f32.mrb[5].mxu0  ;;  %4328 = vmatprep.subr.bf16.mxu1 %v4327_v31 }
 0x12a   :  { %v235_v38 = vadd.f32 %v3903_v19, %v234_v37  ;;  %4150 = vmatprep.mubr.msk.f32.mxu1 %vm269_vm1, %v255_v34 }
 0x12b   :  { %v258_v39 = vadd.f32 %v240_v36, %v108_v12  ;;  %4151 = vmatmul.mubr.msk.f32.gmra.mrb[2].mxu1 %vm269_vm1, %v256_v33 }
 0x12c   :  { %v257_v40 = vadd.f32 %v235_v38, %v107_v11  ;;  %v4144_v41 = vpop.f32.mrb[6].mxu0  ;;  %4330 = vmatpush3.bf16.msra.mxu1 %v4327_v31 }
 0x12d   :  { %v250_v42 = vadd.f32 %v4144_v41, %v3903_v19  ;;  %v244_v43 = vpop.f32.mrb[7].mxu0 }
 0x12e   :  { %v245_v44 = vadd.f32 %v3903_v19, %v244_v43  ;;  %4153 = vmatprep.mubr.msk.f32.mxu1 %vm269_vm1, %v257_v40 }
 0x12f   :  { %v260_v45 = vadd.f32 %v250_v42, %v110_v14  ;;  %4154 = vmatmul.mubr.msk.f32.gmra.mrb[4].mxu1 %vm269_vm1, %v258_v39 }
 0x130   :  { %v259_v46 = vadd.f32 %v245_v44, %v109_v13 }
 0x132   :  { %4156 = vmatprep.mubr.msk.f32.mxu1 %vm269_vm1, %v259_v46 }
 0x133   :  { %4157 = vmatmul.mubr.msk.f32.gmra.mrb[6].mxu1 %vm269_vm1, %v260_v45 }
 0x1fa   :  { %v4149_v48 = vpop.f32.mrb[0].mxu1 }
 0x1fb   :  { %v360_v49 = vpop.f32.mrb[1].mxu1  ;;  %v366_v51 = vadd.f32 %v4149_v48, %v3912_v47 }
 0x1fc   :  { %v361_v50 = vadd.f32 %v3912_v47, %v360_v49 }
 0x1fe   :  { %v4152_v52 = vpop.f32.mrb[2].mxu1  ;;  %4167 = vmatprep.mubr.msk.f32.mxu1 %vm410_vm2, %v361_v50 }
 0x1ff   :  { %v376_v53 = vadd.f32 %v4152_v52, %v3912_v47  ;;  %v370_v54 = vpop.f32.mrb[3].mxu1  ;;  %4168 = vmatmul.mubr.msk.f32.vlgmr.msra.gmra.mrb[8].mxu1 %vm410_vm2, %v366_v51 }
 0x200   :  { %v371_v55 = vadd.f32 %v3912_v47, %v370_v54 }
 0x202   :  { %v4155_v56 = vpop.f32.mrb[4].mxu1  ;;  %4170 = vmatprep.mubr.msk.f32.mxu1 %vm410_vm2, %v371_v55 }
 0x203   :  { %v5148_v57 = vadd.f32 %v4155_v56, %v3912_v47  ;;  %v380_v58 = vpop.f32.mrb[5].mxu1  ;;  %4171 = vmatmul.mubr.msk.f32.gmra.mrb[10].mxu1 %vm410_vm2, %v376_v53 }
 0x204   :  { %v381_v59 = vadd.f32 %v3912_v47, %v380_v58 }
 0x206   :  { %v4158_v60 = vpop.f32.mrb[6].mxu1  ;;  %4173 = vmatprep.mubr.msk.f32.mxu1 %vm410_vm2, %v381_v59 }
 0x207   :  { %v5152_v61 = vadd.f32 %v4158_v60, %v3912_v47  ;;  %v390_v62 = vpop.f32.mrb[7].mxu1  ;;  %4174 = vmatmul.mubr.msk.f32.gmra.mrb[12].mxu1 %vm410_vm2, %v5148_v57 }
 0x208   :  { %v391_v63 = vadd.f32 %v3912_v47, %v390_v62 }
 0x20a   :  { %4176 = vmatprep.mubr.msk.f32.mxu1 %vm410_vm2, %v391_v63 }
 0x20b   :  { %4177 = vmatmul.mubr.msk.f32.gmra.mrb[14].mxu1 %vm410_vm2, %v5152_v61 }
 0x2d2   :  { %v4169_v1 = vpop.f32.mrb[8].mxu1 }
 0x2d3   :  { %v507_v2 = vadd.f32 %v4169_v1, %v3921_v0  ;;  %v501_v3 = vpop.f32.mrb[9].mxu1 }
 0x2d4   :  { %v502_v4 = vadd.f32 %v3921_v0, %v501_v3 }
 0x2d5   :  { %vm541_vm3 = vcmp.gt.f32.partialorder %v507_v2, 0.0  ;;  %v549_v5 = vmul.f32 0.01, %v507_v2 }
 0x2d6   :  { %v548_v6 = vmul.f32 0.01, %v502_v4  ;;  %v4172_v7 = vpop.f32.mrb[10].mxu1  ;;  %vm540_vm4 = vcmp.gt.f32.partialorder %v502_v4, 0.0 }
 0x2d7   :  { %v517_v8 = vadd.f32 %v4172_v7, %v3921_v0  ;;  %v511_v9 = vpop.f32.mrb[11].mxu1  ;;  %v557_v12 = vsel %vm541_vm3, %v507_v2, %v549_v5 }
 0x2d8   :  { %v512_v10 = vadd.f32 %v3921_v0, %v511_v9  ;;  %v556_v11 = vsel %vm540_vm4, %v502_v4, %v548_v6  ;;  %v565_v20 = vadd.f32 %v557_v12, %v366_v51 }
 0x2d9   :  { %vm543_vm5 = vcmp.gt.f32.partialorder %v517_v8, 0.0  ;;  %v551_v13 = vmul.f32 0.01, %v517_v8  ;;  %v564_v14 = vadd.f32 %v556_v11, %v361_v50 }
 0x2da   :  { %v550_v15 = vmul.f32 0.01, %v512_v10  ;;  %v4175_v16 = vpop.f32.mrb[12].mxu1  ;;  %vm542_vm6 = vcmp.gt.f32.partialorder %v512_v10, 0.0  ;;  %v575_v31 = vsel %vm410_vm2, %v565_v20, 0.0 }
 0x2db   :  { %v527_v17 = vadd.f32 %v4175_v16, %v3921_v0  ;;  %v521_v18 = vpop.f32.mrb[13].mxu1  ;;  %v572_v19 = vsel %vm410_vm2, %v564_v14, 0.0  ;;  %v559_v23 = vsel %vm543_vm5, %v517_v8, %v551_v13 }
 0x2dc   :  { %v522_v21 = vadd.f32 %v3921_v0, %v521_v18  ;;  %573 = vadd.xlane.f32.xlu0 %v572_v19  ;;  %v558_v22 = vsel %vm542_vm6, %v512_v10, %v550_v15  ;;  %v567_v32 = vadd.f32 %v559_v23, %v376_v53 }
 0x2dd   :  { %vm545_vm7 = vcmp.gt.f32.partialorder %v527_v17, 0.0  ;;  %v553_v24 = vmul.f32 0.01, %v527_v17  ;;  %v566_v25 = vadd.f32 %v558_v22, %v371_v55 }
 0x2de   :  { %vm544_vm8 = vcmp.gt.f32.partialorder %v522_v21, 0.0  ;;  %v552_v26 = vmul.f32 0.01, %v522_v21  ;;  %v4178_v27 = vpop.f32.mrb[14].mxu1  ;;  %v581_v39 = vsel %vm410_vm2, %v567_v32, 0.0 }
 0x2df   :  { %v537_v28 = vadd.f32 %v4178_v27, %v3921_v0  ;;  %v531_v29 = vpop.f32.mrb[15].mxu1  ;;  %v578_v30 = vsel %vm410_vm2, %v566_v25, 0.0  ;;  %v561_v35 = vsel %vm545_vm7, %v527_v17, %v553_v24  ;;  %v710_v27 = vld [vmem:[%s5873_s9 + $0x18] sm:$0xff] }
 0x2e0   :  { %v532_v33 = vadd.f32 %v3921_v0, %v531_v29  ;;  %579 = vadd.xlane.f32.xlu1 %v578_v30  ;;  %576 = vadd.xlane.f32.xlu0 %v575_v31  ;;  %v560_v34 = vsel %vm544_vm8, %v522_v21, %v552_v26  ;;  %v569_v41 = vadd.f32 %v561_v35, %v5148_v57  ;;  %v712_v26 = vld [vmem:[%s5873_s9 + $0x28] sm:$0xff]  ;;  %v707_v29 = vld [vmem:[%s5873_s9] sm:$0xff]  ;;  %v714_v31 = vld [vmem:[%s5873_s9 + $0x38] sm:$0xff] }
 0x2e1   :  { %vm547_vm9 = vcmp.gt.f32.partialorder %v537_v28, 0.0  ;;  %v555_v36 = vmul.f32 0.01, %v537_v28  ;;  %v568_v37 = vadd.f32 %v560_v34, %v381_v59  ;;  %v711_v30 = vld [vmem:[%s5873_s9 + $0x20] sm:$0xff]  ;;  %v709_v34 = vld [vmem:[%s5873_s9 + $0x10] sm:$0xff] }
 0x2e2   :  { %vm546_vm10 = vcmp.gt.f32.partialorder %v532_v33, 0.0  ;;  %v554_v38 = vmul.f32 0.01, %v532_v33  ;;  %v587_v45 = vsel %vm410_vm2, %v569_v41, 0.0  ;;  %v713_v35 = vld [vmem:[%s5873_s9 + $0x30] sm:$0xff] }
 0x2e3   :  { %v584_v40 = vsel %vm410_vm2, %v568_v37, 0.0  ;;  %v563_v43 = vsel %vm547_vm9, %v537_v28, %v555_v36  ;;  %v4341_v36 = vpack.c.bf16 %v713_v35, %v709_v34 }
 0x2e4   :  { %582 = vadd.xlane.f32.xlu1 %v581_v39  ;;  %585 = vadd.xlane.f32.xlu0 %v584_v40  ;;  %v562_v42 = vsel %vm546_vm10, %v532_v33, %v554_v38  ;;  %v571_v47 = vadd.f32 %v563_v43, %v5152_v61  ;;  %v4339_v33 = vpack.c.bf16 %v714_v31, %v710_v27  ;;  %v720_v38 = vld [vmem:[%s5873_s9 + $0x68] sm:$0xff]  ;;  %v718_v39 = vld [vmem:[%s5873_s9 + $0x58] sm:$0xff]  ;;  %v1036_v27 = vld [vmem:[#allocation4 + $0x48] sm:$0xff] }
 0x2e5   :  { %v570_v44 = vadd.f32 %v562_v42, %v391_v63  ;;  %v719_v42 = vld [vmem:[%s5873_s9 + $0x60] sm:$0xff]  ;;  %v722_v43 = vld [vmem:[%s5873_s9 + $0x78] sm:$0xff]  ;;  %v1033_v31 = vld [vmem:[#allocation4 + $0x30] sm:$0xff] }
 0x2e6   :  { %v593_v48 = vsel %vm410_vm2, %v571_v47, 0.0  ;;  %4340 = vmatprep.subr.bf16.mxu1 %v4339_v33 }
 0x2e7   :  { %v590_v46 = vsel %vm410_vm2, %v570_v44, 0.0  ;;  %4342 = vmatpush1.bf16.msra.mxu1 %v4341_v36 }
 0x2e8   :  { %588 = vadd.xlane.f32.xlu1 %v587_v45  ;;  %591 = vadd.xlane.f32.xlu0 %v590_v46  ;;  %v4343_v45 = vpack.c.bf16 %v722_v43, %v718_v39  ;;  %v717_v46 = vld [vmem:[%s5873_s9 + $0x50] sm:$0xff] }
 0x2ea   :  { %4344 = vmatprep.subr.bf16.mxu1 %v4343_v45 }
 0x2ec   :  { %594 = vadd.xlane.f32.xlu1 %v593_v48 }
 0x369   :  { %v574_v49 = vpop.xlane.xlu0 %573 }
 0x36a   :  { %v597_v50 = vmul.f32 0.03125, %v574_v49  ;;  %v1028_v49 = vld [vmem:[#allocation4 + $0x8] sm:$0xff] }
 0x36c   :  { %v5172_v51 = vsub.f32 %v564_v14, %v597_v50  ;;  %v1032_v50 = vld [vmem:[#allocation4 + $0x28] sm:$0xff] }
 0x36d   :  { %v580_v52 = vpop.xlane.xlu1 %579  ;;  %v577_v53 = vpop.xlane.xlu0 %576 }
 0x36e   :  { %v599_v54 = vmul.f32 0.03125, %v580_v52  ;;  %v598_v55 = vmul.f32 0.03125, %v577_v53  ;;  %v613_v56 = vmul.f32 %v5172_v51, %v5172_v51  ;;  %v4914_v52 = vmov 0.0  }
 0x36f   :  { %833 = vmatprep.mubr.f32.mxu0 %v4914_v52  ;;  %946 = vmatprep.mubr.f32.mxu1 %v4914_v52  ;;  %v5262_v53 = vpack.c.bf16 %v1032_v50, %v1028_v49 }
 0x370   :  { %v5176_v57 = vsub.f32 %v566_v25, %v599_v54  ;;  %v5178_v58 = vsub.f32 %v565_v20, %v598_v55  ;;  %v621_v59 = vsel %vm410_vm2, %v613_v56, 0.0  ;;  %v708_v25 = vld [vmem:[%s5873_s9 + $0x8] sm:$0xff]  ;;  %v1030_v54 = vld [vmem:[#allocation4 + $0x18] sm:$0xff] }
 0x371   :  { %v583_v60 = vpop.xlane.xlu1 %582  ;;  %622 = vadd.xlane.f32.xlu0 %v621_v59  ;;  %v586_v61 = vpop.xlane.xlu0 %585  ;;  %v4331_v28 = vpack.c.bf16 %v712_v26, %v708_v25  ;;  %v1034_v55 = vld [vmem:[#allocation4 + $0x38] sm:$0xff]  ;;  %v1031_v25 = vld [vmem:[#allocation4 + $0x20] sm:$0xff]  ;;  %v5277_v26 = vld [vmem:[%s5872_s8] ss:$0 sm:$0xff] }
 0x372   :  { %v600_v62 = vmul.f32 0.03125, %v583_v60  ;;  %v601_v63 = vmul.f32 0.03125, %v586_v61  ;;  %v615_v0 = vmul.f32 %v5176_v57, %v5176_v57  ;;  %v614_v1 = vmul.f32 %v5178_v58, %v5178_v58 }
 0x373   :  { %4332 = vmatprep.subr.bf16.mxu0 %v4331_v28  ;;  %v5265_v56 = vpack.c.bf16 %v1034_v55, %v1030_v54  ;;  %v1040_v28 = vld [vmem:[#allocation4 + $0x68] sm:$0xff] }
 0x374   :  { %v5185_v2 = vsub.f32 %v567_v32, %v600_v62  ;;  %v5187_v3 = vsub.f32 %v568_v37, %v601_v63  ;;  %v627_v4 = vsel %vm410_vm2, %v615_v0, 0.0  ;;  %v624_v5 = vsel %vm410_vm2, %v614_v1, 0.0  ;;  %v716_v37 = vld [vmem:[%s5873_s9 + $0x48] sm:$0xff] }
 0x375   :  { %v589_v6 = vpop.xlane.xlu1 %588  ;;  %628 = vadd.xlane.f32.xlu0 %v627_v4  ;;  %625 = vadd.xlane.f32.xlu1 %v624_v5  ;;  %v592_v7 = vpop.xlane.xlu0 %591  ;;  %v4333_v32 = vpack.c.bf16 %v711_v30, %v707_v29  ;;  %v4335_v40 = vpack.c.bf16 %v720_v38, %v716_v37  ;;  %v1029_v30 = vld [vmem:[#allocation4 + $0x10] sm:$0xff]  ;;  %v5284_v39 = vpack.c.bf16 %v1040_v28, %v1036_v27 }
 0x376   :  { %v602_v8 = vmul.f32 0.03125, %v589_v6  ;;  %v603_v9 = vmul.f32 0.03125, %v592_v7  ;;  %v616_v10 = vmul.f32 %v5185_v2, %v5185_v2  ;;  %v617_v11 = vmul.f32 %v5187_v3, %v5187_v3 }
 0x377   :  { %4334 = vmatpush1.bf16.msra.mxu0 %v4333_v32 }
 0x378   :  { %v5195_v12 = vsub.f32 %v569_v41, %v602_v8  ;;  %v5197_v13 = vsub.f32 %v570_v44, %v603_v9  ;;  %v630_v14 = vsel %vm410_vm2, %v616_v10, 0.0  ;;  %v633_v15 = vsel %vm410_vm2, %v617_v11, 0.0  ;;  %v715_v41 = vld [vmem:[%s5873_s9 + $0x40] sm:$0xff]  ;;  %4336 = vmatprep.subr.bf16.mxu0 %v4335_v40  ;;  %v1039_v40 = vld [vmem:[#allocation4 + $0x60] sm:$0xff] }
 0x379   :  { %v595_v16 = vpop.xlane.xlu1 %594  ;;  %631 = vadd.xlane.f32.xlu1 %v630_v14  ;;  %634 = vadd.xlane.f32.xlu0 %v633_v15  ;;  %v4337_v44 = vpack.c.bf16 %v719_v42, %v715_v41  ;;  %v1038_v41 = vld [vmem:[#allocation4 + $0x58] sm:$0xff] }
 0x37a   :  { %v604_v17 = vmul.f32 0.03125, %v595_v16  ;;  %v618_v18 = vmul.f32 %v5195_v12, %v5195_v12  ;;  %v619_v19 = vmul.f32 %v5197_v13, %v5197_v13  ;;  %v1042_v42 = vld [vmem:[#allocation4 + $0x78] sm:$0xff] }
 0x37b   :  { %4338 = vmatpush1.bf16.msra.mxu0 %v4337_v44  ;;  %v5287_v44 = vpack.c.bf16 %v1033_v31, %v1029_v30 }
 0x37c   :  { %v5205_v20 = vsub.f32 %v571_v47, %v604_v17  ;;  %v636_v21 = vsel %vm410_vm2, %v618_v18, 0.0  ;;  %v639_v22 = vsel %vm410_vm2, %v619_v19, 0.0  ;;  %v721_v47 = vld [vmem:[%s5873_s9 + $0x70] sm:$0xff]  ;;  %4348 = vmatprep.subr.bf16.mxu0 %v5262_v53  ;;  %v5271_v18 = vld [vmem:[%s5871_s7] ss:$0 sm:$0xff] }
 0x37d   :  { %637 = vadd.xlane.f32.xlu1 %v636_v21  ;;  %640 = vadd.xlane.f32.xlu0 %v639_v22  ;;  %v4345_v48 = vpack.c.bf16 %v721_v47, %v717_v46  ;;  %v1037_v46 = vld [vmem:[#allocation4 + $0x50] sm:$0xff] }
 0x37e   :  { %v620_v23 = vmul.f32 %v5205_v20, %v5205_v20  ;;  %v1041_v47 = vld [vmem:[#allocation4 + $0x70] sm:$0xff] }
 0x37f   :  { %4346 = vmatpush1.bf16.msra.mxu1 %v4345_v48 }
 0x380   :  { %v642_v24 = vsel %vm410_vm2, %v620_v23, 0.0  ;;  %4356 = vmatprep.subr.bf16.mxu1 %v5265_v56 }
 0x381   :  { %643 = vadd.xlane.f32.xlu1 %v642_v24  ;;  %v1027_v24 = vld [vmem:[#allocation4] sm:$0xff] }
 0x382   :  { %v5280_v35 = vpack.c.bf16 %v1031_v25, %v1027_v24 }
 0x3fe   :  { %v623_v59 = vpop.xlane.xlu0 %622 }
 0x3ff   :  { %v645_v60 = vmul.f32 0.03125, %v623_v59 }
 0x401   :  { %v653_v61 = vadd.f32 1e-05, %v645_v60  ;;  %v5304_v60 = vpack.c.bf16 %v1041_v47, %v1037_v46 }
 0x402   :  { %v626_v62 = vpop.xlane.xlu1 %625  ;;  %v629_v63 = vpop.xlane.xlu0 %628 }
 0x403   :  { %4647 = vrsqrt.f32 %v653_v61  ;;  %v646_v0 = vmul.f32 0.03125, %v626_v62  ;;  %v647_v1 = vmul.f32 0.03125, %v629_v63 }
 0x405   :  { %v654_v4 = vadd.f32 1e-05, %v646_v0  ;;  %v655_v5 = vadd.f32 1e-05, %v647_v1 }
 0x406   :  { %v632_v6 = vpop.xlane.xlu1 %631  ;;  %v635_v7 = vpop.xlane.xlu0 %634 }
 0x407   :  { %4649 = vrsqrt.f32 %v654_v4  ;;  %v648_v8 = vmul.f32 0.03125, %v632_v6  ;;  %v649_v9 = vmul.f32 0.03125, %v635_v7 }
 0x408   :  { %4651 = vrsqrt.f32 %v655_v5 }
 0x409   :  { %v656_v10 = vadd.f32 1e-05, %v648_v8  ;;  %v657_v11 = vadd.f32 1e-05, %v649_v9 }
 0x40a   :  { %v638_v14 = vpop.xlane.xlu1 %637  ;;  %v641_v15 = vpop.xlane.xlu0 %640 }
 0x40b   :  { %4653 = vrsqrt.f32 %v656_v10  ;;  %v650_v16 = vmul.f32 0.03125, %v638_v14  ;;  %v651_v21 = vmul.f32 0.03125, %v641_v15  ;;  %v725_v14 = vlaneseq }
 0x40c   :  { %4655 = vrsqrt.f32 %v657_v11 }
 0x40d   :  { %v4648_v17 = vpop.eup %4647  ;;  %v658_v19 = vadd.f32 1e-05, %v650_v16  ;;  %v659_v33 = vadd.f32 1e-05, %v651_v21  ;;  %v5366_v15 = vshrl.u32 %v725_v14, 7 }
 0x40e   :  { %v669_v22 = vmul.f32 %v4648_v17, %v5172_v51  ;;  %v644_v23 = vpop.xlane.xlu1 %643  ;;  %v1035_v51 = vld [vmem:[#allocation4 + $0x40] sm:$0xff]  ;;  %v723_v17 = vld [vmem:[%s5875_s11] sm:$0xf] }
 0x40f   :  { %4657 = vrsqrt.f32 %v658_v19  ;;  %v652_v34 = vmul.f32 0.03125, %v644_v23  ;;  %v5294_v49 = vpack.c.bf16 %v1039_v40, %v1035_v51  ;;  %v727_v16 = vsub.s32 0, %v5366_v15 }
 0x410   :  { %v684_v29 = vmul.f32 %v5271_v18, %v669_v22  ;;  %4659 = vrsqrt.f32 %v659_v33  ;;  %v739_v24 = vsub.s32 3, %v5366_v15 }
 0x411   :  { %v4650_v32 = vpop.eup %4649  ;;  %v5375_v19 = vrot.slane %v723_v17, %v727_v16 }
 0x412   :  { %v4652_v36 = vpop.eup %4651  ;;  %v699_v37 = vadd.f32 %v5277_v26, %v684_v29  ;;  %v670_v38 = vmul.f32 %v4650_v32, %v5178_v58  ;;  %v660_v58 = vadd.f32 1e-05, %v652_v34  ;;  %v5386_v31 = vrot.slane %v723_v17, %v739_v24 }
 0x413   :  { %v671_v43 = vmul.f32 %v4652_v36, %v5176_v57  ;;  %v5296_v57 = vpack.c.bf16 %v1042_v42, %v1038_v41  ;;  %v735_v32 = vsub.s32 2, %v5366_v15 }
 0x414   :  { %3932 = vmatmul.mubr.msk.f32.vlgmr.msra.gmra.mrb[8].mxu0 %vm410_vm2, %v699_v37  ;;  %3940 = vmatmul.mubr.msk.f32.vlgmr.msra.gmra.mrb[16].mxu1 %vm410_vm2, %v699_v37  ;;  %v685_v45 = vmul.f32 %v5271_v18, %v670_v38  ;;  %4661 = vrsqrt.f32 %v660_v58 }
 0x415   :  { %v4654_v48 = vpop.eup %4653  ;;  %4350 = vmatpush1.bf16.msra.mxu0 %v5280_v35  ;;  %839 = vmatprep.mubr.f32.mxu0 %v4914_v52  ;;  %v686_v54 = vmul.f32 %v5271_v18, %v671_v43  ;;  %v5392_v34 = vrot.slane %v723_v17, %v735_v32 }
 0x416   :  { %952 = vmatprep.mubr.f32.mxu1 %v4914_v52  ;;  %v700_v50 = vadd.f32 %v5277_v26, %v685_v45  ;;  %v672_v55 = vmul.f32 %v4654_v48, %v5185_v2  ;;  %4352 = vmatprep.subr.bf16.mxu0 %v5284_v39  ;;  %v4656_v59 = vpop.eup %4655 }
 0x417   :  { %4358 = vmatpush1.bf16.msra.mxu1 %v5287_v44  ;;  %v701_v61 = vadd.f32 %v5277_v26, %v686_v54  ;;  %v673_v62 = vmul.f32 %v4656_v59, %v5187_v3 }
 0x418   :  { %3933 = vmatmul.mubr.msk.f32.gmra.mrb[10].mxu0 %vm410_vm2, %v700_v50  ;;  %3941 = vmatmul.mubr.msk.f32.gmra.mrb[18].mxu1 %vm410_vm2, %v700_v50  ;;  %v687_v2 = vmul.f32 %v5271_v18, %v672_v55 }
 0x419   :  { %845 = vmatprep.mubr.f32.mxu0 %v4914_v52  ;;  %958 = vmatprep.mubr.f32.mxu1 %v4914_v52  ;;  %v4658_v63 = vpop.eup %4657  ;;  %v688_v3 = vmul.f32 %v5271_v18, %v673_v62 }
 0x41a   :  { %4354 = vmatpush1.bf16.msra.mxu0 %v5294_v49  ;;  %4360 = vmatprep.subr.bf16.mxu1 %v5296_v57  ;;  %v702_v0 = vadd.f32 %v5277_v26, %v687_v2  ;;  %v674_v1 = vmul.f32 %v4658_v63, %v5195_v12  ;;  %v4660_v4 = vpop.eup %4659 }
 0x41b   :  { %4362 = vmatpush1.bf16.msra.mxu1 %v5304_v60  ;;  %4364 = vmatprep.subr.bf16.mxu0 %v5262_v53  ;;  %v703_v5 = vadd.f32 %v5277_v26, %v688_v3  ;;  %v675_v7 = vmul.f32 %v4660_v4, %v5197_v13 }
 0x41c   :  { %3934 = vmatmul.mubr.msk.f32.gmra.mrb[12].mxu0 %vm410_vm2, %v701_v61  ;;  %3942 = vmatmul.mubr.msk.f32.gmra.mrb[20].mxu1 %vm410_vm2, %v701_v61  ;;  %v689_v6 = vmul.f32 %v5271_v18, %v674_v1 }
 0x41d   :  { %851 = vmatprep.mubr.f32.mxu0 %v4914_v52  ;;  %964 = vmatprep.mubr.f32.mxu1 %v4914_v52  ;;  %v690_v9 = vmul.f32 %v5271_v18, %v675_v7 }
 0x41e   :  { %4372 = vmatprep.subr.bf16.mxu1 %v5265_v56  ;;  %v4662_v8 = vpop.eup %4661  ;;  %v704_v12 = vadd.f32 %v5277_v26, %v689_v6 }
 0x41f   :  { %v676_v10 = vmul.f32 %v4662_v8, %v5205_v20  ;;  %v705_v13 = vadd.f32 %v5277_v26, %v690_v9 }
 0x420   :  { %3935 = vmatmul.mubr.msk.f32.gmra.mrb[14].mxu0 %vm410_vm2, %v702_v0  ;;  %3943 = vmatmul.mubr.msk.f32.gmra.mrb[22].mxu1 %vm410_vm2, %v702_v0 }
 0x421   :  { %857 = vmatprep.mubr.f32.mxu0 %v4914_v52  ;;  %970 = vmatprep.mubr.f32.mxu1 %v4914_v52  ;;  %v691_v11 = vmul.f32 %v5271_v18, %v676_v10  ;;  %v731_v18 = vsub.s32 1, %v5366_v15 }
 0x423   :  { %v706_v20 = vadd.f32 %v5277_v26, %v691_v11  ;;  %v5379_v21 = vrot.slane %v723_v17, %v731_v18 }
 0x424   :  { %3936 = vmatmul.mubr.msk.f32.gmra.mrb[16].mxu0 %vm410_vm2, %v703_v5  ;;  %3944 = vmatmul.mubr.msk.f32.gmra.mrb[24].mxu1 %vm410_vm2, %v703_v5 }
 0x425   :  { %863 = vmatprep.mubr.f32.mxu0 %v4914_v52  ;;  %976 = vmatprep.mubr.f32.mxu1 %v4914_v52 }
 0x428   :  { %3937 = vmatmul.mubr.msk.f32.gmra.mrb[18].mxu0 %vm410_vm2, %v704_v12  ;;  %3945 = vmatmul.mubr.msk.f32.gmra.mrb[26].mxu1 %vm410_vm2, %v704_v12 }
 0x429   :  { %869 = vmatprep.mubr.f32.mxu0 %v4914_v52  ;;  %982 = vmatprep.mubr.f32.mxu1 %v4914_v52 }
 0x42c   :  { %3938 = vmatmul.mubr.msk.f32.gmra.mrb[20].mxu0 %vm410_vm2, %v705_v13  ;;  %3946 = vmatmul.mubr.msk.f32.gmra.mrb[28].mxu1 %vm410_vm2, %v705_v13 }
 0x42d   :  { %875 = vmatprep.mubr.f32.mxu0 %v4914_v52  ;;  %988 = vmatprep.mubr.f32.mxu1 %v4914_v52 }
 0x430   :  { %3939 = vmatmul.mubr.msk.f32.gmra.mrb[22].mxu0 %vm410_vm2, %v706_v20  ;;  %3947 = vmatmul.mubr.msk.f32.gmra.mrb[30].mxu1 %vm410_vm2, %v706_v20 }
 0x431   :  { %1176 = vmatprep.mubr.f32.mxu0 %v4914_v52  ;;  %1247 = vmatprep.mubr.f32.mxu1 %v4914_v52 }
 0x434   :  { %1177 = vmatmul.mubr.f32.vlgmr.msra.gmra.mrb[8].mxu0 %v4914_v52  ;;  %1248 = vmatmul.mubr.f32.vlgmr.msra.gmra.mrb[16].mxu1 %v4914_v52 }
 0x435   :  { %4366 = vmatpush1.bf16.msra.mxu0 %v5280_v35  ;;  %4374 = vmatpush1.bf16.msra.mxu1 %v5287_v44 }
 0x436   :  { %4368 = vmatprep.subr.bf16.mxu0 %v5284_v39  ;;  %4376 = vmatprep.subr.bf16.mxu1 %v5296_v57 }
 0x437   :  { %1357 = vmatprep.mubr.f32.mxu0 %v4914_v52  ;;  %1428 = vmatprep.mubr.f32.mxu1 %v4914_v52 }
 0x439   :  { %4370 = vmatpush1.bf16.msra.mxu0 %v5294_v49  ;;  %4378 = vmatpush1.bf16.msra.mxu1 %v5304_v60 }
 0x43a   :  { %4380 = vmatprep.subr.bf16.mxu0 %v5262_v53  ;;  %4388 = vmatprep.subr.bf16.mxu1 %v5265_v56 }
 0x507   :  { %v1178_v22 = vpop.f32.mrb[8].mxu0  ;;  %v1249_v23 = vpop.f32.mrb[16].mxu1 }
 0x508   :  { %v4575_v25 = vadd.f32 %v1178_v22, %v5375_v19  ;;  %v1180_v26 = vpop.f32.mrb[9].mxu0  ;;  %v1251_v27 = vpop.f32.mrb[17].mxu1  ;;  %v4591_v36 = vadd.f32 %v1249_v23, %v5392_v34 }
 0x509   :  { %v4576_v28 = vadd.f32 %v1180_v26, %v5379_v21  ;;  %v4592_v33 = vadd.f32 %v1251_v27, %v5386_v31 }
 0x50a   :  { %v3948_v29 = vmul.f32 -1.442695, %v4575_v25 }
 0x50b   :  { %v3949_v30 = vmul.f32 -1.442695, %v4576_v28  ;;  %v3950_v51 = vmul.f32 -1.442695, %v4592_v33 }
 0x50c   :  { %4663 = vpow2.f32 %v3948_v29 }
 0x50d   :  { %4665 = vpow2.f32 %v3949_v30 }
 0x50e   :  { %4667 = vpow2.f32 %v3950_v51 }
 0x50f   :  { %4669 = vtanh.f32 %v4591_v36 }
 0x516   :  { %v4664_v37 = vpop.eup %4663 }
 0x517   :  { %v4666_v38 = vpop.eup %4665  ;;  %v1261_v40 = vadd.f32 1.0, %v4664_v37 }
 0x518   :  { %v1267_v41 = vadd.f32 1.0, %v4666_v38  ;;  %v4668_v42 = vpop.eup %4667 }
 0x519   :  { %4671 = vrcp.f32 %v1261_v40  ;;  %v4670_v43 = vpop.eup %4669  ;;  %v1274_v48 = vadd.f32 1.0, %v4668_v42 }
 0x51a   :  { %4673 = vrcp.f32 %v1267_v41 }
 0x51b   :  { %4675 = vrcp.f32 %v1274_v48 }
 0x523   :  { %v4672_v45 = vpop.eup %4671 }
 0x524   :  { %v4674_v46 = vpop.eup %4673  ;;  %v1278_v47 = vmul.f32 %v4672_v45, %v4670_v43 }
 0x525   :  { %v1277_v58 = vmul.f32 0.0, %v4674_v46  ;;  %v4676_v54 = vpop.eup %4675 }
 0x527   :  { %v1279_v50 = vadd.f32 %v1278_v47, %v1277_v58 }
 0x529   :  { %4677 = vtanh.f32 %v1279_v50 }
 0x533   :  { %v4678_v55 = vpop.eup %4677 }
 0x534   :  { %v1281_v59 = vmul.f32 %v4678_v55, %v4676_v54 }
 0x536   :  { %1282 = vst.msk [vmem:[#allocation3] sm:$0xff] %vm410_vm2, %v1281_v59  ;;  %3951 = vmatmul.mubr.msk.f32.vlgmr.msra.gmra.mrb[10].mxu0 %vm410_vm2, %v1281_v59  ;;  %3952 = vmatmul.mubr.msk.f32.vlgmr.msra.gmra.mrb[18].mxu1 %vm410_vm2, %v1281_v59 }
 0x537   :  { %4382 = vmatpush1.bf16.msra.mxu0 %v5280_v35  ;;  %4390 = vmatpush1.bf16.msra.mxu1 %v5287_v44 }
 0x538   :  { %4384 = vmatprep.subr.bf16.mxu0 %v5284_v39  ;;  %4392 = vmatprep.subr.bf16.mxu1 %v5296_v57 }
 0x539   :  { %1539 = vmatprep.mubr.f32.mxu0 %v4914_v52  ;;  %1610 = vmatprep.mubr.f32.mxu1 %v4914_v52 }
 0x53b   :  { %4386 = vmatpush1.bf16.msra.mxu0 %v5294_v49  ;;  %4394 = vmatpush1.bf16.msra.mxu1 %v5304_v60 }
 0x53c   :  { %4396 = vmatprep.subr.bf16.mxu0 %v5262_v53  ;;  %4404 = vmatprep.subr.bf16.mxu1 %v5265_v56 }
 0x609   :  { %v1359_v61 = vpop.f32.mrb[10].mxu0  ;;  %v1430_v2 = vpop.f32.mrb[18].mxu1 }
 0x60a   :  { %v4577_v62 = vadd.f32 %v1359_v61, %v5375_v19  ;;  %v1361_v63 = vpop.f32.mrb[11].mxu0  ;;  %v1432_v0 = vpop.f32.mrb[19].mxu1  ;;  %v4593_v7 = vadd.f32 %v1430_v2, %v5392_v34 }
 0x60b   :  { %v4578_v3 = vadd.f32 %v1361_v63, %v5379_v21  ;;  %v4594_v5 = vadd.f32 %v1432_v0, %v5386_v31 }
 0x60c   :  { %v3953_v1 = vmul.f32 -1.442695, %v4577_v62 }
 0x60d   :  { %v3954_v4 = vmul.f32 -1.442695, %v4578_v3  ;;  %v3955_v6 = vmul.f32 -1.442695, %v4594_v5 }
 0x60e   :  { %4679 = vpow2.f32 %v3953_v1 }
 0x60f   :  { %4681 = vpow2.f32 %v3954_v4 }
 0x610   :  { %4683 = vpow2.f32 %v3955_v6 }
 0x611   :  { %4685 = vtanh.f32 %v4593_v7 }
 0x618   :  { %v4680_v8 = vpop.eup %4679 }
 0x619   :  { %v4682_v12 = vpop.eup %4681  ;;  %v1442_v9 = vadd.f32 1.0, %v4680_v8 }
 0x61a   :  { %v1448_v10 = vadd.f32 1.0, %v4682_v12  ;;  %v4684_v13 = vpop.eup %4683 }
 0x61b   :  { %4687 = vrcp.f32 %v1442_v9  ;;  %v4686_v11 = vpop.eup %4685  ;;  %v1455_v22 = vadd.f32 1.0, %v4684_v13 }
 0x61c   :  { %4689 = vrcp.f32 %v1448_v10 }
 0x61d   :  { %4691 = vrcp.f32 %v1455_v22 }
 0x625   :  { %v4688_v20 = vpop.eup %4687 }
 0x626   :  { %v4690_v14 = vpop.eup %4689  ;;  %v1459_v17 = vmul.f32 %v4688_v20, %v4686_v11 }
 0x627   :  { %v1458_v23 = vmul.f32 %v4690_v14, %v1279_v50  ;;  %v4692_v26 = vpop.eup %4691 }
 0x629   :  { %v1460_v25 = vadd.f32 %v1459_v17, %v1458_v23 }
 0x62b   :  { %4693 = vtanh.f32 %v1460_v25 }
 0x635   :  { %v4694_v27 = vpop.eup %4693 }
 0x636   :  { %v1462_v28 = vmul.f32 %v4694_v27, %v4692_v26 }
 0x638   :  { %1464 = vst.msk [vmem:[#allocation3 + $0x8] sm:$0xff] %vm410_vm2, %v1462_v28  ;;  %3956 = vmatmul.mubr.msk.f32.vlgmr.msra.gmra.mrb[12].mxu0 %vm410_vm2, %v1462_v28  ;;  %3957 = vmatmul.mubr.msk.f32.vlgmr.msra.gmra.mrb[20].mxu1 %vm410_vm2, %v1462_v28 }
 0x639   :  { %4398 = vmatpush1.bf16.msra.mxu0 %v5280_v35  ;;  %4406 = vmatpush1.bf16.msra.mxu1 %v5287_v44 }
 0x63a   :  { %4400 = vmatprep.subr.bf16.mxu0 %v5284_v39  ;;  %4408 = vmatprep.subr.bf16.mxu1 %v5296_v57 }
 0x63b   :  { %1721 = vmatprep.mubr.f32.mxu0 %v4914_v52  ;;  %1792 = vmatprep.mubr.f32.mxu1 %v4914_v52 }
 0x63d   :  { %4402 = vmatpush1.bf16.msra.mxu0 %v5294_v49  ;;  %4410 = vmatpush1.bf16.msra.mxu1 %v5304_v60 }
 0x63e   :  { %4412 = vmatprep.subr.bf16.mxu0 %v5262_v53  ;;  %4420 = vmatprep.subr.bf16.mxu1 %v5265_v56 }
 0x70b   :  { %v1541_v29 = vpop.f32.mrb[12].mxu0  ;;  %v1612_v30 = vpop.f32.mrb[20].mxu1 }
 0x70c   :  { %v4579_v33 = vadd.f32 %v1541_v29, %v5375_v19  ;;  %v1543_v51 = vpop.f32.mrb[13].mxu0  ;;  %v1614_v36 = vpop.f32.mrb[21].mxu1  ;;  %v4595_v43 = vadd.f32 %v1612_v30, %v5392_v34 }
 0x70d   :  { %v4580_v37 = vadd.f32 %v1543_v51, %v5379_v21  ;;  %v4596_v41 = vadd.f32 %v1614_v36, %v5386_v31 }
 0x70e   :  { %v3958_v38 = vmul.f32 -1.442695, %v4579_v33 }
 0x70f   :  { %v3959_v40 = vmul.f32 -1.442695, %v4580_v37  ;;  %v3960_v42 = vmul.f32 -1.442695, %v4596_v41 }
 0x710   :  { %4695 = vpow2.f32 %v3958_v38 }
 0x711   :  { %4697 = vpow2.f32 %v3959_v40 }
 0x712   :  { %4699 = vpow2.f32 %v3960_v42 }
 0x713   :  { %4701 = vtanh.f32 %v4595_v43 }
 0x71a   :  { %v4696_v45 = vpop.eup %4695 }
 0x71b   :  { %v4698_v46 = vpop.eup %4697  ;;  %v1624_v47 = vadd.f32 1.0, %v4696_v45 }
 0x71c   :  { %v1630_v48 = vadd.f32 1.0, %v4698_v46  ;;  %v4700_v58 = vpop.eup %4699 }
 0x71d   :  { %4703 = vrcp.f32 %v1624_v47  ;;  %v4702_v50 = vpop.eup %4701  ;;  %v1637_v61 = vadd.f32 1.0, %v4700_v58 }
 0x71e   :  { %4705 = vrcp.f32 %v1630_v48 }
 0x71f   :  { %4707 = vrcp.f32 %v1637_v61 }
 0x727   :  { %v4704_v54 = vpop.eup %4703 }
 0x728   :  { %v4706_v55 = vpop.eup %4705  ;;  %v1641_v59 = vmul.f32 %v4704_v54, %v4702_v50 }
 0x729   :  { %v1640_v2 = vmul.f32 %v4706_v55, %v1460_v25  ;;  %v4708_v63 = vpop.eup %4707 }
 0x72b   :  { %v1642_v62 = vadd.f32 %v1641_v59, %v1640_v2 }
 0x72d   :  { %4709 = vtanh.f32 %v1642_v62 }
 0x737   :  { %v4710_v0 = vpop.eup %4709 }
 0x738   :  { %v1644_v3 = vmul.f32 %v4710_v0, %v4708_v63 }
 0x73a   :  { %1646 = vst.msk [vmem:[#allocation3 + $0x10] sm:$0xff] %vm410_vm2, %v1644_v3  ;;  %3961 = vmatmul.mubr.msk.f32.vlgmr.msra.gmra.mrb[14].mxu0 %vm410_vm2, %v1644_v3  ;;  %3962 = vmatmul.mubr.msk.f32.vlgmr.msra.gmra.mrb[22].mxu1 %vm410_vm2, %v1644_v3 }
 0x73b   :  { %4414 = vmatpush1.bf16.msra.mxu0 %v5280_v35  ;;  %4422 = vmatpush1.bf16.msra.mxu1 %v5287_v44 }
 0x73c   :  { %4416 = vmatprep.subr.bf16.mxu0 %v5284_v39  ;;  %4424 = vmatprep.subr.bf16.mxu1 %v5296_v57 }
 0x73d   :  { %1903 = vmatprep.mubr.f32.mxu0 %v4914_v52  ;;  %1974 = vmatprep.mubr.f32.mxu1 %v4914_v52 }
 0x73f   :  { %4418 = vmatpush1.bf16.msra.mxu0 %v5294_v49  ;;  %4426 = vmatpush1.bf16.msra.mxu1 %v5304_v60 }
 0x740   :  { %4428 = vmatprep.subr.bf16.mxu0 %v5262_v53  ;;  %4436 = vmatprep.subr.bf16.mxu1 %v5265_v56 }
 0x80d   :  { %v1723_v1 = vpop.f32.mrb[14].mxu0  ;;  %v1794_v4 = vpop.f32.mrb[22].mxu1 }
 0x80e   :  { %v4581_v5 = vadd.f32 %v1723_v1, %v5375_v19  ;;  %v1725_v6 = vpop.f32.mrb[15].mxu0  ;;  %v1796_v7 = vpop.f32.mrb[23].mxu1  ;;  %v4597_v11 = vadd.f32 %v1794_v4, %v5392_v34 }
 0x80f   :  { %v4582_v8 = vadd.f32 %v1725_v6, %v5379_v21  ;;  %v4598_v10 = vadd.f32 %v1796_v7, %v5386_v31 }
 0x810   :  { %v3963_v12 = vmul.f32 -1.442695, %v4581_v5 }
 0x811   :  { %v3964_v9 = vmul.f32 -1.442695, %v4582_v8  ;;  %v3965_v13 = vmul.f32 -1.442695, %v4598_v10 }
 0x812   :  { %4711 = vpow2.f32 %v3963_v12 }
 0x813   :  { %4713 = vpow2.f32 %v3964_v9 }
 0x814   :  { %4715 = vpow2.f32 %v3965_v13 }
 0x815   :  { %4717 = vtanh.f32 %v4597_v11 }
 0x81c   :  { %v4712_v20 = vpop.eup %4711 }
 0x81d   :  { %v4714_v14 = vpop.eup %4713  ;;  %v1806_v17 = vadd.f32 1.0, %v4712_v20 }
 0x81e   :  { %v1812_v22 = vadd.f32 1.0, %v4714_v14  ;;  %v4716_v23 = vpop.eup %4715 }
 0x81f   :  { %4719 = vrcp.f32 %v1806_v17  ;;  %v4718_v25 = vpop.eup %4717  ;;  %v1819_v29 = vadd.f32 1.0, %v4716_v23 }
 0x820   :  { %4721 = vrcp.f32 %v1812_v22 }
 0x821   :  { %4723 = vrcp.f32 %v1819_v29 }
 0x829   :  { %v4720_v26 = vpop.eup %4719 }
 0x82a   :  { %v4722_v27 = vpop.eup %4721  ;;  %v1823_v28 = vmul.f32 %v4720_v26, %v4718_v25 }
 0x82b   :  { %v1822_v30 = vmul.f32 %v4722_v27, %v1642_v62  ;;  %v4724_v51 = vpop.eup %4723 }
 0x82d   :  { %v1824_v33 = vadd.f32 %v1823_v28, %v1822_v30 }
 0x82f   :  { %4725 = vtanh.f32 %v1824_v33 }
 0x839   :  { %v4726_v36 = vpop.eup %4725 }
 0x83a   :  { %v1826_v37 = vmul.f32 %v4726_v36, %v4724_v51 }
 0x83c   :  { %1828 = vst.msk [vmem:[#allocation3 + $0x18] sm:$0xff] %vm410_vm2, %v1826_v37  ;;  %3966 = vmatmul.mubr.msk.f32.vlgmr.msra.gmra.mrb[16].mxu0 %vm410_vm2, %v1826_v37  ;;  %3967 = vmatmul.mubr.msk.f32.vlgmr.msra.gmra.mrb[24].mxu1 %vm410_vm2, %v1826_v37 }
 0x83d   :  { %4430 = vmatpush1.bf16.msra.mxu0 %v5280_v35  ;;  %4438 = vmatpush1.bf16.msra.mxu1 %v5287_v44 }
 0x83e   :  { %4432 = vmatprep.subr.bf16.mxu0 %v5284_v39  ;;  %4440 = vmatprep.subr.bf16.mxu1 %v5296_v57 }
 0x83f   :  { %2085 = vmatprep.mubr.f32.mxu0 %v4914_v52  ;;  %2156 = vmatprep.mubr.f32.mxu1 %v4914_v52 }
 0x841   :  { %4434 = vmatpush1.bf16.msra.mxu0 %v5294_v49  ;;  %4442 = vmatpush1.bf16.msra.mxu1 %v5304_v60 }
 0x842   :  { %4444 = vmatprep.subr.bf16.mxu0 %v5262_v53  ;;  %4452 = vmatprep.subr.bf16.mxu1 %v5265_v56 }
 0x90f   :  { %v1905_v38 = vpop.f32.mrb[16].mxu0  ;;  %v1976_v40 = vpop.f32.mrb[24].mxu1 }
 0x910   :  { %v4583_v41 = vadd.f32 %v1905_v38, %v5375_v19  ;;  %v1907_v42 = vpop.f32.mrb[17].mxu0  ;;  %v1978_v43 = vpop.f32.mrb[25].mxu1  ;;  %v4599_v50 = vadd.f32 %v1976_v40, %v5392_v34 }
 0x911   :  { %v4584_v45 = vadd.f32 %v1907_v42, %v5379_v21  ;;  %v4600_v48 = vadd.f32 %v1978_v43, %v5386_v31  ;;  %v4915_v43 = vmov 0.0|0.0  }
 0x912   :  { %v3968_v46 = vmul.f32 -1.442695, %v4583_v41 }
 0x913   :  { %v3969_v47 = vmul.f32 -1.442695, %v4584_v45  ;;  %v3970_v58 = vmul.f32 -1.442695, %v4600_v48 }
 0x914   :  { %4727 = vpow2.f32 %v3968_v46 }
 0x915   :  { %4729 = vpow2.f32 %v3969_v47 }
 0x916   :  { %4731 = vpow2.f32 %v3970_v58 }
 0x917   :  { %4733 = vtanh.f32 %v4599_v50 }
 0x91e   :  { %v4728_v54 = vpop.eup %4727 }
 0x91f   :  { %v4730_v55 = vpop.eup %4729  ;;  %v1988_v59 = vadd.f32 1.0, %v4728_v54 }
 0x920   :  { %v1994_v61 = vadd.f32 1.0, %v4730_v55  ;;  %v4732_v2 = vpop.eup %4731 }
 0x921   :  { %4735 = vrcp.f32 %v1988_v59  ;;  %v4734_v62 = vpop.eup %4733  ;;  %v2001_v1 = vadd.f32 1.0, %v4732_v2 }
 0x922   :  { %4737 = vrcp.f32 %v1994_v61 }
 0x923   :  { %4739 = vrcp.f32 %v2001_v1 }
 0x92b   :  { %v4736_v63 = vpop.eup %4735 }
 0x92c   :  { %v4738_v0 = vpop.eup %4737  ;;  %v2005_v3 = vmul.f32 %v4736_v63, %v4734_v62 }
 0x92d   :  { %v2004_v4 = vmul.f32 %v4738_v0, %v1824_v33  ;;  %v4740_v6 = vpop.eup %4739 }
 0x92f   :  { %v2006_v5 = vadd.f32 %v2005_v3, %v2004_v4 }
 0x931   :  { %4741 = vtanh.f32 %v2006_v5 }
 0x93b   :  { %v4742_v7 = vpop.eup %4741 }
 0x93c   :  { %v2008_v8 = vmul.f32 %v4742_v7, %v4740_v6  ;;  %v1093_v6 = vld [vmem:[%s5879_s15 + $0x8] sm:$0xff] }
 0x93e   :  { %2010 = vst.msk [vmem:[#allocation3 + $0x20] sm:$0xff] %vm410_vm2, %v2008_v8  ;;  %3971 = vmatmul.mubr.msk.f32.vlgmr.msra.gmra.mrb[18].mxu0 %vm410_vm2, %v2008_v8  ;;  %3972 = vmatmul.mubr.msk.f32.vlgmr.msra.gmra.mrb[26].mxu1 %vm410_vm2, %v2008_v8 }
 0x93f   :  { %4446 = vmatpush1.bf16.msra.mxu0 %v5280_v35  ;;  %4454 = vmatpush1.bf16.msra.mxu1 %v5287_v44 }
 0x940   :  { %4448 = vmatprep.subr.bf16.mxu0 %v5284_v39  ;;  %4456 = vmatprep.subr.bf16.mxu1 %v5296_v57 }
 0x941   :  { %2267 = vmatprep.mubr.f32.mxu0 %v4914_v52  ;;  %2338 = vmatprep.mubr.f32.mxu1 %v4914_v52 }
 0x943   :  { %4450 = vmatpush1.bf16.msra.mxu0 %v5294_v49  ;;  %4458 = vmatpush1.bf16.msra.mxu1 %v5304_v60 }
 0x944   :  { %4468 = vmatprep.subr.bf16.mxu1 %v5265_v56  ;;  %4460 = vmatprep.subr.bf16.mxu0 %v5262_v53 }
 0xa11   :  { %v2087_v12 = vpop.f32.mrb[18].mxu0  ;;  %v2158_v9 = vpop.f32.mrb[26].mxu1 }
 0xa12   :  { %v4585_v10 = vadd.f32 %v2087_v12, %v5375_v19  ;;  %v2089_v13 = vpop.f32.mrb[19].mxu0  ;;  %v2160_v11 = vpop.f32.mrb[27].mxu1  ;;  %v4601_v25 = vadd.f32 %v2158_v9, %v5392_v34 }
 0xa13   :  { %v4586_v20 = vadd.f32 %v2089_v13, %v5379_v21  ;;  %v4602_v22 = vadd.f32 %v2160_v11, %v5386_v31  ;;  %v1095_v13 = vld [vmem:[%s5879_s15 + $0x18] sm:$0xff] }
 0xa14   :  { %v3973_v14 = vmul.f32 -1.442695, %v4585_v10  ;;  %v1094_v10 = vld [vmem:[%s5879_s15 + $0x10] sm:$0xff] }
 0xa15   :  { %v3974_v17 = vmul.f32 -1.442695, %v4586_v20  ;;  %v3975_v23 = vmul.f32 -1.442695, %v4602_v22  ;;  %v5517_v11 = vpack.c.bf16 %v1095_v13, %v1094_v10  ;;  %v5524_v20 = vld [vmem:[#allocation3] sm:$0xff] }
 0xa16   :  { %4743 = vpow2.f32 %v3973_v14  ;;  %v5530_v14 = vld [vmem:[#allocation3 + $0x8] sm:$0xff]  ;;  %v1044_v22 = vld [vmem:[#allocation6 + $0x8] sm:$0xff] }
 0xa17   :  { %4745 = vpow2.f32 %v3974_v17  ;;  %v5536_v17 = vld [vmem:[#allocation3 + $0x10] sm:$0xff] }
 0xa18   :  { %4747 = vpow2.f32 %v3975_v23  ;;  %v1048_v23 = vld [vmem:[#allocation6 + $0x28] sm:$0xff] }
 0xa19   :  { %4749 = vtanh.f32 %v4601_v25  ;;  %v1060_v25 = vld [vmem:[#allocation8 + $0x8] sm:$0xff] }
 0xa20   :  { %v4744_v56 = vpop.eup %4743 }
 0xa21   :  { %v4746_v26 = vpop.eup %4745  ;;  %v2170_v53 = vadd.f32 1.0, %v4744_v56  ;;  %v1064_v56 = vld [vmem:[#allocation8 + $0x28] sm:$0xff] }
 0xa22   :  { %v2176_v27 = vadd.f32 1.0, %v4746_v26  ;;  %v4748_v28 = vpop.eup %4747  ;;  %v1076_v26 = vadd.f32 %v1060_v25, %v1044_v22 }
 0xa23   :  { %4751 = vrcp.f32 %v2170_v53  ;;  %v4750_v29 = vpop.eup %4749  ;;  %v2183_v36 = vadd.f32 1.0, %v4748_v28  ;;  %v1043_v53 = vld [vmem:[#allocation6] sm:$0xff]  ;;  %v1080_v28 = vadd.f32 %v1064_v56, %v1048_v23 }
 0xa24   :  { %4753 = vrcp.f32 %v2176_v27  ;;  %v1047_v27 = vld [vmem:[#allocation6 + $0x20] sm:$0xff] }
 0xa25   :  { %4755 = vrcp.f32 %v2183_v36 }
 0xa2d   :  { %v4752_v30 = vpop.eup %4751 }
 0xa2e   :  { %v4754_v33 = vpop.eup %4753  ;;  %v2187_v51 = vmul.f32 %v4752_v30, %v4750_v29  ;;  %v1059_v29 = vld [vmem:[#allocation8] sm:$0xff] }
 0xa2f   :  { %v2186_v37 = vmul.f32 %v4754_v33, %v2006_v5  ;;  %v4756_v40 = vpop.eup %4755  ;;  %v1092_v5 = vld [vmem:[%s5879_s15] sm:$0xff]  ;;  %v1063_v30 = vld [vmem:[#allocation8 + $0x20] sm:$0xff] }
 0xa30   :  { %v5505_v12 = vpack.c.bf16 %v1093_v6, %v1092_v5  ;;  %v1052_v33 = vld [vmem:[#allocation6 + $0x48] sm:$0xff]  ;;  %v1079_v36 = vadd.f32 %v1063_v30, %v1047_v27 }
 0xa31   :  { %v2188_v38 = vadd.f32 %v2187_v51, %v2186_v37  ;;  %v1075_v51 = vadd.f32 %v1059_v29, %v1043_v53  ;;  %v1056_v37 = vld [vmem:[#allocation6 + $0x68] sm:$0xff] }
 0xa33   :  { %4757 = vtanh.f32 %v2188_v38 }
 0xa3d   :  { %v4758_v41 = vpop.eup %4757 }
 0xa3e   :  { %v2190_v42 = vmul.f32 %v4758_v41, %v4756_v40  ;;  %v1072_v40 = vld [vmem:[#allocation8 + $0x68] sm:$0xff]  ;;  %v5541_v41 = vpack.c.bf16 %v1080_v28, %v1076_v26 }
 0xa40   :  { %2192 = vst.msk [vmem:[#allocation3 + $0x28] sm:$0xff] %vm410_vm2, %v2190_v42  ;;  %3976 = vmatmul.mubr.msk.f32.vlgmr.msra.gmra.mrb[20].mxu0 %vm410_vm2, %v2190_v42  ;;  %3977 = vmatmul.mubr.msk.f32.vlgmr.msra.gmra.mrb[28].mxu1 %vm410_vm2, %v2190_v42 }
 0xa41   :  { %4470 = vmatpush1.bf16.msra.mxu1 %v5287_v44  ;;  %4462 = vmatpush1.bf16.msra.mxu0 %v5280_v35 }
 0xa42   :  { %4472 = vmatprep.subr.bf16.mxu1 %v5296_v57  ;;  %4464 = vmatprep.subr.bf16.mxu0 %v5284_v39 }
 0xa43   :  { %2449 = vmatprep.mubr.f32.mxu0 %v4914_v52  ;;  %2520 = vmatprep.mubr.f32.mxu1 %v4914_v52 }
 0xa45   :  { %4474 = vmatpush1.bf16.msra.mxu1 %v5304_v60  ;;  %4466 = vmatpush1.bf16.msra.mxu0 %v5294_v49 }
 0xa46   :  { %4491 = vmatprep.subr.bf16.mxu1 %v4915_v43  ;;  %4476 = vmatprep.subr.bf16.mxu0 %v5541_v41 }
 0xb13   :  { %v2269_v45 = vpop.f32.mrb[20].mxu0  ;;  %v2340_v46 = vpop.f32.mrb[28].mxu1 }
 0xb14   :  { %v4587_v44 = vadd.f32 %v2269_v45, %v5375_v19  ;;  %v2271_v35 = vpop.f32.mrb[21].mxu0  ;;  %v2342_v47 = vpop.f32.mrb[29].mxu1  ;;  %v4603_v49 = vadd.f32 %v2340_v46, %v5392_v34  ;;  %v1088_v45 = vadd.f32 %v1072_v40, %v1056_v37  ;;  %v1051_v46 = vld [vmem:[#allocation6 + $0x40] sm:$0xff]  ;;  %v1045_v37 = vld [vmem:[#allocation6 + $0x10] sm:$0xff] }
 0xb15   :  { %v4588_v57 = vadd.f32 %v2271_v35, %v5379_v21  ;;  %v4604_v58 = vadd.f32 %v2342_v47, %v5386_v31  ;;  %v1067_v35 = vld [vmem:[#allocation8 + $0x40] sm:$0xff]  ;;  %v5543_v47 = vpack.c.bf16 %v1079_v36, %v1075_v51  ;;  %v1061_v40 = vld [vmem:[#allocation8 + $0x10] sm:$0xff] }
 0xb16   :  { %v3978_v39 = vmul.f32 -1.442695, %v4587_v44  ;;  %v1055_v44 = vld [vmem:[#allocation6 + $0x60] sm:$0xff] }
 0xb17   :  { %v3979_v48 = vmul.f32 -1.442695, %v4588_v57  ;;  %v3980_v60 = vmul.f32 -1.442695, %v4604_v58  ;;  %v1071_v57 = vld [vmem:[#allocation8 + $0x60] sm:$0xff]  ;;  %v1050_v58 = vld [vmem:[#allocation6 + $0x38] sm:$0xff] }
 0xb18   :  { %4759 = vpow2.f32 %v3978_v39  ;;  %v1083_v39 = vadd.f32 %v1067_v35, %v1051_v46  ;;  %v1058_v46 = vld [vmem:[#allocation6 + $0x78] sm:$0xff] }
 0xb19   :  { %4761 = vpow2.f32 %v3979_v48  ;;  %v1046_v48 = vld [vmem:[#allocation6 + $0x18] sm:$0xff] }
 0xb1a   :  { %4763 = vpow2.f32 %v3980_v60  ;;  %v1074_v35 = vld [vmem:[#allocation8 + $0x78] sm:$0xff] }
 0xb1b   :  { %4765 = vtanh.f32 %v4603_v49  ;;  %v1087_v49 = vadd.f32 %v1071_v57, %v1055_v44  ;;  %v1070_v44 = vld [vmem:[#allocation8 + $0x58] sm:$0xff]  ;;  %v1077_v57 = vadd.f32 %v1061_v40, %v1045_v37 }
 0xb22   :  { %v4760_v50 = vpop.eup %4759 }
 0xb23   :  { %v4762_v54 = vpop.eup %4761  ;;  %v2352_v55 = vadd.f32 1.0, %v4760_v50  ;;  %v1062_v50 = vld [vmem:[#allocation8 + $0x18] sm:$0xff] }
 0xb24   :  { %v2358_v59 = vadd.f32 1.0, %v4762_v54  ;;  %v4764_v61 = vpop.eup %4763  ;;  %v1066_v54 = vld [vmem:[#allocation8 + $0x38] sm:$0xff] }
 0xb25   :  { %4767 = vrcp.f32 %v2352_v55  ;;  %v4766_v2 = vpop.eup %4765  ;;  %v2365_v3 = vadd.f32 1.0, %v4764_v61  ;;  %v1078_v55 = vadd.f32 %v1062_v50, %v1046_v48  ;;  %v5552_v61 = vpack.c.bf16 %v1087_v49, %v1083_v39  ;;  %v1053_v48 = vld [vmem:[#allocation6 + $0x50] sm:$0xff] }
 0xb26   :  { %4769 = vrcp.f32 %v2358_v59  ;;  %v1082_v59 = vadd.f32 %v1066_v54, %v1050_v58  ;;  %v1090_v49 = vadd.f32 %v1074_v35, %v1058_v46  ;;  %v1057_v50 = vld [vmem:[#allocation6 + $0x70] sm:$0xff] }
 0xb27   :  { %4771 = vrcp.f32 %v2365_v3  ;;  %v1073_v54 = vld [vmem:[#allocation8 + $0x70] sm:$0xff] }
 0xb2f   :  { %v4768_v62 = vpop.eup %4767 }
 0xb30   :  { %v4770_v63 = vpop.eup %4769  ;;  %v2369_v0 = vmul.f32 %v4768_v62, %v4766_v2  ;;  %v5555_v2 = vpack.c.bf16 %v1082_v59, %v1078_v55 }
 0xb31   :  { %v2368_v1 = vmul.f32 %v4770_v63, %v2188_v38  ;;  %v4772_v7 = vpop.eup %4771  ;;  %v1068_v38 = vld [vmem:[#allocation8 + $0x48] sm:$0xff] }
 0xb32   :  { %v1084_v42 = vadd.f32 %v1068_v38, %v1052_v33  ;;  %v1049_v38 = vld [vmem:[#allocation6 + $0x30] sm:$0xff] }
 0xb33   :  { %v5496_v4 = vadd.f32 %v2369_v0, %v2368_v1 }
 0xb34   :  { %v5546_v60 = vpack.c.bf16 %v1088_v45, %v1084_v42  ;;  %v1065_v42 = vld [vmem:[#allocation8 + $0x30] sm:$0xff]  ;;  %v1054_v45 = vld [vmem:[#allocation6 + $0x58] sm:$0xff] }
 0xb35   :  { %4773 = vtanh.f32 %v5496_v4  ;;  %v1081_v39 = vadd.f32 %v1065_v42, %v1049_v38  ;;  %v1086_v58 = vadd.f32 %v1070_v44, %v1054_v45 }
 0xb3f   :  { %v4774_v8 = vpop.eup %4773 }
 0xb40   :  { %v2372_v9 = vmul.f32 %v4774_v8, %v4772_v7 }
 0xb42   :  { %2374 = vst.msk [vmem:[#allocation3 + $0x30] sm:$0xff] %vm410_vm2, %v2372_v9  ;;  %3981 = vmatmul.mubr.msk.f32.vlgmr.msra.gmra.mrb[22].mxu0 %vm410_vm2, %v2372_v9  ;;  %3982 = vmatmul.mubr.msk.f32.vlgmr.msra.gmra.mrb[30].mxu1 %vm410_vm2, %v2372_v9 }
 0xb43   :  { %4493 = vmatpush3.bf16.msra.mxu1 %v5505_v12  ;;  %4187 = vmatprep.mubr.msk.f32.mxu1 %vm4916_vm11, %v4914_v52 }
 0xb44   :  { %4494 = vmatprep.subr.bf16.mxu1 %v4915_v43  ;;  %2645 = vmatprep.mubr.f32.mxu0 %v4914_v52 }
 0xb45   :  { %4478 = vmatpush1.bf16.msra.mxu0 %v5543_v47 }
 0xb46   :  { %4480 = vmatprep.subr.bf16.mxu0 %v5546_v60 }
 0xb47   :  { %4496 = vmatpush3.bf16.msra.mxu1 %v5517_v11 }
 0xb48   :  { %4504 = vmatprep.subr.bf16.mxu1 %v5541_v41 }
 0xb49   :  { %4482 = vmatpush1.bf16.msra.mxu0 %v5552_v61 }
 0xb4a   :  { %4188 = vmatmul.mubr.msk.f32.vlgmr.msra.gmra.mrb[32].mxu1 %vm410_vm2, %v5524_v20  ;;  %4484 = vmatprep.subr.bf16.mxu0 %v5555_v2 }
 0xb4b   :  { %4190 = vmatprep.mubr.msk.f32.mxu1 %vm4916_vm11, %v4914_v52  ;;  %4506 = vmatpush1.bf16.msra.mxu1 %v5543_v47 }
 0xb4c   :  { %4508 = vmatprep.subr.bf16.mxu1 %v5546_v60 }
 0xb4e   :  { %4191 = vmatmul.mubr.msk.f32.gmra.mrb[34].mxu1 %vm410_vm2, %v5530_v14 }
 0xb4f   :  { %4193 = vmatprep.mubr.msk.f32.mxu1 %vm4916_vm11, %v4914_v52  ;;  %4510 = vmatpush1.bf16.msra.mxu1 %v5552_v61 }
 0xb50   :  { %4519 = vmatprep.subr.bf16.mxu1 %v4915_v43 }
 0xb52   :  { %4194 = vmatmul.mubr.msk.f32.gmra.mrb[36].mxu1 %vm410_vm2, %v5536_v17 }
 0xb53   :  { %3025 = vmatprep.mubr.f32.mxu1 %v4914_v52 }
 0xc15   :  { %v2451_v62 = vpop.f32.mrb[22].mxu0  ;;  %v2522_v63 = vpop.f32.mrb[30].mxu1 }
 0xc16   :  { %v4589_v0 = vadd.f32 %v2451_v62, %v5375_v19  ;;  %v2453_v3 = vpop.f32.mrb[23].mxu0  ;;  %v2524_v1 = vpop.f32.mrb[31].mxu1  ;;  %v4605_v23 = vadd.f32 %v2522_v63, %v5392_v34  ;;  %v5571_v62 = vpack.c.bf16 %v1081_v39, %v1077_v57  ;;  %v5657_v57 = vld [vmem:[%s5882_s18] ss:$0 sm:$0xff] }
 0xc17   :  { %v4590_v5 = vadd.f32 %v2453_v3, %v5379_v21  ;;  %v4606_v8 = vadd.f32 %v2524_v1, %v5386_v31  ;;  %v5573_v1 = vpack.c.bf16 %v1090_v49, %v1086_v58 }
 0xc18   :  { %v3983_v6 = vmul.f32 -1.442695, %v4589_v0  ;;  %v1089_v0 = vadd.f32 %v1073_v54, %v1057_v50 }
 0xc19   :  { %v3984_v7 = vmul.f32 -1.442695, %v4590_v5  ;;  %v3985_v13 = vmul.f32 -1.442695, %v4606_v8  ;;  %v5578_v5 = vld [vmem:[%s5880_s16] ss:$0 sm:$0xff] }
 0xc1a   :  { %4775 = vpow2.f32 %v3983_v6  ;;  %v1098_v8 = vld [vmem:[%s5881_s17 + $0x8] sm:$0xff] }
 0xc1b   :  { %4777 = vpow2.f32 %v3984_v7  ;;  %v1097_v7 = vld [vmem:[%s5881_s17] sm:$0xff] }
 0xc1c   :  { %4779 = vpow2.f32 %v3985_v13  ;;  %v5595_v13 = vpack.c.bf16 %v1098_v8, %v1097_v7 }
 0xc1d   :  { %v2833_v9 = vpop.f32.mrb[32].mxu1  ;;  %4781 = vtanh.f32 %v4605_v23  ;;  %v1099_v23 = vld [vmem:[%s5881_s17 + $0x10] sm:$0xff] }
 0xc1e   :  { %v4189_v10 = vpop.f32.mrb[33].mxu1 }
 0xc1f   :  { %v2834_v10 = vadd.f32 %v5578_v5, %v2833_v9 }
 0xc21   :  { %v2838_v22 = vpop.f32.mrb[34].mxu1  ;;  %vm2847_vm12 = vcmp.gt.f32.partialorder %v2834_v10, 0.0 }
 0xc22   :  { %v4192_v25 = vpop.f32.mrb[35].mxu1 }
 0xc23   :  { %v1100_v25 = vld [vmem:[%s5881_s17 + $0x18] sm:$0xff] }
 0xc24   :  { %v4776_v56 = vpop.eup %4775  ;;  %v5607_v9 = vpack.c.bf16 %v1100_v25, %v1099_v23 }
 0xc25   :  { %v4778_v26 = vpop.eup %4777  ;;  %v2534_v19 = vadd.f32 1.0, %v4776_v56  ;;  %v5565_v53 = vpop.f32.mrb[36].mxu1  ;;  %v2850_v56 = vmul.f32 0.01, %v2834_v10 }
 0xc26   :  { %v2540_v21 = vadd.f32 1.0, %v4778_v26  ;;  %v4195_v27 = vpop.f32.mrb[37].mxu1  ;;  %v4780_v28 = vpop.eup %4779  ;;  %v2839_v26 = vadd.f32 %v5578_v5, %v2838_v22 }
 0xc27   :  { %4783 = vrcp.f32 %v2534_v19  ;;  %v4782_v31 = vpop.eup %4781  ;;  %v2547_v51 = vadd.f32 1.0, %v4780_v28  ;;  %v2853_v19 = vsel %vm2847_vm12, %v2834_v10, %v2850_v56  ;;  %v2844_v27 = vadd.f32 %v5578_v5, %v5565_v53 }
 0xc28   :  { %4785 = vrcp.f32 %v2540_v21  ;;  %v2851_v21 = vmul.f32 0.01, %v2839_v26  ;;  %vm2848_vm13 = vcmp.gt.f32.partialorder %v2839_v26, 0.0  ;;  %v2856_v22 = vadd.f32 %v2853_v19, %v5524_v20 }
 0xc29   :  { %4787 = vrcp.f32 %v2547_v51  ;;  %vm2849_vm14 = vcmp.gt.f32.partialorder %v2844_v27, 0.0 }
 0xc2a   :  { %v2854_v28 = vsel %vm2848_vm13, %v2839_v26, %v2851_v21 }
 0xc31   :  { %v4784_v29 = vpop.eup %4783 }
 0xc32   :  { %v4786_v30 = vpop.eup %4785  ;;  %v2551_v33 = vmul.f32 %v4784_v29, %v4782_v31  ;;  %v2852_v31 = vmul.f32 0.01, %v2844_v27  ;;  %v2857_v29 = vadd.f32 %v2854_v28, %v5530_v14  ;;  %v1091_v14 = vld [vmem:[%s5878_s14] sm:$0xf] }
 0xc33   :  { %v2550_v34 = vmul.f32 %v4786_v30, %v5496_v4  ;;  %v1069_v4 = vld [vmem:[#allocation8 + $0x50] sm:$0xff]  ;;  %v4788_v55 = vpop.eup %4787  ;;  %v5636_v30 = vrot.slane %v1091_v14, %v727_v16  ;;  %v5646_v42 = vrot.slane %v1091_v14, %v739_v24  ;;  %v5650_v45 = vrot.slane %v1091_v14, %v735_v32 }
 0xc34   :  { %v1085_v63 = vadd.f32 %v1069_v4, %v1053_v48  ;;  %v2855_v53 = vsel %vm2849_vm14, %v2844_v27, %v2852_v31  ;;  %v3130_v27 = vld [vmem:[#allocation3 + $0x20] sm:$0xff] }
 0xc35   :  { %v5568_v36 = vadd.f32 %v2551_v33, %v2550_v34  ;;  %v2858_v20 = vadd.f32 %v2855_v53, %v5536_v17  ;;  %v5640_v33 = vrot.slane %v1091_v14, %v731_v18 }
 0xc36   :  { %v5583_v6 = vpack.c.bf16 %v1089_v0, %v1085_v63 }
 0xc37   :  { %4789 = vtanh.f32 %v5568_v36 }
 0xc41   :  { %v4790_v59 = vpop.eup %4789 }
 0xc42   :  { %v2554_v3 = vmul.f32 %v4790_v59, %v4788_v55 }
 0xc44   :  { %2556 = vst.msk [vmem:[#allocation3 + $0x38] sm:$0xff] %vm410_vm2, %v2554_v3  ;;  %3986 = vmatmul.mubr.msk.f32.vlgmr.msra.gmra.mrb[24].mxu0 %vm410_vm2, %v2554_v3 }
 0xc45   :  { %4486 = vmatpush1.bf16.msra.mxu0 %v5571_v62  ;;  %2716 = vmatprep.mubr.f32.mxu0 %v4914_v52 }
 0xc46   :  { %4488 = vmatprep.subr.bf16.mxu0 %v5573_v1 }
 0xc49   :  { %4490 = vmatpush1.bf16.msra.mxu0 %v5583_v6 }
 0xc4a   :  { %4497 = vmatprep.subr.bf16.mxu0 %v4915_v43 }
 0xc4c   :  { %3987 = vmatmul.mubr.msk.f32.vlgmr.msra.gmra.mrb[26].mxu0 %vm410_vm2, %v2554_v3 }
 0xc4d   :  { %4499 = vmatpush3.bf16.msra.mxu0 %v5595_v13  ;;  %4204 = vmatprep.mubr.msk.f32.mxu0 %vm4916_vm11, %v4914_v52 }
 0xc4e   :  { %4500 = vmatprep.subr.bf16.mxu0 %v4915_v43 }
 0xc51   :  { %4502 = vmatpush3.bf16.msra.mxu0 %v5607_v9 }
 0xc52   :  { %4512 = vmatprep.subr.bf16.mxu0 %v5555_v2 }
 0xc54   :  { %4205 = vmatmul.mubr.msk.f32.vlgmr.msra.gmra.mrb[28].mxu0 %vm410_vm2, %v2856_v22 }
 0xc55   :  { %4207 = vmatprep.mubr.msk.f32.mxu0 %vm4916_vm11, %v4914_v52  ;;  %4514 = vmatpush1.bf16.msra.mxu0 %v5571_v62 }
 0xc56   :  { %4516 = vmatprep.subr.bf16.mxu0 %v5573_v1 }
 0xc58   :  { %4208 = vmatmul.mubr.msk.f32.gmra.mrb[30].mxu0 %vm410_vm2, %v2857_v29 }
 0xc59   :  { %4210 = vmatprep.mubr.msk.f32.mxu0 %vm4916_vm11, %v4914_v52  ;;  %4518 = vmatpush1.bf16.msra.mxu0 %v5583_v6 }
 0xc5a   :  { %4525 = vmatprep.subr.bf16.mxu0 %v4915_v43 }
 0xc5c   :  { %4211 = vmatmul.mubr.msk.f32.gmra.mrb[32].mxu0 %vm410_vm2, %v2858_v20 }
 0xc5d   :  { %3096 = vmatprep.mubr.f32.mxu0 %v4914_v52 }
 0xd17   :  { %v2647_v51 = vpop.f32.mrb[24].mxu0 }
 0xd18   :  { %v2648_v17 = vadd.f32 %v2647_v51, %v5636_v30  ;;  %v2649_v34 = vpop.f32.mrb[25].mxu0 }
 0xd19   :  { %v2650_v37 = vadd.f32 %v2649_v34, %v5640_v33 }
 0xd1a   :  { %v3988_v38 = vmul.f32 -1.442695, %v2648_v17 }
 0xd1b   :  { %v3989_v40 = vmul.f32 -1.442695, %v2650_v37 }
 0xd1c   :  { %4791 = vpow2.f32 %v3988_v38 }
 0xd1d   :  { %4793 = vpow2.f32 %v3989_v40 }
 0xd1f   :  { %v2718_v16 = vpop.f32.mrb[26].mxu0 }
 0xd20   :  { %v2720_v18 = vpop.f32.mrb[27].mxu0  ;;  %v2719_v35 = vadd.f32 %v2718_v16, %v5650_v45 }
 0xd21   :  { %v2721_v46 = vadd.f32 %v2720_v18, %v5646_v42 }
 0xd23   :  { %v3990_v44 = vmul.f32 -1.442695, %v2721_v46 }
 0xd25   :  { %4795 = vpow2.f32 %v3990_v44 }
 0xd26   :  { %v4792_v39 = vpop.eup %4791  ;;  %4797 = vtanh.f32 %v2719_v35 }
 0xd27   :  { %v4794_v48 = vpop.eup %4793  ;;  %v2726_v24 = vadd.f32 1.0, %v4792_v39  ;;  %v2940_v58 = vpop.f32.mrb[28].mxu0 }
 0xd28   :  { %v2732_v15 = vadd.f32 1.0, %v4794_v48  ;;  %v2941_v32 = vadd.f32 %v5657_v57, %v2940_v58  ;;  %v4206_v49 = vpop.f32.mrb[29].mxu0 }
 0xd29   :  { %4799 = vrcp.f32 %v2726_v24 }
 0xd2a   :  { %4801 = vrcp.f32 %v2732_v15  ;;  %2955 = vst.msk [vmem:[%s5883_s19] sm:$0xff] %vm2954_vm15, %v2941_v32 }
 0xd2b   :  { %v2945_v50 = vpop.f32.mrb[30].mxu0 }
 0xd2c   :  { %v2946_v4 = vadd.f32 %v5657_v57, %v2945_v50  ;;  %v4209_v54 = vpop.f32.mrb[31].mxu0 }
 0xd2e   :  { %2956 = vst.msk [vmem:[%s5883_s19 + $0x8] sm:$0xff] %vm2954_vm15, %v2946_v4 }
 0xd2f   :  { %v2950_v55 = vpop.f32.mrb[32].mxu0  ;;  %v4796_v0 = vpop.eup %4795 }
 0xd30   :  { %v2951_v59 = vadd.f32 %v5657_v57, %v2950_v55  ;;  %v4212_v63 = vpop.f32.mrb[33].mxu0  ;;  %v4798_v3 = vpop.eup %4797  ;;  %v2739_v23 = vadd.f32 1.0, %v4796_v0 }
 0xd32   :  { %2957 = vst.msk [vmem:[%s5883_s19 + $0x10] sm:$0xff] %vm2954_vm15, %v2951_v59  ;;  %4803 = vrcp.f32 %v2739_v23 }
 0xd33   :  { %v4800_v7 = vpop.eup %4799 }
 0xd34   :  { %v4802_v8 = vpop.eup %4801  ;;  %v2743_v10 = vmul.f32 %v4800_v7, %v4798_v3 }
 0xd35   :  { %v2742_v25 = vmul.f32 %v4802_v8, %v5568_v36  ;;  %v3129_v36 = vld [vmem:[#allocation3 + $0x18] sm:$0xff] }
 0xd37   :  { %v5675_v56 = vadd.f32 %v2743_v10, %v2742_v25  ;;  %v5753_v25 = vld [vmem:[#allocation3 + $0x30] sm:$0xff] }
 0xd39   :  { %4805 = vtanh.f32 %v5675_v56 }
 0xd3c   :  { %v4804_v26 = vpop.eup %4803 }
 0xd43   :  { %v4806_v19 = vpop.eup %4805 }
 0xd44   :  { %v2746_v21 = vmul.f32 %v4806_v19, %v4804_v26 }
 0xd46   :  { %2748 = vst.msk [vmem:[#allocation3 + $0x40] sm:$0xff] %vm410_vm2, %v2746_v21  ;;  %3999 = vmatmul.mubr.msk.f32.vlgmr.msra.gmra.mrb[38].mxu1 %vm410_vm2, %v2746_v21  ;;  %4000 = vmatmul.mubr.msk.f32.vlgmr.msra.gmra.mrb[34].mxu0 %vm410_vm2, %v2746_v21 }
 0xd47   :  { %4521 = vmatpush3.bf16.msra.mxu1 %v5505_v12  ;;  %4221 = vmatprep.mubr.msk.f32.mxu1 %vm4916_vm11, %v4914_v52 }
 0xd48   :  { %4522 = vmatprep.subr.bf16.mxu1 %v4915_v43  ;;  %4527 = vmatpush3.bf16.msra.mxu0 %v5595_v13 }
 0xd49   :  { %4528 = vmatprep.subr.bf16.mxu0 %v4915_v43  ;;  %4238 = vmatprep.mubr.msk.f32.mxu0 %vm4916_vm11, %v4914_v52 }
 0xd4b   :  { %4524 = vmatpush3.bf16.msra.mxu1 %v5517_v11 }
 0xd4c   :  { %4530 = vmatpush3.bf16.msra.mxu0 %v5607_v9  ;;  %4532 = vmatprep.subr.bf16.mxu1 %v5541_v41  ;;  %v5703_v41 = vld [vmem:[#allocation3 + $0x28] sm:$0xff] }
 0xd4d   :  { %4540 = vmatprep.subr.bf16.mxu0 %v5555_v2 }
 0xd4e   :  { %4222 = vmatmul.mubr.msk.f32.vlgmr.msra.gmra.mrb[40].mxu1 %vm410_vm2, %v3129_v36 }
 0xd4f   :  { %4224 = vmatprep.mubr.msk.f32.mxu1 %vm4916_vm11, %v4914_v52  ;;  %4534 = vmatpush1.bf16.msra.mxu1 %v5543_v47 }
 0xd50   :  { %4536 = vmatprep.subr.bf16.mxu1 %v5546_v60 }
 0xd52   :  { %4225 = vmatmul.mubr.msk.f32.gmra.mrb[42].mxu1 %vm410_vm2, %v3130_v27 }
 0xd53   :  { %4227 = vmatprep.mubr.msk.f32.mxu1 %vm4916_vm11, %v4914_v52  ;;  %4538 = vmatpush1.bf16.msra.mxu1 %v5552_v61 }
 0xd54   :  { %4547 = vmatprep.subr.bf16.mxu1 %v4915_v43 }
 0xd56   :  { %4228 = vmatmul.mubr.msk.f32.gmra.mrb[44].mxu1 %vm410_vm2, %v5703_v41 }
 0xd57   :  { %3393 = vmatprep.mubr.f32.mxu1 %v4914_v52 }
 0xe19   :  { %v3027_v47 = vpop.f32.mrb[38].mxu1  ;;  %v3098_v2 = vpop.f32.mrb[34].mxu0 }
 0xe1a   :  { %v3028_v60 = vadd.f32 %v3027_v47, %v5636_v30  ;;  %v3029_v22 = vpop.f32.mrb[39].mxu1  ;;  %v3100_v28 = vpop.f32.mrb[35].mxu0  ;;  %v3099_v38 = vadd.f32 %v3098_v2, %v5650_v45 }
 0xe1b   :  { %v3030_v31 = vadd.f32 %v3029_v22, %v5640_v33  ;;  %v3101_v61 = vadd.f32 %v3100_v28, %v5646_v42 }
 0xe1c   :  { %v4001_v29 = vmul.f32 -1.442695, %v3028_v60 }
 0xe1d   :  { %v4002_v53 = vmul.f32 -1.442695, %v3030_v31  ;;  %v4003_v34 = vmul.f32 -1.442695, %v3101_v61 }
 0xe1e   :  { %4807 = vpow2.f32 %v4001_v29 }
 0xe1f   :  { %4809 = vpow2.f32 %v4002_v53 }
 0xe20   :  { %4811 = vpow2.f32 %v4003_v34 }
 0xe21   :  { %v3207_v20 = vpop.f32.mrb[40].mxu1  ;;  %4813 = vtanh.f32 %v3099_v38 }
 0xe22   :  { %v3208_v14 = vadd.f32 %v5578_v5, %v3207_v20  ;;  %v4223_v51 = vpop.f32.mrb[41].mxu1 }
 0xe24   :  { %vm3221_vm0 = vcmp.gt.f32.partialorder %v3208_v14, 0.0  ;;  %v3224_v17 = vmul.f32 0.01, %v3208_v14 }
 0xe25   :  { %v3212_v37 = vpop.f32.mrb[42].mxu1 }
 0xe26   :  { %v3227_v40 = vsel %vm3221_vm0, %v3208_v14, %v3224_v17  ;;  %v3213_v16 = vadd.f32 %v5578_v5, %v3212_v37  ;;  %v4226_v18 = vpop.f32.mrb[43].mxu1 }
 0xe27   :  { %v3230_v46 = vadd.f32 %v3227_v40, %v3129_v36 }
 0xe28   :  { %v4808_v44 = vpop.eup %4807  ;;  %vm3222_vm1 = vcmp.gt.f32.partialorder %v3213_v16, 0.0  ;;  %v3225_v35 = vmul.f32 0.01, %v3213_v16 }
 0xe29   :  { %v4810_v39 = vpop.eup %4809  ;;  %v3106_v48 = vadd.f32 1.0, %v4808_v44  ;;  %v3217_v24 = vpop.f32.mrb[44].mxu1  ;;  %4239 = vmatmul.mubr.msk.f32.vlgmr.msra.gmra.mrb[36].mxu0 %vm410_vm2, %v3230_v46 }
 0xe2a   :  { %v3112_v58 = vadd.f32 1.0, %v4810_v39  ;;  %v3228_v15 = vsel %vm3222_vm1, %v3213_v16, %v3225_v35  ;;  %v3218_v32 = vadd.f32 %v5578_v5, %v3217_v24  ;;  %v4229_v49 = vpop.f32.mrb[45].mxu1  ;;  %4241 = vmatprep.mubr.msk.f32.mxu0 %vm4916_vm11, %v4914_v52  ;;  %4542 = vmatpush1.bf16.msra.mxu0 %v5571_v62  ;;  %v4812_v62 = vpop.eup %4811 }
 0xe2b   :  { %4815 = vrcp.f32 %v3106_v48  ;;  %v3231_v50 = vadd.f32 %v3228_v15, %v3130_v27  ;;  %4544 = vmatprep.subr.bf16.mxu0 %v5573_v1  ;;  %v4814_v1 = vpop.eup %4813  ;;  %v3119_v3 = vadd.f32 1.0, %v4812_v62 }
 0xe2c   :  { %4817 = vrcp.f32 %v3112_v58  ;;  %vm3223_vm3 = vcmp.gt.f32.partialorder %v3218_v32, 0.0  ;;  %v3226_v4 = vmul.f32 0.01, %v3218_v32 }
 0xe2d   :  { %4242 = vmatmul.mubr.msk.f32.gmra.mrb[38].mxu0 %vm410_vm2, %v3231_v50  ;;  %4819 = vrcp.f32 %v3119_v3 }
 0xe2e   :  { %v3229_v54 = vsel %vm3223_vm3, %v3218_v32, %v3226_v4  ;;  %4244 = vmatprep.mubr.msk.f32.mxu0 %vm4916_vm11, %v4914_v52  ;;  %4546 = vmatpush1.bf16.msra.mxu0 %v5583_v6 }
 0xe2f   :  { %v3232_v55 = vadd.f32 %v3229_v54, %v5703_v41  ;;  %4553 = vmatprep.subr.bf16.mxu0 %v4915_v43 }
 0xe31   :  { %4245 = vmatmul.mubr.msk.f32.gmra.mrb[40].mxu0 %vm410_vm2, %v3232_v55 }
 0xe32   :  { %3464 = vmatprep.mubr.f32.mxu0 %v4914_v52 }
 0xe35   :  { %v4816_v59 = vpop.eup %4815 }
 0xe36   :  { %v4818_v63 = vpop.eup %4817  ;;  %v3123_v0 = vmul.f32 %v4816_v59, %v4814_v1 }
 0xe37   :  { %v3122_v7 = vmul.f32 %v4818_v63, %v5675_v56  ;;  %v4820_v6 = vpop.eup %4819  ;;  %v5761_v56 = vld [vmem:[#allocation3 + $0x38] sm:$0xff] }
 0xe39   :  { %v5729_v8 = vadd.f32 %v3123_v0, %v3122_v7 }
 0xe3b   :  { %4821 = vtanh.f32 %v5729_v8 }
 0xe45   :  { %v4822_v10 = vpop.eup %4821 }
 0xe46   :  { %v3126_v23 = vmul.f32 %v4822_v10, %v4820_v6 }
 0xe48   :  { %3128 = vst.msk [vmem:[#allocation3 + $0x48] sm:$0xff] %vm410_vm2, %v3126_v23  ;;  %4013 = vmatmul.mubr.msk.f32.vlgmr.msra.gmra.mrb[46].mxu1 %vm410_vm2, %v3126_v23  ;;  %4014 = vmatmul.mubr.msk.f32.vlgmr.msra.gmra.mrb[42].mxu0 %vm410_vm2, %v3126_v23 }
 0xe49   :  { %4549 = vmatpush3.bf16.msra.mxu1 %v5505_v12  ;;  %4255 = vmatprep.mubr.msk.f32.mxu1 %vm4916_vm11, %v4914_v52 }
 0xe4a   :  { %4550 = vmatprep.subr.bf16.mxu1 %v4915_v43  ;;  %4555 = vmatpush3.bf16.msra.mxu0 %v5595_v13 }
 0xe4b   :  { %4556 = vmatprep.subr.bf16.mxu0 %v4915_v43  ;;  %4272 = vmatprep.mubr.msk.f32.mxu0 %vm4916_vm11, %v4914_v52 }
 0xe4d   :  { %4552 = vmatpush3.bf16.msra.mxu1 %v5517_v11 }
 0xe4e   :  { %4559 = vmatprep.subr.bf16.mxu1 %v4915_v43  ;;  %4558 = vmatpush3.bf16.msra.mxu0 %v5607_v9 }
 0xe4f   :  { %4565 = vmatprep.subr.bf16.mxu0 %v4915_v43 }
 0xe50   :  { %4256 = vmatmul.mubr.msk.f32.vlgmr.msra.gmra.mrb[48].mxu1 %vm410_vm2, %v5703_v41 }
 0xe51   :  { %4258 = vmatprep.mubr.msk.f32.mxu1 %vm4916_vm11, %v4914_v52  ;;  %4561 = vmatpush3.bf16.msra.mxu1 %v5505_v12  ;;  %v5767_v12 = vld [vmem:[#allocation3 + $0x40] sm:$0xff] }
 0xe52   :  { %4562 = vmatprep.subr.bf16.mxu1 %v4915_v43 }
 0xe54   :  { %4259 = vmatmul.mubr.msk.f32.gmra.mrb[50].mxu1 %vm410_vm2, %v5753_v25 }
 0xe55   :  { %4261 = vmatprep.mubr.msk.f32.mxu1 %vm4916_vm11, %v4914_v52  ;;  %4564 = vmatpush3.bf16.msra.mxu1 %v5517_v11  ;;  %v5775_v11 = vld [vmem:[#allocation3 + $0x48] sm:$0xff] }
 0xe56   :  { %4571 = vmatprep.subr.bf16.mxu1 %v4915_v43 }
 0xe58   :  { %4262 = vmatmul.mubr.msk.f32.gmra.mrb[52].mxu1 %vm410_vm2, %v5761_v56 }
 0xe59   :  { %4289 = vmatprep.mubr.msk.f32.mxu1 %vm4916_vm11, %v4914_v52 }
 0xe5c   :  { %4290 = vmatmul.mubr.msk.f32.vlgmr.msra.gmra.mrb[54].mxu1 %vm410_vm2, %v5767_v12 }
 0xe5d   :  { %4292 = vmatprep.mubr.msk.f32.mxu1 %vm4916_vm11, %v4914_v52  ;;  %4573 = vmatpush3.bf16.msra.mxu1 %v5595_v13 }
 0xe5e   :  { %4572 = vmatprep.subr.bf16.mxu1 %v4915_v43 }
 0xe60   :  { %4293 = vmatmul.mubr.msk.f32.gmra.mrb[56].mxu1 %vm410_vm2, %v5775_v11 }
 0xe61   :  { %4295 = vmatprep.mubr.msk.f32.mxu1 %vm4916_vm11, %v4914_v52  ;;  %4574 = vmatpush3.bf16.msra.mxu1 %v5607_v9 }
 0xefc   :  { %v3308_v26 = vpop.f32.mrb[36].mxu0 }
 0xefd   :  { %v3309_v19 = vadd.f32 %v5657_v57, %v3308_v26  ;;  %v4240_v21 = vpop.f32.mrb[37].mxu0 }
 0xeff   :  { %4010 = vst.msk [vmem:[%s5883_s19 + $0x18] sm:$0xff] %vm2954_vm15, %v3309_v19 }
 0xf00   :  { %v3313_v36 = vpop.f32.mrb[38].mxu0 }
 0xf01   :  { %v3314_v27 = vadd.f32 %v5657_v57, %v3313_v36  ;;  %v4243_v47 = vpop.f32.mrb[39].mxu0 }
 0xf03   :  { %4011 = vst.msk [vmem:[%s5883_s19 + $0x20] sm:$0xff] %vm2954_vm15, %v3314_v27 }
 0xf04   :  { %v3318_v2 = vpop.f32.mrb[40].mxu0 }
 0xf05   :  { %v3319_v60 = vadd.f32 %v5657_v57, %v3318_v2  ;;  %v4246_v22 = vpop.f32.mrb[41].mxu0 }
 0xf07   :  { %4012 = vst.msk [vmem:[%s5883_s19 + $0x28] sm:$0xff] %vm2954_vm15, %v3319_v60 }
 0xf1b   :  { %v3395_v28 = vpop.f32.mrb[46].mxu1  ;;  %v3466_v31 = vpop.f32.mrb[42].mxu0 }
 0xf1c   :  { %v3396_v29 = vadd.f32 %v3395_v28, %v5636_v30  ;;  %v3397_v53 = vpop.f32.mrb[47].mxu1  ;;  %v3468_v61 = vpop.f32.mrb[43].mxu0  ;;  %v3467_v30 = vadd.f32 %v3466_v31, %v5650_v45 }
 0xf1d   :  { %v3398_v20 = vadd.f32 %v3397_v53, %v5640_v33  ;;  %v3469_v17 = vadd.f32 %v3468_v61, %v5646_v42 }
 0xf1e   :  { %v4015_v14 = vmul.f32 -1.442695, %v3396_v29 }
 0xf1f   :  { %v4016_v51 = vmul.f32 -1.442695, %v3398_v20  ;;  %v4017_v16 = vmul.f32 -1.442695, %v3469_v17 }
 0xf20   :  { %4823 = vpow2.f32 %v4015_v14 }
 0xf21   :  { %4825 = vpow2.f32 %v4016_v51 }
 0xf22   :  { %4827 = vpow2.f32 %v4017_v16 }
 0xf23   :  { %v3575_v34 = vpop.f32.mrb[48].mxu1  ;;  %4829 = vtanh.f32 %v3467_v30 }
 0xf24   :  { %v3576_v37 = vadd.f32 %v5578_v5, %v3575_v34  ;;  %v4257_v38 = vpop.f32.mrb[49].mxu1 }
 0xf26   :  { %vm3589_vm4 = vcmp.gt.f32.partialorder %v3576_v37, 0.0  ;;  %v3592_v40 = vmul.f32 0.01, %v3576_v37 }
 0xf27   :  { %v3580_v18 = vpop.f32.mrb[50].mxu1 }
 0xf28   :  { %v3595_v46 = vsel %vm3589_vm4, %v3576_v37, %v3592_v40  ;;  %v3581_v44 = vadd.f32 %v5578_v5, %v3580_v18  ;;  %v4260_v33 = vpop.f32.mrb[51].mxu1 }
 0xf29   :  { %v3598_v35 = vadd.f32 %v3595_v46, %v5703_v41 }
 0xf2a   :  { %v4824_v39 = vpop.eup %4823  ;;  %vm3590_vm5 = vcmp.gt.f32.partialorder %v3581_v44, 0.0  ;;  %v3593_v48 = vmul.f32 0.01, %v3581_v44 }
 0xf2b   :  { %v4826_v42 = vpop.eup %4825  ;;  %v3474_v24 = vadd.f32 1.0, %v4824_v39  ;;  %v3585_v58 = vpop.f32.mrb[52].mxu1  ;;  %4273 = vmatmul.mubr.msk.f32.vlgmr.msra.gmra.mrb[44].mxu0 %vm410_vm2, %v3598_v35 }
 0xf2c   :  { %v3480_v15 = vadd.f32 1.0, %v4826_v42  ;;  %v3596_v32 = vsel %vm3590_vm5, %v3581_v44, %v3593_v48  ;;  %v3586_v45 = vadd.f32 %v5578_v5, %v3585_v58  ;;  %v4263_v49 = vpop.f32.mrb[53].mxu1  ;;  %4275 = vmatprep.mubr.msk.f32.mxu0 %vm4916_vm11, %v4914_v52  ;;  %4567 = vmatpush3.bf16.msra.mxu0 %v5595_v13  ;;  %v4828_v3 = vpop.eup %4827 }
 0xf2d   :  { %4831 = vrcp.f32 %v3474_v24  ;;  %v3599_v41 = vadd.f32 %v3596_v32, %v5753_v25  ;;  %4568 = vmatprep.subr.bf16.mxu0 %v4915_v43  ;;  %v4830_v6 = vpop.eup %4829 }
 0xf2e   :  { %4833 = vrcp.f32 %v3480_v15  ;;  %vm3591_vm6 = vcmp.gt.f32.partialorder %v3586_v45, 0.0  ;;  %v3594_v50 = vmul.f32 0.01, %v3586_v45 }
 0xf2f   :  { %4276 = vmatmul.mubr.msk.f32.gmra.mrb[46].mxu0 %vm410_vm2, %v3599_v41  ;;  %v3772_v4 = vpop.f32.mrb[54].mxu1 }
 0xf30   :  { %v3597_v54 = vsel %vm3591_vm6, %v3586_v45, %v3594_v50  ;;  %v3773_v55 = vadd.f32 %v5578_v5, %v3772_v4  ;;  %v4291_v62 = vpop.f32.mrb[55].mxu1  ;;  %4278 = vmatprep.mubr.msk.f32.mxu0 %vm4916_vm11, %v4914_v52  ;;  %4570 = vmatpush3.bf16.msra.mxu0 %v5607_v9 }
 0xf31   :  { %v3600_v13 = vadd.f32 %v3597_v54, %v5761_v56  ;;  %v3487_v56 = vadd.f32 1.0, %v4828_v3 }
 0xf32   :  { %vm3786_vm7 = vcmp.gt.f32.partialorder %v3773_v55, 0.0  ;;  %v3789_v1 = vmul.f32 0.01, %v3773_v55 }
 0xf33   :  { %4279 = vmatmul.mubr.msk.f32.gmra.mrb[48].mxu0 %vm410_vm2, %v3600_v13  ;;  %v3777_v43 = vpop.f32.mrb[56].mxu1  ;;  %4835 = vrcp.f32 %v3487_v56 }
 0xf34   :  { %v3792_v59 = vsel %vm3786_vm7, %v3773_v55, %v3789_v1  ;;  %v3778_v63 = vadd.f32 %v5578_v5, %v3777_v43  ;;  %v4294_v0 = vpop.f32.mrb[57].mxu1  ;;  %4306 = vmatprep.mubr.msk.f32.mxu0 %vm4916_vm11, %v4914_v52 }
 0xf35   :  { %v3795_v7 = vadd.f32 %v3792_v59, %v5767_v12 }
 0xf36   :  { %vm3787_vm8 = vcmp.gt.f32.partialorder %v3778_v63, 0.0  ;;  %v3790_v9 = vmul.f32 0.01, %v3778_v63 }
 0xf37   :  { %v4832_v10 = vpop.eup %4831  ;;  %4307 = vmatmul.mubr.msk.f32.vlgmr.msra.gmra.mrb[50].mxu0 %vm410_vm2, %v3795_v7 }
 0xf38   :  { %v4834_v23 = vpop.eup %4833  ;;  %v3491_v25 = vmul.f32 %v4832_v10, %v4830_v6  ;;  %v3793_v26 = vsel %vm3787_vm8, %v3778_v63, %v3790_v9  ;;  %4309 = vmatprep.mubr.msk.f32.mxu0 %vm4916_vm11, %v4914_v52 }
 0xf39   :  { %v3490_v19 = vmul.f32 %v4834_v23, %v5729_v8  ;;  %v3796_v21 = vadd.f32 %v3793_v26, %v5775_v11 }
 0xf3b   :  { %v3492_v36 = vadd.f32 %v3491_v25, %v3490_v19  ;;  %4310 = vmatmul.mubr.msk.f32.gmra.mrb[52].mxu0 %vm410_vm2, %v3796_v21 }
 0xf3d   :  { %4837 = vtanh.f32 %v3492_v36  ;;  %v4836_v12 = vpop.eup %4835 }
 0xf47   :  { %v4838_v27 = vpop.eup %4837 }
 0xf48   :  { %v3494_v47 = vmul.f32 %v4838_v27, %v4836_v12 }
 0xf4a   :  { %3496 = vst.msk [vmem:[#allocation3 + $0x50] sm:$0xff] %vm410_vm2, %v3494_v47 }
 0xf51   :  { %v3696_v2 = vld [vmem:[#allocation3 + $0x50] sm:$0xff] }
 0xf52   :  { %4296 = vmatmul.mubr.msk.f32.gmra.mrb[58].mxu1 %vm410_vm2, %v3696_v2 }
 0xf53   :  { %4312 = vmatprep.mubr.msk.f32.mxu1 %vm4916_vm11, %v4914_v52 }
 0xffe   :  { %v3676_v60 = vpop.f32.mrb[44].mxu0 }
 0xfff   :  { %v3677_v8 = vadd.f32 %v5657_v57, %v3676_v60  ;;  %v4274_v11 = vpop.f32.mrb[45].mxu0 }
0x1001   :  { %4024 = vst.msk [vmem:[%s5883_s19 + $0x28] sm:$0xff] %vm2954_vm15, %v3677_v8 }
0x1002   :  { %v3681_v22 = vpop.f32.mrb[46].mxu0 }
0x1003   :  { %v3682_v28 = vadd.f32 %v5657_v57, %v3681_v22  ;;  %v4277_v31 = vpop.f32.mrb[47].mxu0 }
0x1005   :  { %4025 = vst.msk [vmem:[%s5883_s19 + $0x30] sm:$0xff] %vm2954_vm15, %v3682_v28 }
0x1006   :  { %v3686_v29 = vpop.f32.mrb[48].mxu0 }
0x1007   :  { %v3687_v52 = vadd.f32 %v5657_v57, %v3686_v29  ;;  %v4280_v53 = vpop.f32.mrb[49].mxu0 }
0x1009   :  { %4026 = vst.msk [vmem:[%s5883_s19 + $0x38] sm:$0xff] %vm2954_vm15, %v3687_v52 }
0x100a   :  { %v3873_v61 = vpop.f32.mrb[50].mxu0 }
0x100b   :  { %v3874_v20 = vadd.f32 %v5657_v57, %v3873_v61  ;;  %v4308_v14 = vpop.f32.mrb[51].mxu0 }
0x100d   :  { %3887 = vst.msk [vmem:[%s5883_s19 + $0x40] sm:$0xff] %vm2954_vm15, %v3874_v20 }
0x100e   :  { %v3878_v51 = vpop.f32.mrb[52].mxu0 }
0x100f   :  { %v3879_v17 = vadd.f32 %v5657_v57, %v3878_v51  ;;  %v4311_v34 = vpop.f32.mrb[53].mxu0 }
0x1011   :  { %3888 = vst.msk [vmem:[%s5883_s19 + $0x48] sm:$0xff] %vm2954_vm15, %v3879_v17 }
0x1025   :  { %v3782_v37 = vpop.f32.mrb[58].mxu1 }
0x1026   :  { %v3783_v38 = vadd.f32 %v5578_v5, %v3782_v37  ;;  %v4297_v40 = vpop.f32.mrb[59].mxu1 }
0x1028   :  { %vm3788_vm9 = vcmp.gt.f32.partialorder %v3783_v38, 0.0  ;;  %v3791_v16 = vmul.f32 0.01, %v3783_v38 }
0x102a   :  { %v3794_v18 = vsel %vm3788_vm9, %v3783_v38, %v3791_v16 }
0x102b   :  { %v3797_v30 = vadd.f32 %v3794_v18, %v3696_v2 }
0x102d   :  { %4313 = vmatmul.mubr.msk.f32.vlgmr.msra.gmra.mrb[60].mxu1 %vm410_vm2, %v3797_v30 }
0x1100   :  { %v3883_v46 = vpop.f32.mrb[60].mxu1 }
0x1101   :  { %v3884_v44 = vadd.f32 %v5657_v57, %v3883_v46  ;;  %v4314_v33 = vpop.f32.mrb[61].mxu1 }
0x1103   :  { %3889 = vst.msk [vmem:[%s5883_s19 + $0x50] sm:$0xff] %vm2954_vm15, %v3884_v44 }
0x1104   :  { %3894 = vsyncpa [#allocation5], 1 }
0x1105   :  { %3895 = vsyncpa [#allocation7], 1 }

</bundles_post_ra>
